<compile_context>
chip_gen: v6e
topology: v6e:2x2x1
jax: 0.10.0
libtpu: 0.0.40
codegen_flags: <defaults>
</compile_context>

<pallas_src>
import jax
import jax.numpy as jnp
from jax.experimental import pallas as pl
from jax.experimental.pallas import tpu as pltpu

N_OUT = 28 * 28          # 784 logical output features
N_OUT_PAD = 896          # 7 * 128 -> lane-dense output stores


def _round_up(x, m):
    return (x + m - 1) // m * m


def decoder_mlp_kernel(x_ref, w1_ref, b1_ref, w2_ref, b2_ref, w3_ref, b3_ref,
                       o_ref):
    """Fused MLP: relu(x@W1+b1) -> relu(.@W2+b2) -> .@W3+b3.

    Inputs/weights are bf16 (MXU-native), accumulation is f32; the ReLU'd
    intermediates are materialized only in bf16.
    """
    x = x_ref[...]                                               # bf16 (tm, d_in_pad)
    h1 = jnp.maximum(
        jnp.dot(x, w1_ref[...], preferred_element_type=jnp.float32)
        + b1_ref[...], 0.0).astype(jnp.bfloat16)
    h2 = jnp.maximum(
        jnp.dot(h1, w2_ref[...], preferred_element_type=jnp.float32)
        + b2_ref[...], 0.0).astype(jnp.bfloat16)
    o_ref[...] = (jnp.dot(h2, w3_ref[...], preferred_element_type=jnp.float32)
                  + b3_ref[...])


def decoder_forward(x, kparams, *, block_m=256):
    """x: (B, num_capsules, in_channels) -> (B, 784) f32.

    block_m: per-tile batch rows. 256 is safe everywhere (v5e 16 MiB scoped
    VMEM); on v6e with large batches block_m=512 halves grid steps.
    """
    w1, b1, w2, b2, w3, b3 = kparams   # bf16 weights (w1 K-padded, w3/b3 lane-padded)
    batch = x.shape[0]
    d_in = x.shape[1] * x.shape[2]
    d_in_pad = w1.shape[0]             # d_in rounded up to a multiple of 128

    # x.view(B, -1), cast to bf16 (MXU input / half the DMA bytes), pad K dim.
    x2d = x.reshape(batch, -1).astype(jnp.bfloat16)
    if d_in_pad != d_in:
        x2d = jnp.pad(x2d, ((0, 0), (0, d_in_pad - d_in)))

    # Batch tile: multiple of 8 sublanes; >=2 tiles when batch > 8 so the
    # "parallel" grid axis can shard across v7x's two TensorCores.
    if batch <= 8:
        tm = _round_up(batch, 8)
    else:
        tm = min(block_m, _round_up((batch + 1) // 2, 8))
    b_pad = _round_up(batch, tm)
    if b_pad != batch:
        x2d = jnp.pad(x2d, ((0, b_pad - batch), (0, 0)))
    grid = (b_pad // tm,)

    # Weights/biases: same block every grid step -> keep resident, single buffer.
    resident = lambda i: (0, 0)
    single = pl.Buffered(1)

    flops = 2 * b_pad * (d_in_pad * w1.shape[1]
                         + w1.shape[1] * w2.shape[1]
                         + w2.shape[1] * w3.shape[1])
    bytes_accessed = (x2d.size * x2d.dtype.itemsize + b_pad * N_OUT_PAD * 4
                      + sum(int(a.size) * a.dtype.itemsize
                            for a in (w1, b1, w2, b2, w3, b3)))

    out = pl.pallas_call(
        decoder_mlp_kernel,
        out_shape=jax.ShapeDtypeStruct((b_pad, N_OUT_PAD), jnp.float32),
        grid=grid,
        in_specs=[
            pl.BlockSpec((tm, d_in_pad), lambda i: (i, 0)),
            pl.BlockSpec(w1.shape, resident, pipeline_mode=single),
            pl.BlockSpec(b1.shape, resident, pipeline_mode=single),
            pl.BlockSpec(w2.shape, resident, pipeline_mode=single),
            pl.BlockSpec(b2.shape, resident, pipeline_mode=single),
            pl.BlockSpec(w3.shape, resident, pipeline_mode=single),
            pl.BlockSpec(b3.shape, resident, pipeline_mode=single),
        ],
        out_specs=pl.BlockSpec((tm, N_OUT_PAD), lambda i: (i, 0)),
        compiler_params=pltpu.CompilerParams(
            dimension_semantics=("parallel",)),
        cost_estimate=pl.CostEstimate(
            flops=flops, transcendentals=0, bytes_accessed=bytes_accessed),
    )(x2d, w1, b1, w2, b2, w3, b3)

    # Crop lane padding (896 -> 784); only crop batch if we actually padded it.
    if b_pad != batch:
        out = out[:batch, :N_OUT]
    else:
        out = out[:, :N_OUT]
    return out


def init_decoder_params(key, num_capsules, in_channels):
    """f32 params mimicking nn.Linear default init (U[-1/sqrt(fan_in), +])."""
    d_in = num_capsules * in_channels
    dims = [(d_in, 512), (512, 1024), (1024, N_OUT)]
    params = []
    for fan_in, fan_out in dims:
        kw, kb, key = jax.random.split(key, 3)
        bound = 1.0 / jnp.sqrt(fan_in)
        w = jax.random.uniform(kw, (fan_in, fan_out), jnp.float32, -bound, bound)
        b = jax.random.uniform(kb, (1, fan_out), jnp.float32, -bound, bound)
        params += [w, b]
    return tuple(params)


def prepare_kernel_params(params_f32):
    """Cast weights to bf16; pad W1 rows (K) to 128 and layer-3 lanes 784->896."""
    w1, b1, w2, b2, w3, b3 = params_f32
    d_in = w1.shape[0]
    d_in_pad = _round_up(d_in, 128)
    w1p = jnp.pad(w1, ((0, d_in_pad - d_in), (0, 0)))
    w3p = jnp.pad(w3, ((0, 0), (0, N_OUT_PAD - N_OUT)))
    b3p = jnp.pad(b3, ((0, 0), (0, N_OUT_PAD - N_OUT)))
    return (w1p.astype(jnp.bfloat16), b1.astype(jnp.float32),
            w2.astype(jnp.bfloat16), b2.astype(jnp.float32),
            w3p.astype(jnp.bfloat16), b3p.astype(jnp.float32))


def decoder_reference_bf16(x, params_f32):
    """Pure-JAX reference with the same bf16-weight / bf16-act / f32-acc math."""
    w1, b1, w2, b2, w3, b3 = params_f32
    h = x.reshape(x.shape[0], -1).astype(jnp.bfloat16)
    h = jnp.maximum(jnp.dot(h, w1.astype(jnp.bfloat16),
                            preferred_element_type=jnp.float32) + b1,
                    0.0).astype(jnp.bfloat16)
    h = jnp.maximum(jnp.dot(h, w2.astype(jnp.bfloat16),
                            preferred_element_type=jnp.float32) + b2,
                    0.0).astype(jnp.bfloat16)
    return jnp.dot(h, w3.astype(jnp.bfloat16),
                   preferred_element_type=jnp.float32) + b3


def decoder_reference_f32(x, params_f32):
    """Full-f32 reference matching the PyTorch module's math exactly."""
    w1, b1, w2, b2, w3, b3 = params_f32
    h = x.reshape(x.shape[0], -1).astype(jnp.float32)
    h = jnp.maximum(jnp.dot(h, w1) + b1, 0.0)
    h = jnp.maximum(jnp.dot(h, w2) + b2, 0.0)
    return jnp.dot(h, w3) + b3


if __name__ == "__main__":
    # Shapes consistent with the module: Decoder(num_points, num_capsules,
    # in_channels, out_channels) -> input x of shape (B, num_capsules, in_channels).
    batch, num_capsules, in_channels = 2, 4, 16

    key = jax.random.PRNGKey(0)
    kx, kp = jax.random.split(key)
    x = jax.random.normal(kx, (batch, num_capsules, in_channels), jnp.float32)
    params_f32 = init_decoder_params(kp, num_capsules, in_channels)
    kparams = prepare_kernel_params(params_f32)

    out = decoder_forward(x, kparams)
    out = jax.block_until_ready(out)
    assert out.shape == (batch, N_OUT), out.shape

    # Tight check against a reference using identical bf16-weight math.
    ref_bf16 = decoder_reference_bf16(x, params_f32)
    assert jnp.allclose(out, ref_bf16, atol=1e-2, rtol=1e-2), \
        "mismatch vs bf16-math reference"
    # Looser check against the true f32 PyTorch-equivalent math (bf16 weights
    # are a deliberate MXU-friendly approximation of the f32 module params).
    ref_f32 = decoder_reference_f32(x, params_f32)
    assert jnp.allclose(out, ref_f32, atol=3e-2, rtol=3e-2), \
        "mismatch vs f32 reference"

    print("KERNEL_OK")
</pallas_src>

<mosaic_0001>
module attributes {stable_mosaic.version = 11 : i64} {
  func.func @decoder_mlp_kernel(%arg0: i32, %arg1: memref<8x128xbf16, #tpu.memory_space<vmem>>, %arg2: memref<128x512xbf16, #tpu.memory_space<vmem>>, %arg3: memref<1x512xf32, #tpu.memory_space<vmem>>, %arg4: memref<512x1024xbf16, #tpu.memory_space<vmem>>, %arg5: memref<1x1024xf32, #tpu.memory_space<vmem>>, %arg6: memref<1024x896xbf16, #tpu.memory_space<vmem>>, %arg7: memref<1x896xf32, #tpu.memory_space<vmem>>, %arg8: memref<8x896xf32, #tpu.memory_space<vmem>>) attributes {dimension_semantics = [#tpu.dimension_semantics<parallel>], iteration_bounds = array<i64: 1>, scalar_prefetch = 0 : i64, scratch_operands = 0 : i64, tpu.core_type = #tpu.core_type<tc>, window_params = [{transform_indices = @transform_0, window_bounds = array<i64: 8, 128>}, {pipeline_mode = #tpu.pipeline_mode<synchronous>, transform_indices = @transform_1, window_bounds = array<i64: 128, 512>}, {pipeline_mode = #tpu.pipeline_mode<synchronous>, transform_indices = @transform_2, window_bounds = array<i64: 1, 512>}, {pipeline_mode = #tpu.pipeline_mode<synchronous>, transform_indices = @transform_3, window_bounds = array<i64: 512, 1024>}, {pipeline_mode = #tpu.pipeline_mode<synchronous>, transform_indices = @transform_4, window_bounds = array<i64: 1, 1024>}, {pipeline_mode = #tpu.pipeline_mode<synchronous>, transform_indices = @transform_5, window_bounds = array<i64: 1024, 896>}, {pipeline_mode = #tpu.pipeline_mode<synchronous>, transform_indices = @transform_6, window_bounds = array<i64: 1, 896>}, {transform_indices = @transform_7, window_bounds = array<i64: 8, 896>}]} {
    %c0 = arith.constant 0 : index
    %c0_0 = arith.constant 0 : index
    %0 = vector.load %arg1[%c0, %c0_0] : memref<8x128xbf16, #tpu.memory_space<vmem>>, vector<8x128xbf16>
    %c0_1 = arith.constant 0 : index
    %c0_2 = arith.constant 0 : index
    %1 = vector.load %arg2[%c0_1, %c0_2] : memref<128x512xbf16, #tpu.memory_space<vmem>>, vector<128x512xbf16>
    %cst = arith.constant dense<0.000000e+00> : vector<8x512xf32>
    %2 = tpu.matmul %0, %1, %cst {dimension_numbers = #tpu.dot_dimension_numbers<[1], [0], [0], [1], [0, 0, 1, 1], [], []>} : vector<8x128xbf16>, vector<128x512xbf16>, vector<8x512xf32> -> vector<8x512xf32>
    %c0_3 = arith.constant 0 : index
    %c0_4 = arith.constant 0 : index
    %3 = vector.load %arg3[%c0_3, %c0_4] : memref<1x512xf32, #tpu.memory_space<vmem>>, vector<1x512xf32>
    %4 = vector.broadcast %3 : vector<1x512xf32> to vector<8x512xf32>
    %5 = arith.addf %2, %4 : vector<8x512xf32>
    %cst_5 = arith.constant 0.000000e+00 : f32
    %6 = vector.broadcast %cst_5 : f32 to vector<8x512xf32>
    %7 = arith.maximumf %5, %6 : vector<8x512xf32>
    %8 = arith.truncf %7 : vector<8x512xf32> to vector<8x512xbf16>
    %c0_6 = arith.constant 0 : index
    %c0_7 = arith.constant 0 : index
    %9 = vector.load %arg4[%c0_6, %c0_7] : memref<512x1024xbf16, #tpu.memory_space<vmem>>, vector<512x1024xbf16>
    %cst_8 = arith.constant dense<0.000000e+00> : vector<8x1024xf32>
    %10 = tpu.matmul %8, %9, %cst_8 {dimension_numbers = #tpu.dot_dimension_numbers<[1], [0], [0], [1], [0, 0, 1, 1], [], []>} : vector<8x512xbf16>, vector<512x1024xbf16>, vector<8x1024xf32> -> vector<8x1024xf32>
    %c0_9 = arith.constant 0 : index
    %c0_10 = arith.constant 0 : index
    %11 = vector.load %arg5[%c0_9, %c0_10] : memref<1x1024xf32, #tpu.memory_space<vmem>>, vector<1x1024xf32>
    %12 = vector.broadcast %11 : vector<1x1024xf32> to vector<8x1024xf32>
    %13 = arith.addf %10, %12 : vector<8x1024xf32>
    %cst_11 = arith.constant 0.000000e+00 : f32
    %14 = vector.broadcast %cst_11 : f32 to vector<8x1024xf32>
    %15 = arith.maximumf %13, %14 : vector<8x1024xf32>
    %16 = arith.truncf %15 : vector<8x1024xf32> to vector<8x1024xbf16>
    %c0_12 = arith.constant 0 : index
    %c0_13 = arith.constant 0 : index
    %17 = vector.load %arg6[%c0_12, %c0_13] : memref<1024x896xbf16, #tpu.memory_space<vmem>>, vector<1024x896xbf16>
    %cst_14 = arith.constant dense<0.000000e+00> : vector<8x896xf32>
    %18 = tpu.matmul %16, %17, %cst_14 {dimension_numbers = #tpu.dot_dimension_numbers<[1], [0], [0], [1], [0, 0, 1, 1], [], []>} : vector<8x1024xbf16>, vector<1024x896xbf16>, vector<8x896xf32> -> vector<8x896xf32>
    %c0_15 = arith.constant 0 : index
    %c0_16 = arith.constant 0 : index
    %19 = vector.load %arg7[%c0_15, %c0_16] : memref<1x896xf32, #tpu.memory_space<vmem>>, vector<1x896xf32>
    %20 = vector.broadcast %19 : vector<1x896xf32> to vector<8x896xf32>
    %21 = arith.addf %18, %20 : vector<8x896xf32>
    %c0_17 = arith.constant 0 : index
    %c0_18 = arith.constant 0 : index
    %22 = vector.load %arg8[%c0_17, %c0_18] : memref<8x896xf32, #tpu.memory_space<vmem>>, vector<8x896xf32>
    tpu.vector_store %arg8[%c0_17, %c0_18], %21 {strides = array<i32>} : memref<8x896xf32, #tpu.memory_space<vmem>>, vector<8x896xf32>,
    return
  }
  func.func @transform_0(%arg0: i32) -> (i32, i32) {
    %c0_i32 = arith.constant 0 : i32
    %c0_i32_0 = arith.constant 0 : i32
    return %arg0, %c0_i32 : i32, i32
  }
  func.func @transform_1(%arg0: i32) -> (i32, i32) {
    %c0_i32 = arith.constant 0 : i32
    %c0_i32_0 = arith.constant 0 : i32
    %c0_i32_1 = arith.constant 0 : i32
    return %c0_i32, %c0_i32_0 : i32, i32
  }
  func.func @transform_2(%arg0: i32) -> (i32, i32) {
    %c0_i32 = arith.constant 0 : i32
    %c0_i32_0 = arith.constant 0 : i32
    %c0_i32_1 = arith.constant 0 : i32
    return %c0_i32, %c0_i32_0 : i32, i32
  }
  func.func @transform_3(%arg0: i32) -> (i32, i32) {
    %c0_i32 = arith.constant 0 : i32
    %c0_i32_0 = arith.constant 0 : i32
    %c0_i32_1 = arith.constant 0 : i32
    return %c0_i32, %c0_i32_0 : i32, i32
  }
  func.func @transform_4(%arg0: i32) -> (i32, i32) {
    %c0_i32 = arith.constant 0 : i32
    %c0_i32_0 = arith.constant 0 : i32
    %c0_i32_1 = arith.constant 0 : i32
    return %c0_i32, %c0_i32_0 : i32, i32
  }
  func.func @transform_5(%arg0: i32) -> (i32, i32) {
    %c0_i32 = arith.constant 0 : i32
    %c0_i32_0 = arith.constant 0 : i32
    %c0_i32_1 = arith.constant 0 : i32
    return %c0_i32, %c0_i32_0 : i32, i32
  }
  func.func @transform_6(%arg0: i32) -> (i32, i32) {
    %c0_i32 = arith.constant 0 : i32
    %c0_i32_0 = arith.constant 0 : i32
    %c0_i32_1 = arith.constant 0 : i32
    return %c0_i32, %c0_i32_0 : i32, i32
  }
  func.func @transform_7(%arg0: i32) -> (i32, i32) {
    %c0_i32 = arith.constant 0 : i32
    %c0_i32_0 = arith.constant 0 : i32
    return %arg0, %c0_i32 : i32, i32
  }
}

</mosaic_0001>

<bundles_post_ra>
// kernel: tpu_custom_call.1
= control target key start
LH: loop header
LB: loop body
LE: loop exit
PB: predicated region body
PF: predicated region fallthrough
CT: control target
= control target key end

     0   :  { %12 = vsyncpa [#allocation3], 0  ;;  %s7815_s0 = inlined_call_operand.hbm [shape: bf16[8,128], index: 0, kind: input, shape index: {}]   ;;  %s7816_s1 = inlined_call_operand.hbm [shape: bf16[128,512], index: 1, kind: input, shape index: {}]   ;;  %s7817_s2 = inlined_call_operand.hbm [shape: f32[1,512], index: 2, kind: input, shape index: {}]   ;;  %s7818_s3 = inlined_call_operand.hbm [shape: bf16[512,1024], index: 3, kind: input, shape index: {}]   ;;  %s7819_s4 = inlined_call_operand.hbm [shape: f32[1,1024], index: 4, kind: input, shape index: {}]   ;;  %s7820_s5 = inlined_call_operand.hbm [shape: bf16[1024,896], index: 5, kind: input, shape index: {}]   ;;  %s7821_s6 = inlined_call_operand.hbm [shape: f32[1,896], index: 6, kind: input, shape index: {}]   ;;  %s7822_s7 = inlined_call_operand.hbm [shape: f32[8,896], index: 7, kind: output, shape index: {}]  }
   0x1   :  { %13 = vsyncpa [#allocation6], 0 }
   0x2   :  { %14 = vsyncpa [#allocation9], 0 }
   0x3   :  { %15 = vsyncpa [#allocation12], 0 }
   0x4   :  { %16 = vsyncpa [#allocation4], 0  ;;  %s7570_s24 = smov [#allocation5]  }
   0x5   :  { %s32_s25 = sshll.u32 %s7570_s24, 4  ;;  %s33_s25 = int_to_ptr.vmem [resolvable:$true] %s32_s25 }
   0x6   :  { %s7408_s26 = scalar_lea.vmem %s33_s25, 4096  ;;  %p7413_p1 = scmp.lt.s32.totalorder %s33_s25, %s33_s25 }
   0x7   :  { %p7409_p0 = scmp.ne.s32.totalorder %s33_s25, %s7408_s26  ;;  %p7414_p2 = scmp.lt.s32.totalorder %s7408_s26, %s7408_s26 }
   0x9   :  { %p7415_p3 = por %p7414_p2, %p7413_p1 }
   0xb   :  { %p7416_p4 = pnand %p7415_p3, %p7409_p0 }
   0xd   :  { %7419 = shalt.err (!%p7416_p4)
}
   0xe   :  { %s7571_s27 = smov 256   ;;  %s7572_s28 = smov 16  }
   0xf   :  { %38 = dma.hbm_to_vmem [thread:$0]  %s7816_s1, 4096, %s33_s25, [#allocation6], %s7571_s27, %s7571_s27, %s7572_s28  }
  0x10   :  { %s7573_s8 = smov [#allocation8]  }
  0x11   :  { %s54_s9 = sshll.u32 %s7573_s8, 4  ;;  %s55_s9 = int_to_ptr.vmem [resolvable:$true] %s54_s9 }
  0x12   :  { %s7428_s10 = scalar_lea.vmem %s55_s9, 32768  ;;  %p7433_p6 = scmp.lt.s32.totalorder %s55_s9, %s55_s9 }
  0x13   :  { %p7429_p5 = scmp.ne.s32.totalorder %s55_s9, %s7428_s10  ;;  %p7434_p7 = scmp.lt.s32.totalorder %s7428_s10, %s7428_s10 }
  0x15   :  { %p7435_p8 = por %p7434_p7, %p7433_p6 }
  0x17   :  { %p7436_p9 = pnand %p7435_p8, %p7429_p5 }
  0x19   :  { %7439 = shalt.err (!%p7436_p9)
}
  0x1a   :  { %s7574_s11 = smov 512   ;;  %s7575_s12 = smov 32  }
  0x1b   :  { %60 = dma.hbm_to_vmem [thread:$0]  %s7818_s3, 32768, %s55_s9, [#allocation9], %s7574_s11, %s7574_s11, %s7575_s12  }
  0x1c   :  { %s7576_s15 = smov [#allocation11]  }
  0x1d   :  { %s76_s16 = sshll.u32 %s7576_s15, 4  ;;  %s77_s16 = int_to_ptr.vmem [resolvable:$true] %s76_s16 }
  0x1e   :  { %s7448_s1 = scalar_lea.vmem %s77_s16, 57344  ;;  %p7453_p11 = scmp.lt.s32.totalorder %s77_s16, %s77_s16 }
  0x1f   :  { %p7449_p10 = scmp.ne.s32.totalorder %s77_s16, %s7448_s1  ;;  %p7454_p12 = scmp.lt.s32.totalorder %s7448_s1, %s7448_s1 }
  0x21   :  { %p7455_p13 = por %p7454_p12, %p7453_p11 }
  0x23   :  { %p7456_p0 = pnand %p7455_p13, %p7449_p10 }
  0x25   :  { %7459 = shalt.err (!%p7456_p0)
}
  0x26   :  { %s7577_s17 = smov 448   ;;  %s7578_s18 = smov 28  }
  0x27   :  { %82 = dma.hbm_to_vmem [thread:$0]  %s7820_s5, 57344, %s77_s16, [#allocation12], %s7577_s17, %s7577_s17, %s7578_s18  }
  0x28   :  { %s7579_s21 = smov [#allocation2]   ;;  %s7580_s3 = smov [#allocation7]  }
  0x29   :  { %s23_s22 = sshll.u32 %s7579_s21, 4  ;;  %s45_s23 = sshll.u32 %s7580_s3, 4  ;;  %s24_s22 = int_to_ptr.vmem [resolvable:$true] %s23_s22  ;;  %s46_s23 = int_to_ptr.vmem [resolvable:$true] %s45_s23 }
  0x2a   :  { %s7468_s24 = scalar_lea.vmem %s24_s22, 64  ;;  %p7473_p2 = scmp.lt.s32.totalorder %s24_s22, %s24_s22 }
  0x2b   :  { %p7469_p1 = scmp.ne.s32.totalorder %s24_s22, %s7468_s24  ;;  %p7474_p3 = scmp.lt.s32.totalorder %s7468_s24, %s7468_s24 }
  0x2d   :  { %p7475_p4 = por %p7474_p3, %p7473_p2 }
  0x2f   :  { %p7476_p5 = pnand %p7475_p4, %p7469_p1 }
  0x31   :  { %7479 = shalt.err (!%p7476_p5)
}
  0x32   :  { %26 = dma.hbm_to_vmem [thread:$0]  %s7815_s0, 64, %s24_s22, [#allocation3]  }
  0x33   :  { %s7488_s27 = scalar_lea.vmem %s46_s23, 64  ;;  %p7493_p7 = scmp.lt.s32.totalorder %s46_s23, %s46_s23 }
  0x34   :  { %p7489_p6 = scmp.ne.s32.totalorder %s46_s23, %s7488_s27  ;;  %p7494_p8 = scmp.lt.s32.totalorder %s7488_s27, %s7488_s27 }
  0x36   :  { %p7495_p9 = por %p7494_p8, %p7493_p7 }
  0x38   :  { %p7496_p10 = pnand %p7495_p9, %p7489_p6 }
  0x3a   :  { %7499 = shalt.err (!%p7496_p10)
}
  0x3b   :  { %48 = dma.hbm_to_vmem [thread:$0]  %s7817_s2, 64, %s46_s23, [#allocation6]  }
  0x3c   :  { %s7581_s29 = smov [#allocation10]   ;;  %s7582_s8 = smov [#allocation13]  }
  0x3d   :  { %s67_s30 = sshll.u32 %s7581_s29, 4  ;;  %s89_s9 = sshll.u32 %s7582_s8, 4  ;;  %s68_s30 = int_to_ptr.vmem [resolvable:$true] %s67_s30  ;;  %s90_s9 = int_to_ptr.vmem [resolvable:$true] %s89_s9 }
  0x3e   :  { %s7508_s10 = scalar_lea.vmem %s68_s30, 128  ;;  %p7513_p12 = scmp.lt.s32.totalorder %s68_s30, %s68_s30 }
  0x3f   :  { %p7509_p11 = scmp.ne.s32.totalorder %s68_s30, %s7508_s10  ;;  %p7514_p13 = scmp.lt.s32.totalorder %s7508_s10, %s7508_s10 }
  0x41   :  { %p7515_p0 = por %p7514_p13, %p7513_p12 }
  0x43   :  { %p7516_p1 = pnand %p7515_p0, %p7509_p11 }
  0x45   :  { %7519 = shalt.err (!%p7516_p1)
}
  0x46   :  { %70 = dma.hbm_to_vmem [thread:$0]  %s7819_s4, 128, %s68_s30, [#allocation9]  }
  0x47   :  { %s7528_s12 = scalar_lea.vmem %s90_s9, 112  ;;  %s7532_s2 = scalar_lea.vmem %s90_s9, 128 }
  0x48   :  { %p7529_p2 = scmp.ne.s32.totalorder %s90_s9, %s7528_s12  ;;  %p7533_p3 = scmp.lt.s32.totalorder %s90_s9, %s90_s9 }
  0x49   :  { %p7534_p4 = scmp.lt.s32.totalorder %s7532_s2, %s7528_s12 }
  0x4b   :  { %p7535_p5 = por %p7534_p4, %p7533_p3 }
  0x4d   :  { %p7536_p6 = pnand %p7535_p5, %p7529_p2 }
  0x4f   :  { %7539 = shalt.err (!%p7536_p6)
}
  0x50   :  { %92 = dma.hbm_to_vmem [thread:$0]  %s7821_s6, 112, %s90_s9, [#allocation12]  }
  0x51   :  { %7560 = dma.done.wait [#allocation3], 64  }
  0x52   :  { %7561 = vsyncadd [#allocation3], 4294967232 }
  0x53   :  { %7562 = dma.done.wait [#allocation6], 4160  }
  0x54   :  { %7563 = vsyncadd [#allocation6], 4294963136 }
  0x55   :  { %7564 = dma.done.wait [#allocation9], 32896  }
  0x56   :  { %7565 = vsyncadd [#allocation9], 4294934400 }
  0x57   :  { %7566 = dma.done.wait [#allocation12], 57456  }
  0x58   :  { %7567 = vsyncadd [#allocation12], 4294909840  ;;  %v7583_v0 = vmov 0   ;;  %v6711_v1 = vld [vmem:[#allocation5 + $0xe4] ss:$16 sps:$4 sm:$0xff]   ;;  %s7584_s4 = smov [#allocation14]  }
  0x59   :  { %362 = vmatprep.mubr.bf16.mxu0 %v7583_v0  ;;  %403 = vmatprep.mubr.bf16.mxu1 %v7583_v0  ;;  %v6713_v2 = vld [vmem:[#allocation5 + $0xec] ss:$16 sps:$4 sm:$0xff]   ;;  %v6715_v3 = vld [vmem:[#allocation5 + $0xe0] ss:$16 sps:$4 sm:$0xff]   ;;  %v6716_v4 = vld [vmem:[#allocation5 + $0xe8] ss:$16 sps:$4 sm:$0xff]  }
  0x5a   :  { %330 = vmatprep.subr.bf16.mxu0 %v6711_v1  ;;  %371 = vmatprep.subr.bf16.mxu1 %v6713_v2  ;;  %v6717_v5 = vld [vmem:[#allocation5 + $0xc4] ss:$16 sps:$4 sm:$0xff]   ;;  %v6719_v6 = vld [vmem:[#allocation5 + $0xcc] ss:$16 sps:$4 sm:$0xff]   ;;  %v6721_v7 = vld [vmem:[#allocation5 + $0xc0] ss:$16 sps:$4 sm:$0xff]  }
  0x5b   :  { %331 = vmatpush1.bf16.msra.mxu0 %v6715_v3  ;;  %372 = vmatpush1.bf16.msra.mxu1 %v6716_v4  ;;  %v6722_v8 = vld [vmem:[#allocation5 + $0xc8] ss:$16 sps:$4 sm:$0xff]   ;;  %v6723_v9 = vld [vmem:[#allocation5 + $0xa4] ss:$16 sps:$4 sm:$0xff]   ;;  %v6725_v10 = vld [vmem:[#allocation5 + $0xac] ss:$16 sps:$4 sm:$0xff]  }
  0x5c   :  { %332 = vmatprep.subr.bf16.mxu0 %v6717_v5  ;;  %373 = vmatprep.subr.bf16.mxu1 %v6719_v6  ;;  %v6727_v11 = vld [vmem:[#allocation5 + $0xa0] ss:$16 sps:$4 sm:$0xff]   ;;  %v6728_v12 = vld [vmem:[#allocation5 + $0xa8] ss:$16 sps:$4 sm:$0xff]   ;;  %v6729_v13 = vld [vmem:[#allocation5 + $0x84] ss:$16 sps:$4 sm:$0xff]  }
  0x5d   :  { %v6731_v14 = vld [vmem:[#allocation5 + $0x8c] ss:$16 sps:$4 sm:$0xff]   ;;  %v6733_v15 = vld [vmem:[#allocation5 + $0x80] ss:$16 sps:$4 sm:$0xff]   ;;  %v6734_v16 = vld [vmem:[#allocation5 + $0x88] ss:$16 sps:$4 sm:$0xff]  }
  0x5e   :  { %v6735_v17 = vld [vmem:[#allocation5 + $0x64] ss:$16 sps:$4 sm:$0xff]   ;;  %v6737_v18 = vld [vmem:[#allocation5 + $0x6c] ss:$16 sps:$4 sm:$0xff]   ;;  %v6739_v19 = vld [vmem:[#allocation5 + $0x60] ss:$16 sps:$4 sm:$0xff]  }
  0x5f   :  { %333 = vmatpush1.bf16.msra.mxu0 %v6721_v7  ;;  %374 = vmatpush1.bf16.msra.mxu1 %v6722_v8  ;;  %v6740_v20 = vld [vmem:[#allocation5 + $0x68] ss:$16 sps:$4 sm:$0xff]   ;;  %v6741_v21 = vld [vmem:[#allocation5 + $0x44] ss:$16 sps:$4 sm:$0xff]   ;;  %v6743_v22 = vld [vmem:[#allocation5 + $0x4c] ss:$16 sps:$4 sm:$0xff]  }
  0x60   :  { %334 = vmatprep.subr.bf16.mxu0 %v6723_v9  ;;  %375 = vmatprep.subr.bf16.mxu1 %v6725_v10  ;;  %v6745_v23 = vld [vmem:[#allocation5 + $0x40] ss:$16 sps:$4 sm:$0xff]   ;;  %v6746_v24 = vld [vmem:[#allocation5 + $0x48] ss:$16 sps:$4 sm:$0xff]   ;;  %v6747_v25 = vld [vmem:[#allocation5 + $0x24] ss:$16 sps:$4 sm:$0xff]  }
  0x61   :  { %v6749_v26 = vld [vmem:[#allocation5 + $0x2c] ss:$16 sps:$4 sm:$0xff]   ;;  %v6751_v27 = vld [vmem:[#allocation5 + $0x20] ss:$16 sps:$4 sm:$0xff]   ;;  %v6752_v28 = vld [vmem:[#allocation5 + $0x28] ss:$16 sps:$4 sm:$0xff]  }
  0x62   :  { %v6753_v29 = vld [vmem:[#allocation5 + $0x4] ss:$16 sps:$4 sm:$0xff]   ;;  %v6755_v30 = vld [vmem:[#allocation5 + $0xc] ss:$16 sps:$4 sm:$0xff]   ;;  %v6757_v35 = vld [vmem:[#allocation5] ss:$16 sps:$4 sm:$0xff]  }
  0x63   :  { %335 = vmatpush1.bf16.msra.mxu0 %v6727_v11  ;;  %376 = vmatpush1.bf16.msra.mxu1 %v6728_v12  ;;  %v476_v31 = vld [vmem:[#allocation8 + $0x1c0] sm:$0xff]  ;;  %v115_v43 = vld [vmem:[#allocation2] sm:$0xf]  ;;  %s5860_s6 = sshll.u32 %s7584_s4, 4  ;;  %s5861_s6 = int_to_ptr.vmem [resolvable:$true] %s5860_s6 }
  0x64   :  { %336 = vmatprep.subr.bf16.mxu0 %v6729_v13  ;;  %377 = vmatprep.subr.bf16.mxu1 %v6731_v14  ;;  %v480_v32 = vld [vmem:[#allocation8 + $0x1e0] sm:$0xff]  ;;  %s7540_s15 = scalar_lea.vmem %s5861_s6, 896  ;;  %p7545_p8 = scmp.lt.s32.totalorder %s5861_s6, %s5861_s6 }
  0x65   :  { %v604_v33 = vld [vmem:[#allocation8 + $0x5c0] sm:$0xff]  ;;  %v5961_v37 = vcombine.high %v476_v31, %v480_v32  ;;  %v5960_v44 = vcombine.low %v476_v31, %v480_v32  ;;  %p7541_p7 = scmp.ne.s32.totalorder %s5861_s6, %s7540_s15  ;;  %p7546_p9 = scmp.lt.s32.totalorder %s7540_s15, %s7540_s15 }
  0x66   :  { %v608_v34 = vld [vmem:[#allocation8 + $0x5e0] sm:$0xff] }
  0x67   :  { %337 = vmatpush1.bf16.msra.mxu0 %v6733_v15  ;;  %378 = vmatpush1.bf16.msra.mxu1 %v6734_v16  ;;  %v6758_v36 = vld [vmem:[#allocation5 + $0x8] ss:$16 sps:$4 sm:$0xff]   ;;  %v6089_v38 = vcombine.high %v604_v33, %v608_v34  ;;  %v6088_v45 = vcombine.low %v604_v33, %v608_v34  ;;  %p7547_p10 = por %p7546_p9, %p7545_p8 }
  0x68   :  { %338 = vmatprep.subr.bf16.mxu0 %v6735_v17  ;;  %379 = vmatprep.subr.bf16.mxu1 %v6737_v18  ;;  %v468_v39 = vld [vmem:[#allocation8 + $0x180] sm:$0xff] }
  0x69   :  { %v472_v40 = vld [vmem:[#allocation8 + $0x1a0] sm:$0xff]  ;;  %p7548_p11 = pnand %p7547_p10, %p7541_p7 }
  0x6a   :  { %v596_v41 = vld [vmem:[#allocation8 + $0x580] sm:$0xff]  ;;  %v5953_v46 = vcombine.high %v468_v39, %v472_v40  ;;  %v5952_v52 = vcombine.low %v468_v39, %v472_v40 }
  0x6b   :  { %339 = vmatpush1.bf16.msra.mxu0 %v6739_v19  ;;  %380 = vmatpush1.bf16.msra.mxu1 %v6740_v20  ;;  %v600_v42 = vld [vmem:[#allocation8 + $0x5a0] sm:$0xff] }
  0x6c   :  { %340 = vmatprep.subr.bf16.mxu0 %v6741_v21  ;;  %381 = vmatprep.subr.bf16.mxu1 %v6743_v22  ;;  %v6081_v47 = vcombine.high %v596_v41, %v600_v42  ;;  %v460_v48 = vld [vmem:[#allocation8 + $0x140] sm:$0xff]  ;;  %v6080_v53 = vcombine.low %v596_v41, %v600_v42 }
  0x6d   :  { %v464_v49 = vld [vmem:[#allocation8 + $0x160] sm:$0xff] }
  0x6e   :  { %v588_v50 = vld [vmem:[#allocation8 + $0x540] sm:$0xff]  ;;  %v5945_v54 = vcombine.high %v460_v48, %v464_v49  ;;  %v5944_v60 = vcombine.low %v460_v48, %v464_v49 }
  0x6f   :  { %341 = vmatpush1.bf16.msra.mxu0 %v6745_v23  ;;  %382 = vmatpush1.bf16.msra.mxu1 %v6746_v24  ;;  %v592_v51 = vld [vmem:[#allocation8 + $0x560] sm:$0xff] }
  0x70   :  { %342 = vmatprep.subr.bf16.mxu0 %v6747_v25  ;;  %383 = vmatprep.subr.bf16.mxu1 %v6749_v26  ;;  %v6073_v55 = vcombine.high %v588_v50, %v592_v51  ;;  %v452_v56 = vld [vmem:[#allocation8 + $0x100] sm:$0xff]  ;;  %v6072_v61 = vcombine.low %v588_v50, %v592_v51 }
  0x71   :  { %v456_v57 = vld [vmem:[#allocation8 + $0x120] sm:$0xff] }
  0x72   :  { %v580_v58 = vld [vmem:[#allocation8 + $0x500] sm:$0xff]  ;;  %v5937_v2 = vcombine.high %v452_v56, %v456_v57  ;;  %v5936_v4 = vcombine.low %v452_v56, %v456_v57 }
  0x73   :  { %343 = vmatpush1.bf16.msra.mxu0 %v6751_v27  ;;  %384 = vmatpush1.bf16.msra.mxu1 %v6752_v28  ;;  %v584_v59 = vld [vmem:[#allocation8 + $0x520] sm:$0xff] }
  0x74   :  { %344 = vmatprep.subr.bf16.mxu0 %v6753_v29  ;;  %385 = vmatprep.subr.bf16.mxu1 %v6755_v30  ;;  %v444_v62 = vld [vmem:[#allocation8 + $0xc0] sm:$0xff]  ;;  %v6065_v3 = vcombine.high %v580_v58, %v584_v59  ;;  %v6064_v5 = vcombine.low %v580_v58, %v584_v59 }
  0x75   :  { %v448_v63 = vld [vmem:[#allocation8 + $0xe0] sm:$0xff] }
  0x76   :  { %v572_v0 = vld [vmem:[#allocation8 + $0x4c0] sm:$0xff]  ;;  %v5929_v10 = vcombine.high %v444_v62, %v448_v63  ;;  %v5928_v12 = vcombine.low %v444_v62, %v448_v63 }
  0x77   :  { %345 = vmatpush1.bf16.msra.mxu0 %v6757_v35  ;;  %386 = vmatpush1.bf16.msra.mxu1 %v6758_v36  ;;  %v576_v1 = vld [vmem:[#allocation8 + $0x4e0] sm:$0xff] }
  0x78   :  { %1998 = vmatprep.subr.bf16.mxu0 %v5961_v37  ;;  %2039 = vmatprep.subr.bf16.mxu1 %v6089_v38  ;;  %v436_v6 = vld [vmem:[#allocation8 + $0x80] sm:$0xff]  ;;  %v6057_v11 = vcombine.high %v572_v0, %v576_v1  ;;  %v6056_v13 = vcombine.low %v572_v0, %v576_v1 }
  0x79   :  { %v440_v7 = vld [vmem:[#allocation8 + $0xa0] sm:$0xff] }
  0x7a   :  { %363 = vmatmul.mubr.bf16.vlgmr.msra.gmra.mxu0 %v115_v43  ;;  %404 = vmatmul.mubr.bf16.vlgmr.msra.gmra.mxu1 %v115_v43  ;;  %v564_v8 = vld [vmem:[#allocation8 + $0x480] sm:$0xff]  ;;  %v5921_v18 = vcombine.high %v436_v6, %v440_v7  ;;  %v5920_v20 = vcombine.low %v436_v6, %v440_v7 }
  0x7b   :  { %1999 = vmatpush1.bf16.msra.mxu0 %v5960_v44  ;;  %2040 = vmatpush1.bf16.msra.mxu1 %v6088_v45  ;;  %v568_v9 = vld [vmem:[#allocation8 + $0x4a0] sm:$0xff] }
  0x7c   :  { %2000 = vmatprep.subr.bf16.mxu0 %v5953_v46  ;;  %2041 = vmatprep.subr.bf16.mxu1 %v6081_v47  ;;  %v428_v14 = vld [vmem:[#allocation8 + $0x40] sm:$0xff]  ;;  %v6049_v19 = vcombine.high %v564_v8, %v568_v9  ;;  %v6048_v21 = vcombine.low %v564_v8, %v568_v9 }
  0x7d   :  { %v432_v15 = vld [vmem:[#allocation8 + $0x60] sm:$0xff] }
  0x7e   :  { %v556_v16 = vld [vmem:[#allocation8 + $0x440] sm:$0xff]  ;;  %v5913_v26 = vcombine.high %v428_v14, %v432_v15  ;;  %v5912_v28 = vcombine.low %v428_v14, %v432_v15 }
  0x7f   :  { %2001 = vmatpush1.bf16.msra.mxu0 %v5952_v52  ;;  %2042 = vmatpush1.bf16.msra.mxu1 %v6080_v53  ;;  %v560_v17 = vld [vmem:[#allocation8 + $0x460] sm:$0xff] }
  0x80   :  { %2002 = vmatprep.subr.bf16.mxu0 %v5945_v54  ;;  %2043 = vmatprep.subr.bf16.mxu1 %v6073_v55  ;;  %v420_v22 = vld [vmem:[#allocation8] sm:$0xff]  ;;  %v6041_v27 = vcombine.high %v556_v16, %v560_v17  ;;  %v6040_v29 = vcombine.low %v556_v16, %v560_v17 }
  0x81   :  { %v424_v23 = vld [vmem:[#allocation8 + $0x20] sm:$0xff] }
  0x82   :  { %v548_v24 = vld [vmem:[#allocation8 + $0x400] sm:$0xff]  ;;  %v5905_v34 = vcombine.high %v420_v22, %v424_v23  ;;  %v5904_v36 = vcombine.low %v420_v22, %v424_v23 }
  0x83   :  { %2003 = vmatpush1.bf16.msra.mxu0 %v5944_v60  ;;  %2044 = vmatpush1.bf16.msra.mxu1 %v6072_v61  ;;  %v552_v25 = vld [vmem:[#allocation8 + $0x420] sm:$0xff] }
  0x84   :  { %2004 = vmatprep.subr.bf16.mxu0 %v5937_v2  ;;  %2045 = vmatprep.subr.bf16.mxu1 %v6065_v3  ;;  %v540_v30 = vld [vmem:[#allocation8 + $0x3c0] sm:$0xff]  ;;  %v6033_v35 = vcombine.high %v548_v24, %v552_v25  ;;  %v6032_v37 = vcombine.low %v548_v24, %v552_v25 }
  0x85   :  { %v544_v31 = vld [vmem:[#allocation8 + $0x3e0] sm:$0xff] }
  0x86   :  { %v668_v32 = vld [vmem:[#allocation8 + $0x7c0] sm:$0xff]  ;;  %v6025_v42 = vcombine.high %v540_v30, %v544_v31  ;;  %v6024_v44 = vcombine.low %v540_v30, %v544_v31 }
  0x87   :  { %2005 = vmatpush1.bf16.msra.mxu0 %v5936_v4  ;;  %2046 = vmatpush1.bf16.msra.mxu1 %v6064_v5  ;;  %v672_v33 = vld [vmem:[#allocation8 + $0x7e0] sm:$0xff] }
  0x88   :  { %2006 = vmatprep.subr.bf16.mxu0 %v5929_v10  ;;  %2047 = vmatprep.subr.bf16.mxu1 %v6057_v11  ;;  %v532_v38 = vld [vmem:[#allocation8 + $0x380] sm:$0xff]  ;;  %v6153_v43 = vcombine.high %v668_v32, %v672_v33  ;;  %v6152_v45 = vcombine.low %v668_v32, %v672_v33 }
  0x89   :  { %v536_v39 = vld [vmem:[#allocation8 + $0x3a0] sm:$0xff] }
  0x8a   :  { %v660_v40 = vld [vmem:[#allocation8 + $0x780] sm:$0xff]  ;;  %v6017_v50 = vcombine.high %v532_v38, %v536_v39  ;;  %v6016_v52 = vcombine.low %v532_v38, %v536_v39  ;;  %v609_v38 = vld [vmem:[#allocation8 + $0x5e8] sm:$0xff] }
  0x8b   :  { %2007 = vmatpush1.bf16.msra.mxu0 %v5928_v12  ;;  %2048 = vmatpush1.bf16.msra.mxu1 %v6056_v13  ;;  %v664_v41 = vld [vmem:[#allocation8 + $0x7a0] sm:$0xff] }
  0x8c   :  { %2008 = vmatprep.subr.bf16.mxu0 %v5921_v18  ;;  %2049 = vmatprep.subr.bf16.mxu1 %v6049_v19  ;;  %v524_v46 = vld [vmem:[#allocation8 + $0x340] sm:$0xff]  ;;  %v6145_v51 = vcombine.high %v660_v40, %v664_v41  ;;  %v6144_v53 = vcombine.low %v660_v40, %v664_v41 }
  0x8d   :  { %v528_v47 = vld [vmem:[#allocation8 + $0x360] sm:$0xff] }
  0x8e   :  { %v652_v48 = vld [vmem:[#allocation8 + $0x740] sm:$0xff]  ;;  %v6009_v58 = vcombine.high %v524_v46, %v528_v47  ;;  %v6008_v60 = vcombine.low %v524_v46, %v528_v47 }
  0x8f   :  { %2009 = vmatpush1.bf16.msra.mxu0 %v5920_v20  ;;  %2050 = vmatpush1.bf16.msra.mxu1 %v6048_v21  ;;  %v656_v49 = vld [vmem:[#allocation8 + $0x760] sm:$0xff] }
  0x90   :  { %2010 = vmatprep.subr.bf16.mxu0 %v5913_v26  ;;  %2051 = vmatprep.subr.bf16.mxu1 %v6041_v27  ;;  %v516_v54 = vld [vmem:[#allocation8 + $0x300] sm:$0xff]  ;;  %v6137_v59 = vcombine.high %v652_v48, %v656_v49  ;;  %v6136_v61 = vcombine.low %v652_v48, %v656_v49 }
  0x91   :  { %v520_v55 = vld [vmem:[#allocation8 + $0x320] sm:$0xff] }
  0x92   :  { %v644_v56 = vld [vmem:[#allocation8 + $0x700] sm:$0xff]  ;;  %v6001_v2 = vcombine.high %v516_v54, %v520_v55  ;;  %v6000_v4 = vcombine.low %v516_v54, %v520_v55 }
  0x93   :  { %2011 = vmatpush1.bf16.msra.mxu0 %v5912_v28  ;;  %2052 = vmatpush1.bf16.msra.mxu1 %v6040_v29  ;;  %v648_v57 = vld [vmem:[#allocation8 + $0x720] sm:$0xff] }
  0x94   :  { %2012 = vmatprep.subr.bf16.mxu0 %v5905_v34  ;;  %2053 = vmatprep.subr.bf16.mxu1 %v6033_v35  ;;  %v508_v62 = vld [vmem:[#allocation8 + $0x2c0] sm:$0xff]  ;;  %v6129_v3 = vcombine.high %v644_v56, %v648_v57  ;;  %v6128_v5 = vcombine.low %v644_v56, %v648_v57  ;;  %v477_v34 = vld [vmem:[#allocation8 + $0x1c8] sm:$0xff] }
  0x95   :  { %v512_v63 = vld [vmem:[#allocation8 + $0x2e0] sm:$0xff]  ;;  %v481_v35 = vld [vmem:[#allocation8 + $0x1e8] sm:$0xff] }
  0x96   :  { %v636_v0 = vld [vmem:[#allocation8 + $0x6c0] sm:$0xff]  ;;  %v5993_v10 = vcombine.high %v508_v62, %v512_v63  ;;  %v5992_v12 = vcombine.low %v508_v62, %v512_v63  ;;  %v5962_v39 = vcombine.low %v477_v34, %v481_v35 }
  0x97   :  { %2013 = vmatpush1.bf16.msra.mxu0 %v5904_v36  ;;  %2054 = vmatpush1.bf16.msra.mxu1 %v6032_v37  ;;  %v640_v1 = vld [vmem:[#allocation8 + $0x6e0] sm:$0xff]  ;;  %v605_v36 = vld [vmem:[#allocation8 + $0x5c8] sm:$0xff]  ;;  %v5963_v37 = vcombine.high %v477_v34, %v481_v35 }
  0x98   :  { %2014 = vmatprep.subr.bf16.mxu0 %v6025_v42  ;;  %2055 = vmatprep.subr.bf16.mxu1 %v6153_v43  ;;  %v500_v6 = vld [vmem:[#allocation8 + $0x280] sm:$0xff]  ;;  %v6121_v11 = vcombine.high %v636_v0, %v640_v1  ;;  %v6120_v13 = vcombine.low %v636_v0, %v640_v1  ;;  %v6090_v40 = vcombine.low %v605_v36, %v609_v38  ;;  %v150_v42 = vlaneseq  ;;  %v469_v1 = vld [vmem:[#allocation8 + $0x188] sm:$0xff] }
  0x99   :  { %v504_v7 = vld [vmem:[#allocation8 + $0x2a0] sm:$0xff]  ;;  %v6091_v41 = vcombine.high %v605_v36, %v609_v38  ;;  %v577_v34 = vld [vmem:[#allocation8 + $0x4e8] sm:$0xff] }
  0x9a   :  { %v628_v8 = vld [vmem:[#allocation8 + $0x680] sm:$0xff]  ;;  %v5985_v14 = vcombine.high %v500_v6, %v504_v7  ;;  %v5984_v16 = vcombine.low %v500_v6, %v504_v7  ;;  %v7646_v43 = vshrl.u32 %v150_v42, 7  ;;  %v601_v6 = vld [vmem:[#allocation8 + $0x5a8] sm:$0xff] }
  0x9b   :  { %2015 = vmatpush2.bf16.msra.mxu0 %v6024_v44  ;;  %2056 = vmatpush2.bf16.msra.mxu1 %v6152_v45  ;;  %v632_v9 = vld [vmem:[#allocation8 + $0x6a0] sm:$0xff]  ;;  %v148_v44 = vld [vmem:[#allocation7] sm:$0xf]  ;;  %v569_v42 = vld [vmem:[#allocation8 + $0x4a8] sm:$0xff] }
  0x9c   :  { %2016 = vmatprep.subr.bf16.mxu0 %v6017_v50  ;;  %2057 = vmatprep.subr.bf16.mxu1 %v6145_v51  ;;  %v6113_v15 = vcombine.high %v628_v8, %v632_v9  ;;  %v6112_v17 = vcombine.low %v628_v8, %v632_v9  ;;  %v492_v18 = vld [vmem:[#allocation8 + $0x240] sm:$0xff]  ;;  %v7649_v45 = vsub.s32 0, %v7646_v43  ;;  %v7652_v46 = vsub.s32 2, %v7646_v43 }
  0x9d   :  { %v496_v19 = vld [vmem:[#allocation8 + $0x260] sm:$0xff]  ;;  %v7655_v47 = vsub.s32 1, %v7646_v43  ;;  %v7658_v48 = vsub.s32 3, %v7646_v43 }
  0x9e   :  { %v620_v20 = vld [vmem:[#allocation8 + $0x640] sm:$0xff]  ;;  %v5977_v21 = vcombine.high %v492_v18, %v496_v19  ;;  %v5976_v23 = vcombine.low %v492_v18, %v496_v19  ;;  %v153_v49 = vrot.slane %v148_v44, %v7649_v45  ;;  %v161_v50 = vrot.slane %v148_v44, %v7652_v46  ;;  %v593_v18 = vld [vmem:[#allocation8 + $0x568] sm:$0xff] }
  0x9f   :  { %2017 = vmatpush2.bf16.msra.mxu0 %v6016_v52  ;;  %2058 = vmatpush2.bf16.msra.mxu1 %v6144_v53  ;;  %v624_v22 = vld [vmem:[#allocation8 + $0x660] sm:$0xff]  ;;  %v157_v51 = vrot.slane %v148_v44, %v7655_v47  ;;  %v165_v52 = vrot.slane %v148_v44, %v7658_v48 }
  0xa0   :  { %2018 = vmatprep.subr.bf16.mxu0 %v6009_v58  ;;  %2059 = vmatprep.subr.bf16.mxu1 %v6137_v59  ;;  %v6104_v24 = vcombine.low %v620_v20, %v624_v22  ;;  %v6105_v25 = vcombine.high %v620_v20, %v624_v22  ;;  %v484_v26 = vld [vmem:[#allocation8 + $0x200] sm:$0xff] }
  0xa1   :  { %v488_v27 = vld [vmem:[#allocation8 + $0x220] sm:$0xff] }
  0xa2   :  { %v612_v28 = vld [vmem:[#allocation8 + $0x600] sm:$0xff]  ;;  %v5969_v29 = vcombine.high %v484_v26, %v488_v27  ;;  %v5968_v31 = vcombine.low %v484_v26, %v488_v27  ;;  %v585_v26 = vld [vmem:[#allocation8 + $0x528] sm:$0xff] }
  0xa3   :  { %2019 = vmatpush2.bf16.msra.mxu0 %v6008_v60  ;;  %2060 = vmatpush2.bf16.msra.mxu1 %v6136_v61  ;;  %v616_v30 = vld [vmem:[#allocation8 + $0x620] sm:$0xff] }
  0xa4   :  { %2020 = vmatprep.subr.bf16.mxu0 %v6001_v2  ;;  %2061 = vmatprep.subr.bf16.mxu1 %v6129_v3  ;;  %v6096_v32 = vcombine.low %v612_v28, %v616_v30  ;;  %v6097_v33 = vcombine.high %v612_v28, %v616_v30  ;;  %v473_v2 = vld [vmem:[#allocation8 + $0x1a8] sm:$0xff] }
  0xa5   :  { %v597_v3 = vld [vmem:[#allocation8 + $0x588] sm:$0xff]  ;;  %v5954_v19 = vcombine.low %v469_v1, %v473_v2 }
  0xa6   :  { %v6082_v20 = vcombine.low %v597_v3, %v601_v6 }
  0xa7   :  { %2021 = vmatpush2.bf16.msra.mxu0 %v6000_v4  ;;  %2062 = vmatpush2.bf16.msra.mxu1 %v6128_v5 }
  0xa8   :  { %2022 = vmatprep.subr.bf16.mxu0 %v5993_v10  ;;  %2063 = vmatprep.subr.bf16.mxu1 %v6121_v11 }
  0xab   :  { %2023 = vmatpush2.bf16.msra.mxu0 %v5992_v12  ;;  %2064 = vmatpush2.bf16.msra.mxu1 %v6120_v13  ;;  %v461_v13 = vld [vmem:[#allocation8 + $0x148] sm:$0xff] }
  0xac   :  { %2024 = vmatprep.subr.bf16.mxu0 %v5985_v14  ;;  %2065 = vmatprep.subr.bf16.mxu1 %v6113_v15  ;;  %v465_v14 = vld [vmem:[#allocation8 + $0x168] sm:$0xff] }
  0xad   :  { %v589_v15 = vld [vmem:[#allocation8 + $0x548] sm:$0xff]  ;;  %v5947_v22 = vcombine.high %v461_v13, %v465_v14  ;;  %v5946_v27 = vcombine.low %v461_v13, %v465_v14 }
  0xae   :  { %v6074_v28 = vcombine.low %v589_v15, %v593_v18 }
  0xaf   :  { %2025 = vmatpush2.bf16.msra.mxu0 %v5984_v16  ;;  %2066 = vmatpush2.bf16.msra.mxu1 %v6112_v17  ;;  %v5955_v16 = vcombine.high %v469_v1, %v473_v2  ;;  %v6083_v17 = vcombine.high %v597_v3, %v601_v6  ;;  %v669_v6 = vld [vmem:[#allocation8 + $0x7c8] sm:$0xff] }
  0xb0   :  { %2026 = vmatprep.subr.bf16.mxu0 %v5977_v21  ;;  %2067 = vmatprep.subr.bf16.mxu1 %v6105_v25  ;;  %v453_v21 = vld [vmem:[#allocation8 + $0x108] sm:$0xff] }
  0xb1   :  { %v581_v25 = vld [vmem:[#allocation8 + $0x508] sm:$0xff] }
  0xb2   :  { %v6067_v30 = vcombine.high %v581_v25, %v585_v26  ;;  %v6066_v36 = vcombine.low %v581_v25, %v585_v26  ;;  %v529_v25 = vld [vmem:[#allocation8 + $0x368] sm:$0xff] }
  0xb3   :  { %2027 = vmatpush2.bf16.msra.mxu0 %v5976_v23  ;;  %2068 = vmatpush2.bf16.msra.mxu1 %v6104_v24  ;;  %v6075_v23 = vcombine.high %v589_v15, %v593_v18  ;;  %v457_v24 = vld [vmem:[#allocation8 + $0x128] sm:$0xff] }
  0xb4   :  { %2028 = vmatprep.subr.bf16.mxu0 %v5969_v29  ;;  %2069 = vmatprep.subr.bf16.mxu1 %v6097_v33  ;;  %v5939_v29 = vcombine.high %v453_v21, %v457_v24  ;;  %v573_v33 = vld [vmem:[#allocation8 + $0x4c8] sm:$0xff]  ;;  %v5938_v35 = vcombine.low %v453_v21, %v457_v24 }
  0xb5   :  { %v6059_v38 = vcombine.high %v573_v33, %v577_v34  ;;  %v661_v18 = vld [vmem:[#allocation8 + $0x788] sm:$0xff] }
  0xb6   :  { %v525_v24 = vld [vmem:[#allocation8 + $0x348] sm:$0xff] }
  0xb7   :  { %2029 = vmatpush2.bf16.msra.mxu0 %v5968_v31  ;;  %2070 = vmatpush2.bf16.msra.mxu1 %v6096_v32  ;;  %v445_v31 = vld [vmem:[#allocation8 + $0xc8] sm:$0xff] }
  0xb8   :  { %2080 = vmatprep.subr.bf16.mxu0 %v5963_v37  ;;  %2121 = vmatprep.subr.bf16.mxu1 %v6091_v41  ;;  %v449_v32 = vld [vmem:[#allocation8 + $0xe8] sm:$0xff] }
  0xb9   :  { %v5931_v37 = vcombine.high %v445_v31, %v449_v32  ;;  %v565_v41 = vld [vmem:[#allocation8 + $0x488] sm:$0xff]  ;;  %v5930_v44 = vcombine.low %v445_v31, %v449_v32 }
  0xba   :  { %v653_v26 = vld [vmem:[#allocation8 + $0x748] sm:$0xff] }
  0xbb   :  { %v517_v32 = vld [vmem:[#allocation8 + $0x308] sm:$0xff] }
 0x13a   :  { %v364_v53 = vpop.f32.mrf.mxu0  ;;  %v405_v54 = vpop.f32.mrf.mxu1 }
 0x13b   :  { %v365_v55 = vadd.f32 %v364_v53, %v153_v49  ;;  %v406_v56 = vadd.f32 %v405_v54, %v161_v50  ;;  %v6058_v49 = vcombine.low %v573_v33, %v577_v34  ;;  %v433_v53 = vld [vmem:[#allocation8 + $0x68] sm:$0xff] }
 0x13c   :  { %v366_v57 = vpop.f32.mrf.mxu0  ;;  %v407_v58 = vpop.f32.mrf.mxu1  ;;  %v557_v54 = vld [vmem:[#allocation8 + $0x448] sm:$0xff] }
 0x13d   :  { %v414_v59 = vmax.f32 %v406_v56, 0.0  ;;  %v367_v60 = vadd.f32 %v366_v57, %v157_v51  ;;  %v408_v61 = vadd.f32 %v407_v58, %v165_v52  ;;  %v412_v62 = vmax.f32 %v365_v55, 0.0  ;;  %v429_v52 = vld [vmem:[#allocation8 + $0x48] sm:$0xff] }
 0x13e   :  { %v368_v63 = vpop.f32.mrf.mxu0  ;;  %v409_v0 = vpop.f32.mrf.mxu1  ;;  %v6051_v51 = vcombine.high %v565_v41, %v569_v42  ;;  %v561_v55 = vld [vmem:[#allocation8 + $0x468] sm:$0xff]  ;;  %v6050_v57 = vcombine.low %v565_v41, %v569_v42  ;;  %v5915_v58 = vcombine.high %v429_v52, %v433_v53 }
 0x13f   :  { %v413_v4 = vmax.f32 %v367_v60, 0.0  ;;  %v415_v5 = vmax.f32 %v408_v61, 0.0  ;;  %v7664_v7 = vpack.c.bf16 %v414_v59, %v414_v59  ;;  %v7670_v12 = vpack.c.bf16 %v412_v62, %v412_v62  ;;  %v421_v60 = vld [vmem:[#allocation8 + $0x8] sm:$0xff] }
 0x140   :  { %v369_v8 = vpop.f32.mrf.mxu0  ;;  %v410_v9 = vpop.f32.mrf.mxu1  ;;  %v6043_v59 = vcombine.high %v557_v54, %v561_v55  ;;  %v425_v61 = vld [vmem:[#allocation8 + $0x28] sm:$0xff]  ;;  %v5914_v0 = vcombine.low %v429_v52, %v433_v53  ;;  %v6042_v1 = vcombine.low %v557_v54, %v561_v55 }
 0x141   :  { %v7666_v10 = vpack.c.bf16 %v413_v4, %v413_v4  ;;  %v7668_v11 = vpack.c.bf16 %v415_v5, %v415_v5  ;;  %v549_v62 = vld [vmem:[#allocation8 + $0x408] sm:$0xff]  ;;  %v5907_v2 = vcombine.high %v421_v60, %v425_v61  ;;  %v5906_v9 = vcombine.low %v421_v60, %v425_v61 }
 0x142   :  { %v553_v63 = vld [vmem:[#allocation8 + $0x428] sm:$0xff] }
 0x143   :  { %2030 = vmatprep.mubr.bf16.mxu0 %v7666_v10  ;;  %2071 = vmatprep.mubr.bf16.mxu1 %v7668_v11  ;;  %v6035_v3 = vcombine.high %v549_v62, %v553_v63  ;;  %v541_v4 = vld [vmem:[#allocation8 + $0x3c8] sm:$0xff]  ;;  %v6034_v13 = vcombine.low %v549_v62, %v553_v63 }
 0x144   :  { %2031 = vmatmul.mubr.bf16.vlgmr.msra.gmra.mxu0 %v7670_v12  ;;  %2072 = vmatmul.mubr.bf16.vlgmr.msra.gmra.mxu1 %v7664_v7  ;;  %v545_v5 = vld [vmem:[#allocation8 + $0x3e8] sm:$0xff] }
 0x145   :  { %2081 = vmatpush1.bf16.msra.mxu0 %v5962_v39  ;;  %2122 = vmatpush1.bf16.msra.mxu1 %v6090_v40  ;;  %v437_v39 = vld [vmem:[#allocation8 + $0x88] sm:$0xff]  ;;  %v6027_v14 = vcombine.high %v541_v4, %v545_v5 }
 0x146   :  { %2112 = vmatprep.mubr.bf16.mxu0 %v7666_v10  ;;  %2153 = vmatprep.mubr.bf16.mxu1 %v7668_v11  ;;  %v441_v40 = vld [vmem:[#allocation8 + $0xa8] sm:$0xff] }
 0x147   :  { %2082 = vmatprep.subr.bf16.mxu0 %v5955_v16  ;;  %2123 = vmatprep.subr.bf16.mxu1 %v6083_v17  ;;  %v5923_v50 = vcombine.high %v437_v39, %v441_v40  ;;  %v5922_v56 = vcombine.low %v437_v39, %v441_v40  ;;  %v673_v8 = vld [vmem:[#allocation8 + $0x7e8] sm:$0xff] }
 0x148   :  { %v6155_v15 = vcombine.high %v669_v6, %v673_v8  ;;  %v533_v16 = vld [vmem:[#allocation8 + $0x388] sm:$0xff]  ;;  %v6154_v21 = vcombine.low %v669_v6, %v673_v8 }
 0x149   :  { %2083 = vmatpush1.bf16.msra.mxu0 %v5954_v19  ;;  %2124 = vmatpush1.bf16.msra.mxu1 %v6082_v20  ;;  %v537_v17 = vld [vmem:[#allocation8 + $0x3a8] sm:$0xff]  ;;  %v6026_v20 = vcombine.low %v541_v4, %v545_v5 }
 0x14a   :  { %2084 = vmatprep.subr.bf16.mxu0 %v5947_v22  ;;  %2125 = vmatprep.subr.bf16.mxu1 %v6075_v23  ;;  %v665_v19 = vld [vmem:[#allocation8 + $0x7a8] sm:$0xff]  ;;  %v6019_v22 = vcombine.high %v533_v16, %v537_v17 }
 0x14b   :  { %v6147_v23 = vcombine.high %v661_v18, %v665_v19  ;;  %v521_v33 = vld [vmem:[#allocation8 + $0x328] sm:$0xff] }
 0x14c   :  { %v645_v34 = vld [vmem:[#allocation8 + $0x708] sm:$0xff] }
 0x14d   :  { %2085 = vmatpush1.bf16.msra.mxu0 %v5946_v27  ;;  %2126 = vmatpush1.bf16.msra.mxu1 %v6074_v28  ;;  %v657_v27 = vld [vmem:[#allocation8 + $0x768] sm:$0xff]  ;;  %v6018_v28 = vcombine.low %v533_v16, %v537_v17  ;;  %v478_v17 = vld [vmem:[#allocation8 + $0x1d0] sm:$0xff] }
 0x14e   :  { %2086 = vmatprep.subr.bf16.mxu0 %v5939_v29  ;;  %2127 = vmatprep.subr.bf16.mxu1 %v6067_v30  ;;  %v6146_v29 = vcombine.low %v661_v18, %v665_v19  ;;  %v6011_v30 = vcombine.high %v525_v24, %v529_v25  ;;  %v6139_v31 = vcombine.high %v653_v26, %v657_v27  ;;  %v509_v40 = vld [vmem:[#allocation8 + $0x2c8] sm:$0xff]  ;;  %v482_v18 = vld [vmem:[#allocation8 + $0x1f0] sm:$0xff] }
 0x14f   :  { %v513_v41 = vld [vmem:[#allocation8 + $0x2e8] sm:$0xff]  ;;  %v606_v19 = vld [vmem:[#allocation8 + $0x5d0] sm:$0xff] }
 0x150   :  { %v637_v42 = vld [vmem:[#allocation8 + $0x6c8] sm:$0xff] }
 0x151   :  { %2087 = vmatpush1.bf16.msra.mxu0 %v5938_v35  ;;  %2128 = vmatpush1.bf16.msra.mxu1 %v6066_v36  ;;  %v649_v35 = vld [vmem:[#allocation8 + $0x728] sm:$0xff]  ;;  %v6010_v36 = vcombine.low %v525_v24, %v529_v25  ;;  %v470_v25 = vld [vmem:[#allocation8 + $0x190] sm:$0xff] }
 0x152   :  { %2088 = vmatprep.subr.bf16.mxu0 %v5931_v37  ;;  %2129 = vmatprep.subr.bf16.mxu1 %v6059_v38  ;;  %v6138_v37 = vcombine.low %v653_v26, %v657_v27  ;;  %v6003_v38 = vcombine.high %v517_v32, %v521_v33  ;;  %v6131_v39 = vcombine.high %v645_v34, %v649_v35  ;;  %v501_v53 = vld [vmem:[#allocation8 + $0x288] sm:$0xff]  ;;  %v474_v26 = vld [vmem:[#allocation8 + $0x1b0] sm:$0xff] }
 0x153   :  { %v505_v54 = vld [vmem:[#allocation8 + $0x2a8] sm:$0xff]  ;;  %v598_v27 = vld [vmem:[#allocation8 + $0x590] sm:$0xff] }
 0x154   :  { %v629_v55 = vld [vmem:[#allocation8 + $0x688] sm:$0xff] }
 0x155   :  { %2089 = vmatpush1.bf16.msra.mxu0 %v5930_v44  ;;  %2130 = vmatpush1.bf16.msra.mxu1 %v6058_v49  ;;  %v641_v44 = vld [vmem:[#allocation8 + $0x6e8] sm:$0xff]  ;;  %v6002_v49 = vcombine.low %v517_v32, %v521_v33  ;;  %v462_v33 = vld [vmem:[#allocation8 + $0x150] sm:$0xff] }
 0x156   :  { %2090 = vmatprep.subr.bf16.mxu0 %v5923_v50  ;;  %2131 = vmatprep.subr.bf16.mxu1 %v6051_v51  ;;  %v6130_v50 = vcombine.low %v645_v34, %v649_v35  ;;  %v5995_v51 = vcombine.high %v509_v40, %v513_v41  ;;  %v6123_v52 = vcombine.high %v637_v42, %v641_v44  ;;  %v493_v61 = vld [vmem:[#allocation8 + $0x248] sm:$0xff]  ;;  %v466_v34 = vld [vmem:[#allocation8 + $0x170] sm:$0xff] }
 0x157   :  { %v497_v62 = vld [vmem:[#allocation8 + $0x268] sm:$0xff]  ;;  %v590_v35 = vld [vmem:[#allocation8 + $0x550] sm:$0xff] }
 0x158   :  { %v621_v63 = vld [vmem:[#allocation8 + $0x648] sm:$0xff] }
 0x159   :  { %2091 = vmatpush1.bf16.msra.mxu0 %v5922_v56  ;;  %2132 = vmatpush1.bf16.msra.mxu1 %v6050_v57  ;;  %v633_v56 = vld [vmem:[#allocation8 + $0x6a8] sm:$0xff]  ;;  %v5994_v57 = vcombine.low %v509_v40, %v513_v41  ;;  %v454_v41 = vld [vmem:[#allocation8 + $0x110] sm:$0xff] }
 0x15a   :  { %2092 = vmatprep.subr.bf16.mxu0 %v5915_v58  ;;  %2133 = vmatprep.subr.bf16.mxu1 %v6043_v59  ;;  %v6122_v58 = vcombine.low %v637_v42, %v641_v44  ;;  %v5987_v59 = vcombine.high %v501_v53, %v505_v54  ;;  %v6115_v60 = vcombine.high %v629_v55, %v633_v56  ;;  %v485_v5 = vld [vmem:[#allocation8 + $0x208] sm:$0xff]  ;;  %v458_v42 = vld [vmem:[#allocation8 + $0x130] sm:$0xff] }
 0x15b   :  { %v489_v6 = vld [vmem:[#allocation8 + $0x228] sm:$0xff]  ;;  %v582_v44 = vld [vmem:[#allocation8 + $0x510] sm:$0xff] }
 0x15c   :  { %v613_v8 = vld [vmem:[#allocation8 + $0x608] sm:$0xff] }
 0x15d   :  { %2093 = vmatpush1.bf16.msra.mxu0 %v5914_v0  ;;  %2134 = vmatpush1.bf16.msra.mxu1 %v6042_v1  ;;  %v625_v0 = vld [vmem:[#allocation8 + $0x668] sm:$0xff]  ;;  %v5986_v1 = vcombine.low %v501_v53, %v505_v54  ;;  %v446_v54 = vld [vmem:[#allocation8 + $0xd0] sm:$0xff] }
 0x15e   :  { %2094 = vmatprep.subr.bf16.mxu0 %v5907_v2  ;;  %2135 = vmatprep.subr.bf16.mxu1 %v6035_v3  ;;  %v6114_v2 = vcombine.low %v629_v55, %v633_v56  ;;  %v5979_v3 = vcombine.high %v493_v61, %v497_v62  ;;  %v6107_v4 = vcombine.high %v621_v63, %v625_v0  ;;  %v450_v55 = vld [vmem:[#allocation8 + $0xf0] sm:$0xff] }
 0x15f   :  { %v574_v56 = vld [vmem:[#allocation8 + $0x4d0] sm:$0xff] }
 0x161   :  { %2095 = vmatpush1.bf16.msra.mxu0 %v5906_v9  ;;  %2136 = vmatpush1.bf16.msra.mxu1 %v6034_v13  ;;  %v617_v9 = vld [vmem:[#allocation8 + $0x628] sm:$0xff]  ;;  %v5978_v13 = vcombine.low %v493_v61, %v497_v62  ;;  %v438_v62 = vld [vmem:[#allocation8 + $0x90] sm:$0xff] }
 0x162   :  { %2096 = vmatprep.subr.bf16.mxu0 %v6027_v14  ;;  %2137 = vmatprep.subr.bf16.mxu1 %v6155_v15  ;;  %v6106_v14 = vcombine.low %v621_v63, %v625_v0  ;;  %v5971_v15 = vcombine.high %v485_v5, %v489_v6  ;;  %v6099_v16 = vcombine.high %v613_v8, %v617_v9  ;;  %v442_v63 = vld [vmem:[#allocation8 + $0xb0] sm:$0xff] }
 0x163   :  { %v566_v0 = vld [vmem:[#allocation8 + $0x490] sm:$0xff] }
 0x165   :  { %2097 = vmatpush2.bf16.msra.mxu0 %v6026_v20  ;;  %2138 = vmatpush2.bf16.msra.mxu1 %v6154_v21  ;;  %v610_v20 = vld [vmem:[#allocation8 + $0x5f0] sm:$0xff]  ;;  %v5970_v21 = vcombine.low %v485_v5, %v489_v6 }
 0x166   :  { %2098 = vmatprep.subr.bf16.mxu0 %v6019_v22  ;;  %2139 = vmatprep.subr.bf16.mxu1 %v6147_v23  ;;  %v6098_v22 = vcombine.low %v613_v8, %v617_v9  ;;  %v5965_v23 = vcombine.high %v478_v17, %v482_v18  ;;  %v6093_v24 = vcombine.high %v606_v19, %v610_v20  ;;  %v430_v6 = vld [vmem:[#allocation8 + $0x50] sm:$0xff] }
 0x167   :  { %v434_v8 = vld [vmem:[#allocation8 + $0x70] sm:$0xff] }
 0x168   :  { %v558_v9 = vld [vmem:[#allocation8 + $0x450] sm:$0xff] }
 0x169   :  { %2099 = vmatpush2.bf16.msra.mxu0 %v6018_v28  ;;  %2140 = vmatpush2.bf16.msra.mxu1 %v6146_v29  ;;  %v602_v28 = vld [vmem:[#allocation8 + $0x5b0] sm:$0xff]  ;;  %v5964_v29 = vcombine.low %v478_v17, %v482_v18 }
 0x16a   :  { %2100 = vmatprep.subr.bf16.mxu0 %v6011_v30  ;;  %2141 = vmatprep.subr.bf16.mxu1 %v6139_v31  ;;  %v6092_v30 = vcombine.low %v606_v19, %v610_v20  ;;  %v5957_v31 = vcombine.high %v470_v25, %v474_v26  ;;  %v6085_v32 = vcombine.high %v598_v27, %v602_v28  ;;  %v422_v18 = vld [vmem:[#allocation8 + $0x10] sm:$0xff] }
 0x16b   :  { %v426_v19 = vld [vmem:[#allocation8 + $0x30] sm:$0xff] }
 0x16c   :  { %v550_v20 = vld [vmem:[#allocation8 + $0x410] sm:$0xff] }
 0x16d   :  { %2101 = vmatpush2.bf16.msra.mxu0 %v6010_v36  ;;  %2142 = vmatpush2.bf16.msra.mxu1 %v6138_v37  ;;  %v594_v36 = vld [vmem:[#allocation8 + $0x570] sm:$0xff]  ;;  %v5956_v37 = vcombine.low %v470_v25, %v474_v26 }
 0x16e   :  { %2102 = vmatprep.subr.bf16.mxu0 %v6003_v38  ;;  %2143 = vmatprep.subr.bf16.mxu1 %v6131_v39  ;;  %v6084_v38 = vcombine.low %v598_v27, %v602_v28  ;;  %v5949_v39 = vcombine.high %v462_v33, %v466_v34  ;;  %v6077_v40 = vcombine.high %v590_v35, %v594_v36  ;;  %v542_v26 = vld [vmem:[#allocation8 + $0x3d0] sm:$0xff] }
 0x16f   :  { %v546_v27 = vld [vmem:[#allocation8 + $0x3f0] sm:$0xff] }
 0x170   :  { %v670_v28 = vld [vmem:[#allocation8 + $0x7d0] sm:$0xff] }
 0x171   :  { %2103 = vmatpush2.bf16.msra.mxu0 %v6002_v49  ;;  %2144 = vmatpush2.bf16.msra.mxu1 %v6130_v50  ;;  %v586_v49 = vld [vmem:[#allocation8 + $0x530] sm:$0xff]  ;;  %v5948_v50 = vcombine.low %v462_v33, %v466_v34 }
 0x172   :  { %2104 = vmatprep.subr.bf16.mxu0 %v5995_v51  ;;  %2145 = vmatprep.subr.bf16.mxu1 %v6123_v52  ;;  %v6076_v51 = vcombine.low %v590_v35, %v594_v36  ;;  %v5941_v52 = vcombine.high %v454_v41, %v458_v42  ;;  %v6069_v53 = vcombine.high %v582_v44, %v586_v49  ;;  %v534_v34 = vld [vmem:[#allocation8 + $0x390] sm:$0xff] }
 0x173   :  { %v538_v35 = vld [vmem:[#allocation8 + $0x3b0] sm:$0xff] }
 0x174   :  { %v662_v36 = vld [vmem:[#allocation8 + $0x790] sm:$0xff] }
 0x175   :  { %2105 = vmatpush2.bf16.msra.mxu0 %v5994_v57  ;;  %2146 = vmatpush2.bf16.msra.mxu1 %v6122_v58  ;;  %v578_v57 = vld [vmem:[#allocation8 + $0x4f0] sm:$0xff]  ;;  %v5940_v58 = vcombine.low %v454_v41, %v458_v42 }
 0x176   :  { %2106 = vmatprep.subr.bf16.mxu0 %v5987_v59  ;;  %2147 = vmatprep.subr.bf16.mxu1 %v6115_v60  ;;  %v6068_v59 = vcombine.low %v582_v44, %v586_v49  ;;  %v5933_v60 = vcombine.high %v446_v54, %v450_v55  ;;  %v6061_v61 = vcombine.high %v574_v56, %v578_v57  ;;  %v526_v42 = vld [vmem:[#allocation8 + $0x350] sm:$0xff] }
 0x177   :  { %v530_v44 = vld [vmem:[#allocation8 + $0x370] sm:$0xff] }
 0x178   :  { %v654_v49 = vld [vmem:[#allocation8 + $0x750] sm:$0xff] }
 0x179   :  { %2107 = vmatpush2.bf16.msra.mxu0 %v5986_v1  ;;  %2148 = vmatpush2.bf16.msra.mxu1 %v6114_v2  ;;  %v570_v1 = vld [vmem:[#allocation8 + $0x4b0] sm:$0xff]  ;;  %v5932_v2 = vcombine.low %v446_v54, %v450_v55 }
 0x17a   :  { %2108 = vmatprep.subr.bf16.mxu0 %v5979_v3  ;;  %2149 = vmatprep.subr.bf16.mxu1 %v6107_v4  ;;  %v6060_v3 = vcombine.low %v574_v56, %v578_v57  ;;  %v5925_v4 = vcombine.high %v438_v62, %v442_v63  ;;  %v6053_v5 = vcombine.high %v566_v0, %v570_v1  ;;  %v518_v55 = vld [vmem:[#allocation8 + $0x310] sm:$0xff] }
 0x17b   :  { %v522_v56 = vld [vmem:[#allocation8 + $0x330] sm:$0xff] }
 0x17c   :  { %v646_v57 = vld [vmem:[#allocation8 + $0x710] sm:$0xff] }
 0x17d   :  { %2109 = vmatpush2.bf16.msra.mxu0 %v5978_v13  ;;  %2150 = vmatpush2.bf16.msra.mxu1 %v6106_v14  ;;  %v562_v13 = vld [vmem:[#allocation8 + $0x470] sm:$0xff]  ;;  %v5924_v14 = vcombine.low %v438_v62, %v442_v63 }
 0x17e   :  { %2110 = vmatprep.subr.bf16.mxu0 %v5971_v15  ;;  %2151 = vmatprep.subr.bf16.mxu1 %v6099_v16  ;;  %v6052_v15 = vcombine.low %v566_v0, %v570_v1  ;;  %v5917_v16 = vcombine.high %v430_v6, %v434_v8  ;;  %v6045_v17 = vcombine.high %v558_v9, %v562_v13  ;;  %v510_v63 = vld [vmem:[#allocation8 + $0x2d0] sm:$0xff] }
 0x17f   :  { %v514_v0 = vld [vmem:[#allocation8 + $0x2f0] sm:$0xff] }
 0x180   :  { %v638_v1 = vld [vmem:[#allocation8 + $0x6d0] sm:$0xff] }
 0x181   :  { %2111 = vmatpush2.bf16.msra.mxu0 %v5970_v21  ;;  %2152 = vmatpush2.bf16.msra.mxu1 %v6098_v22  ;;  %v554_v21 = vld [vmem:[#allocation8 + $0x430] sm:$0xff]  ;;  %v5916_v22 = vcombine.low %v430_v6, %v434_v8 }
 0x182   :  { %2162 = vmatprep.subr.bf16.mxu0 %v5965_v23  ;;  %2203 = vmatprep.subr.bf16.mxu1 %v6093_v24  ;;  %v6044_v23 = vcombine.low %v558_v9, %v562_v13  ;;  %v5909_v24 = vcombine.high %v422_v18, %v426_v19  ;;  %v6037_v25 = vcombine.high %v550_v20, %v554_v21  ;;  %v502_v8 = vld [vmem:[#allocation8 + $0x290] sm:$0xff] }
 0x183   :  { %v506_v9 = vld [vmem:[#allocation8 + $0x2b0] sm:$0xff] }
 0x184   :  { %2113 = vmatmul.mubr.bf16.vlgmr.msra.gmra.mxu0 %v7670_v12  ;;  %2154 = vmatmul.mubr.bf16.vlgmr.msra.gmra.mxu1 %v7664_v7  ;;  %v630_v13 = vld [vmem:[#allocation8 + $0x690] sm:$0xff] }
 0x185   :  { %2163 = vmatpush1.bf16.msra.mxu0 %v5964_v29  ;;  %2194 = vmatprep.mubr.bf16.mxu0 %v7666_v10  ;;  %v674_v29 = vld [vmem:[#allocation8 + $0x7f0] sm:$0xff] }
 0x186   :  { %2204 = vmatpush1.bf16.msra.mxu1 %v6092_v30  ;;  %2235 = vmatprep.mubr.bf16.mxu1 %v7668_v11  ;;  %v5908_v30 = vcombine.low %v422_v18, %v426_v19  ;;  %v6157_v33 = vcombine.high %v670_v28, %v674_v29  ;;  %v494_v19 = vld [vmem:[#allocation8 + $0x250] sm:$0xff] }
 0x187   :  { %2164 = vmatprep.subr.bf16.mxu0 %v5957_v31  ;;  %2205 = vmatprep.subr.bf16.mxu1 %v6085_v32  ;;  %v6036_v31 = vcombine.low %v550_v20, %v554_v21  ;;  %v6029_v32 = vcombine.high %v542_v26, %v546_v27  ;;  %v498_v20 = vld [vmem:[#allocation8 + $0x270] sm:$0xff] }
 0x188   :  { %v622_v21 = vld [vmem:[#allocation8 + $0x650] sm:$0xff] }
 0x189   :  { %2165 = vmatpush1.bf16.msra.mxu0 %v5956_v37  ;;  %v666_v37 = vld [vmem:[#allocation8 + $0x7b0] sm:$0xff] }
 0x18a   :  { %2206 = vmatpush1.bf16.msra.mxu1 %v6084_v38  ;;  %2166 = vmatprep.subr.bf16.mxu0 %v5949_v39  ;;  %v6028_v38 = vcombine.low %v542_v26, %v546_v27  ;;  %v6156_v39 = vcombine.low %v670_v28, %v674_v29  ;;  %v6149_v41 = vcombine.high %v662_v36, %v666_v37  ;;  %v486_v27 = vld [vmem:[#allocation8 + $0x210] sm:$0xff] }
 0x18b   :  { %2207 = vmatprep.subr.bf16.mxu1 %v6077_v40  ;;  %v6021_v40 = vcombine.high %v534_v34, %v538_v35  ;;  %v490_v28 = vld [vmem:[#allocation8 + $0x230] sm:$0xff] }
 0x18c   :  { %v614_v29 = vld [vmem:[#allocation8 + $0x610] sm:$0xff] }
 0x18d   :  { %2167 = vmatpush1.bf16.msra.mxu0 %v5948_v50  ;;  %v658_v50 = vld [vmem:[#allocation8 + $0x770] sm:$0xff] }
 0x18e   :  { %2208 = vmatpush1.bf16.msra.mxu1 %v6076_v51  ;;  %2168 = vmatprep.subr.bf16.mxu0 %v5941_v52  ;;  %v6020_v51 = vcombine.low %v534_v34, %v538_v35  ;;  %v6148_v52 = vcombine.low %v662_v36, %v666_v37  ;;  %v6141_v54 = vcombine.high %v654_v49, %v658_v50  ;;  %v479_v35 = vld [vmem:[#allocation8 + $0x1d8] sm:$0xff] }
 0x18f   :  { %2209 = vmatprep.subr.bf16.mxu1 %v6069_v53  ;;  %v6013_v53 = vcombine.high %v526_v42, %v530_v44  ;;  %v483_v36 = vld [vmem:[#allocation8 + $0x1f8] sm:$0xff] }
 0x190   :  { %v607_v37 = vld [vmem:[#allocation8 + $0x5d8] sm:$0xff] }
 0x191   :  { %2169 = vmatpush1.bf16.msra.mxu0 %v5940_v58  ;;  %v650_v58 = vld [vmem:[#allocation8 + $0x730] sm:$0xff] }
 0x192   :  { %2210 = vmatpush1.bf16.msra.mxu1 %v6068_v59  ;;  %2170 = vmatprep.subr.bf16.mxu0 %v5933_v60  ;;  %v6012_v59 = vcombine.low %v526_v42, %v530_v44  ;;  %v6140_v60 = vcombine.low %v654_v49, %v658_v50  ;;  %v6133_v62 = vcombine.high %v646_v57, %v650_v58  ;;  %v471_v44 = vld [vmem:[#allocation8 + $0x198] sm:$0xff] }
 0x193   :  { %2211 = vmatprep.subr.bf16.mxu1 %v6061_v61  ;;  %v6005_v61 = vcombine.high %v518_v55, %v522_v56  ;;  %v475_v49 = vld [vmem:[#allocation8 + $0x1b8] sm:$0xff]  ;;  %v5966_v50 = vcombine.low %v479_v35, %v483_v36 }
 0x195   :  { %2171 = vmatpush1.bf16.msra.mxu0 %v5932_v2  ;;  %v642_v2 = vld [vmem:[#allocation8 + $0x6f0] sm:$0xff] }
 0x196   :  { %2212 = vmatpush1.bf16.msra.mxu1 %v6060_v3  ;;  %2172 = vmatprep.subr.bf16.mxu0 %v5925_v4  ;;  %v6004_v3 = vcombine.low %v518_v55, %v522_v56  ;;  %v6132_v4 = vcombine.low %v646_v57, %v650_v58  ;;  %v6125_v6 = vcombine.high %v638_v1, %v642_v2  ;;  %v463_v55 = vld [vmem:[#allocation8 + $0x158] sm:$0xff] }
 0x197   :  { %2213 = vmatprep.subr.bf16.mxu1 %v6053_v5  ;;  %v5997_v5 = vcombine.high %v510_v63, %v514_v0  ;;  %v467_v56 = vld [vmem:[#allocation8 + $0x178] sm:$0xff] }
 0x198   :  { %v591_v58 = vld [vmem:[#allocation8 + $0x558] sm:$0xff] }
 0x199   :  { %2173 = vmatpush1.bf16.msra.mxu0 %v5924_v14  ;;  %v634_v14 = vld [vmem:[#allocation8 + $0x6b0] sm:$0xff] }
 0x19a   :  { %2214 = vmatpush1.bf16.msra.mxu1 %v6052_v15  ;;  %2174 = vmatprep.subr.bf16.mxu0 %v5917_v16  ;;  %v5996_v15 = vcombine.low %v510_v63, %v514_v0  ;;  %v6124_v16 = vcombine.low %v638_v1, %v642_v2  ;;  %v6117_v18 = vcombine.high %v630_v13, %v634_v14  ;;  %v455_v0 = vld [vmem:[#allocation8 + $0x118] sm:$0xff] }
 0x19b   :  { %2215 = vmatprep.subr.bf16.mxu1 %v6045_v17  ;;  %v5989_v17 = vcombine.high %v502_v8, %v506_v9  ;;  %v459_v1 = vld [vmem:[#allocation8 + $0x138] sm:$0xff] }
 0x19c   :  { %v583_v2 = vld [vmem:[#allocation8 + $0x518] sm:$0xff] }
 0x19d   :  { %2175 = vmatpush1.bf16.msra.mxu0 %v5916_v22  ;;  %v626_v22 = vld [vmem:[#allocation8 + $0x670] sm:$0xff] }
 0x19e   :  { %2216 = vmatpush1.bf16.msra.mxu1 %v6044_v23  ;;  %2176 = vmatprep.subr.bf16.mxu0 %v5909_v24  ;;  %v5988_v23 = vcombine.low %v502_v8, %v506_v9  ;;  %v6116_v24 = vcombine.low %v630_v13, %v634_v14  ;;  %v6109_v26 = vcombine.high %v622_v21, %v626_v22  ;;  %v447_v8 = vld [vmem:[#allocation8 + $0xd8] sm:$0xff] }
 0x19f   :  { %2217 = vmatprep.subr.bf16.mxu1 %v6037_v25  ;;  %v5981_v25 = vcombine.high %v494_v19, %v498_v20  ;;  %v451_v9 = vld [vmem:[#allocation8 + $0xf8] sm:$0xff] }
 0x1a0   :  { %v575_v13 = vld [vmem:[#allocation8 + $0x4d8] sm:$0xff] }
 0x1a1   :  { %2177 = vmatpush1.bf16.msra.mxu0 %v5908_v30  ;;  %v618_v30 = vld [vmem:[#allocation8 + $0x630] sm:$0xff]  ;;  %v579_v14 = vld [vmem:[#allocation8 + $0x4f8] sm:$0xff] }
 0x1a2   :  { %2218 = vmatpush1.bf16.msra.mxu1 %v6036_v31  ;;  %2178 = vmatprep.subr.bf16.mxu0 %v6029_v32  ;;  %v5980_v31 = vcombine.low %v494_v19, %v498_v20  ;;  %v6108_v32 = vcombine.low %v622_v21, %v626_v22  ;;  %v6101_v34 = vcombine.high %v614_v29, %v618_v30  ;;  %v443_v19 = vld [vmem:[#allocation8 + $0xb8] sm:$0xff] }
 0x1a3   :  { %2219 = vmatprep.subr.bf16.mxu1 %v6157_v33  ;;  %v5973_v33 = vcombine.high %v486_v27, %v490_v28  ;;  %v567_v20 = vld [vmem:[#allocation8 + $0x498] sm:$0xff]  ;;  %v5934_v22 = vcombine.low %v447_v8, %v451_v9 }
 0x1a4   :  { %v571_v21 = vld [vmem:[#allocation8 + $0x4b8] sm:$0xff] }
 0x1a5   :  { %2179 = vmatpush2.bf16.msra.mxu0 %v6028_v38  ;;  %v611_v38 = vld [vmem:[#allocation8 + $0x5f8] sm:$0xff] }
 0x1a6   :  { %2220 = vmatpush2.bf16.msra.mxu1 %v6156_v39  ;;  %2180 = vmatprep.subr.bf16.mxu0 %v6021_v40  ;;  %v5972_v39 = vcombine.low %v486_v27, %v490_v28  ;;  %v6100_v40 = vcombine.low %v614_v29, %v618_v30  ;;  %v6095_v42 = vcombine.high %v607_v37, %v611_v38  ;;  %v435_v27 = vld [vmem:[#allocation8 + $0x78] sm:$0xff] }
 0x1a7   :  { %2221 = vmatprep.subr.bf16.mxu1 %v6149_v41  ;;  %v5967_v41 = vcombine.high %v479_v35, %v483_v36  ;;  %v559_v28 = vld [vmem:[#allocation8 + $0x458] sm:$0xff] }
 0x1a8   :  { %v563_v29 = vld [vmem:[#allocation8 + $0x478] sm:$0xff] }
 0x1a9   :  { %2181 = vmatpush2.bf16.msra.mxu0 %v6020_v51  ;;  %v599_v51 = vld [vmem:[#allocation8 + $0x598] sm:$0xff] }
 0x1aa   :  { %2222 = vmatpush2.bf16.msra.mxu1 %v6148_v52  ;;  %2182 = vmatprep.subr.bf16.mxu0 %v6013_v53  ;;  %v603_v52 = vld [vmem:[#allocation8 + $0x5b8] sm:$0xff]  ;;  %v6094_v53 = vcombine.low %v607_v37, %v611_v38 }
 0x1ab   :  { %2223 = vmatprep.subr.bf16.mxu1 %v6141_v54  ;;  %v5959_v54 = vcombine.high %v471_v44, %v475_v49  ;;  %v6087_v57 = vcombine.high %v599_v51, %v603_v52  ;;  %v427_v35 = vld [vmem:[#allocation8 + $0x38] sm:$0xff] }
 0x1ac   :  { %v551_v36 = vld [vmem:[#allocation8 + $0x418] sm:$0xff] }
 0x1ad   :  { %2183 = vmatpush2.bf16.msra.mxu0 %v6012_v59  ;;  %v595_v59 = vld [vmem:[#allocation8 + $0x578] sm:$0xff] }
 0x1ae   :  { %2224 = vmatpush2.bf16.msra.mxu1 %v6140_v60  ;;  %2184 = vmatprep.subr.bf16.mxu0 %v6005_v61  ;;  %v5958_v60 = vcombine.low %v471_v44, %v475_v49  ;;  %v6086_v61 = vcombine.low %v599_v51, %v603_v52  ;;  %v6079_v63 = vcombine.high %v591_v58, %v595_v59  ;;  %v555_v37 = vld [vmem:[#allocation8 + $0x438] sm:$0xff] }
 0x1af   :  { %2225 = vmatprep.subr.bf16.mxu1 %v6133_v62  ;;  %v5951_v62 = vcombine.high %v463_v55, %v467_v56  ;;  %v547_v44 = vld [vmem:[#allocation8 + $0x3f8] sm:$0xff]  ;;  %v6038_v52 = vcombine.low %v551_v36, %v555_v37 }
 0x1b0   :  { %v671_v49 = vld [vmem:[#allocation8 + $0x7d8] sm:$0xff] }
 0x1b1   :  { %2185 = vmatpush2.bf16.msra.mxu0 %v6004_v3  ;;  %v587_v3 = vld [vmem:[#allocation8 + $0x538] sm:$0xff] }
 0x1b2   :  { %2226 = vmatpush2.bf16.msra.mxu1 %v6132_v4  ;;  %2186 = vmatprep.subr.bf16.mxu0 %v5997_v5  ;;  %v5950_v4 = vcombine.low %v463_v55, %v467_v56  ;;  %v6078_v5 = vcombine.low %v591_v58, %v595_v59  ;;  %v535_v55 = vld [vmem:[#allocation8 + $0x398] sm:$0xff] }
 0x1b3   :  { %2227 = vmatprep.subr.bf16.mxu1 %v6125_v6  ;;  %v5943_v6 = vcombine.high %v455_v0, %v459_v1  ;;  %v539_v56 = vld [vmem:[#allocation8 + $0x3b8] sm:$0xff] }
 0x1b4   :  { %v667_v58 = vld [vmem:[#allocation8 + $0x7b8] sm:$0xff] }
 0x1b5   :  { %2187 = vmatpush2.bf16.msra.mxu0 %v5996_v15  ;;  %v6070_v15 = vcombine.low %v583_v2, %v587_v3 }
 0x1b6   :  { %2228 = vmatpush2.bf16.msra.mxu1 %v6124_v16  ;;  %2188 = vmatprep.subr.bf16.mxu0 %v5989_v17  ;;  %v5935_v16 = vcombine.high %v447_v8, %v451_v9  ;;  %v6063_v17 = vcombine.high %v575_v13, %v579_v14  ;;  %v523_v8 = vld [vmem:[#allocation8 + $0x338] sm:$0xff] }
 0x1b7   :  { %2229 = vmatprep.subr.bf16.mxu1 %v6117_v18  ;;  %v439_v18 = vld [vmem:[#allocation8 + $0x98] sm:$0xff] }
 0x1b8   :  { %v5926_v30 = vcombine.low %v439_v18, %v443_v19  ;;  %v647_v9 = vld [vmem:[#allocation8 + $0x718] sm:$0xff] }
 0x1b9   :  { %2189 = vmatpush2.bf16.msra.mxu0 %v5988_v23  ;;  %v6062_v23 = vcombine.low %v575_v13, %v579_v14  ;;  %v651_v13 = vld [vmem:[#allocation8 + $0x738] sm:$0xff] }
 0x1ba   :  { %2230 = vmatpush2.bf16.msra.mxu1 %v6116_v24  ;;  %2190 = vmatprep.subr.bf16.mxu0 %v5981_v25  ;;  %v5927_v24 = vcombine.high %v439_v18, %v443_v19  ;;  %v6055_v25 = vcombine.high %v567_v20, %v571_v21  ;;  %v515_v18 = vld [vmem:[#allocation8 + $0x2f8] sm:$0xff] }
 0x1bb   :  { %2231 = vmatprep.subr.bf16.mxu1 %v6109_v26  ;;  %v431_v26 = vld [vmem:[#allocation8 + $0x58] sm:$0xff] }
 0x1bc   :  { %v5918_v38 = vcombine.low %v431_v26, %v435_v27  ;;  %v639_v19 = vld [vmem:[#allocation8 + $0x6d8] sm:$0xff] }
 0x1bd   :  { %2191 = vmatpush2.bf16.msra.mxu0 %v5980_v31  ;;  %v6054_v31 = vcombine.low %v567_v20, %v571_v21  ;;  %v643_v20 = vld [vmem:[#allocation8 + $0x6f8] sm:$0xff] }
 0x1be   :  { %2232 = vmatpush2.bf16.msra.mxu1 %v6108_v32  ;;  %2192 = vmatprep.subr.bf16.mxu0 %v5973_v33  ;;  %v5919_v32 = vcombine.high %v431_v26, %v435_v27  ;;  %v6047_v33 = vcombine.high %v559_v28, %v563_v29  ;;  %v507_v26 = vld [vmem:[#allocation8 + $0x2b8] sm:$0xff] }
 0x1bf   :  { %2233 = vmatprep.subr.bf16.mxu1 %v6101_v34  ;;  %v423_v34 = vld [vmem:[#allocation8 + $0x18] sm:$0xff] }
 0x1c0   :  { %v5910_v51 = vcombine.low %v423_v34, %v427_v35  ;;  %v631_v27 = vld [vmem:[#allocation8 + $0x698] sm:$0xff] }
 0x1c1   :  { %2193 = vmatpush2.bf16.msra.mxu0 %v5972_v39  ;;  %v6046_v39 = vcombine.low %v559_v28, %v563_v29  ;;  %v635_v28 = vld [vmem:[#allocation8 + $0x6b8] sm:$0xff] }
 0x1c2   :  { %2234 = vmatpush2.bf16.msra.mxu1 %v6100_v40  ;;  %2244 = vmatprep.subr.bf16.mxu0 %v5967_v41  ;;  %v5911_v40 = vcombine.high %v423_v34, %v427_v35  ;;  %v6039_v41 = vcombine.high %v551_v36, %v555_v37  ;;  %v499_v34 = vld [vmem:[#allocation8 + $0x278] sm:$0xff] }
 0x1c3   :  { %2285 = vmatprep.subr.bf16.mxu1 %v6095_v42  ;;  %v543_v42 = vld [vmem:[#allocation8 + $0x3d8] sm:$0xff] }
 0x1c4   :  { %2195 = vmatmul.mubr.bf16.vlgmr.msra.gmra.mxu0 %v7670_v12  ;;  %v6030_v59 = vcombine.low %v543_v42, %v547_v44  ;;  %v623_v35 = vld [vmem:[#allocation8 + $0x658] sm:$0xff] }
 0x1c5   :  { %2236 = vmatmul.mubr.bf16.vlgmr.msra.gmra.mxu1 %v7664_v7  ;;  %2245 = vmatpush1.bf16.msra.mxu0 %v5966_v50  ;;  %v675_v50 = vld [vmem:[#allocation8 + $0x7f8] sm:$0xff] }
 0x1c6   :  { %2276 = vmatprep.mubr.bf16.mxu0 %v7666_v10  ;;  %2286 = vmatpush1.bf16.msra.mxu1 %v6094_v53  ;;  %v6071_v10 = vcombine.high %v583_v2, %v587_v3  ;;  %v6031_v53 = vcombine.high %v543_v42, %v547_v44  ;;  %v659_v2 = vld [vmem:[#allocation8 + $0x778] sm:$0xff]  ;;  %v6022_v3 = vcombine.low %v535_v55, %v539_v56 }
 0x1c7   :  { %2317 = vmatprep.mubr.bf16.mxu1 %v7668_v11  ;;  %2246 = vmatprep.subr.bf16.mxu0 %v5959_v54  ;;  %v5942_v11 = vcombine.low %v455_v0, %v459_v1  ;;  %v6159_v54 = vcombine.high %v671_v49, %v675_v50  ;;  %v531_v0 = vld [vmem:[#allocation8 + $0x378] sm:$0xff] }
 0x1c8   :  { %2287 = vmatprep.subr.bf16.mxu1 %v6087_v57  ;;  %v663_v57 = vld [vmem:[#allocation8 + $0x798] sm:$0xff] }
 0x1c9   :  { %2247 = vmatpush1.bf16.msra.mxu0 %v5958_v60  ;;  %v6158_v60 = vcombine.low %v671_v49, %v675_v50  ;;  %v655_v1 = vld [vmem:[#allocation8 + $0x758] sm:$0xff] }
 0x1ca   :  { %2288 = vmatpush1.bf16.msra.mxu1 %v6086_v61  ;;  %2248 = vmatprep.subr.bf16.mxu0 %v5951_v62  ;;  %v6023_v61 = vcombine.high %v535_v55, %v539_v56  ;;  %v6151_v62 = vcombine.high %v663_v57, %v667_v58  ;;  %v627_v36 = vld [vmem:[#allocation8 + $0x678] sm:$0xff]  ;;  %v6761_v56 = vld [vmem:[#allocation11 + $0x18c] ss:$28 sps:$4 sm:$0xff]  }
 0x1cb   :  { %2289 = vmatprep.subr.bf16.mxu1 %v6079_v63  ;;  %v527_v63 = vld [vmem:[#allocation8 + $0x358] sm:$0xff] }
 0x1cc   :  { %v6014_v14 = vcombine.low %v527_v63, %v531_v0  ;;  %v491_v42 = vld [vmem:[#allocation8 + $0x238] sm:$0xff] }
 0x1cd   :  { %2249 = vmatpush1.bf16.msra.mxu0 %v5950_v4  ;;  %v6150_v4 = vcombine.low %v663_v57, %v667_v58  ;;  %v615_v44 = vld [vmem:[#allocation8 + $0x618] sm:$0xff]  ;;  %v6773_v57 = vld [vmem:[#allocation11 + $0x50c] ss:$28 sps:$4 sm:$0xff]  }
 0x1ce   :  { %2290 = vmatpush1.bf16.msra.mxu1 %v6078_v5  ;;  %2250 = vmatprep.subr.bf16.mxu0 %v5943_v6  ;;  %v6015_v5 = vcombine.high %v527_v63, %v531_v0  ;;  %v6143_v6 = vcombine.high %v655_v1, %v659_v2  ;;  %v619_v49 = vld [vmem:[#allocation8 + $0x638] sm:$0xff]  ;;  %v6759_v58 = vld [vmem:[#allocation11 + $0x188] ss:$28 sps:$4 sm:$0xff]  }
 0x1cf   :  { %2291 = vmatprep.subr.bf16.mxu1 %v6071_v10  ;;  %v519_v10 = vld [vmem:[#allocation8 + $0x318] sm:$0xff]  ;;  %v6102_v55 = vcombine.low %v615_v44, %v619_v49 }
 0x1d0   :  { %v6006_v21 = vcombine.low %v519_v10, %v523_v8  ;;  %v6779_v63 = vld [vmem:[#allocation11 + $0x4d4] ss:$28 sps:$4 sm:$0xff]  }
 0x1d1   :  { %2251 = vmatpush1.bf16.msra.mxu0 %v5942_v11  ;;  %v6142_v11 = vcombine.low %v655_v1, %v659_v2  ;;  %v6762_v2 = vld [vmem:[#allocation11 + $0x150] ss:$28 sps:$4 sm:$0xff]  }
 0x1d2   :  { %2292 = vmatpush1.bf16.msra.mxu1 %v6070_v15  ;;  %2252 = vmatprep.subr.bf16.mxu0 %v5935_v16  ;;  %v6007_v15 = vcombine.high %v519_v10, %v523_v8  ;;  %v6135_v16 = vcombine.high %v647_v9, %v651_v13  ;;  %v6785_v8 = vld [vmem:[#allocation11 + $0x49c] ss:$28 sps:$4 sm:$0xff]  }
 0x1d3   :  { %2293 = vmatprep.subr.bf16.mxu1 %v6063_v17  ;;  %v511_v17 = vld [vmem:[#allocation8 + $0x2d8] sm:$0xff] }
 0x1d4   :  { %v5998_v29 = vcombine.low %v511_v17, %v515_v18 }
 0x1d5   :  { %2253 = vmatpush1.bf16.msra.mxu0 %v5934_v22  ;;  %v6134_v22 = vcombine.low %v647_v9, %v651_v13 }
 0x1d6   :  { %2294 = vmatpush1.bf16.msra.mxu1 %v6062_v23  ;;  %2254 = vmatprep.subr.bf16.mxu0 %v5927_v24  ;;  %v5999_v23 = vcombine.high %v511_v17, %v515_v18  ;;  %v6127_v24 = vcombine.high %v639_v19, %v643_v20  ;;  %v6791_v18 = vld [vmem:[#allocation11 + $0x464] ss:$28 sps:$4 sm:$0xff]  }
 0x1d7   :  { %2295 = vmatprep.subr.bf16.mxu1 %v6055_v25  ;;  %v503_v25 = vld [vmem:[#allocation8 + $0x298] sm:$0xff] }
 0x1d8   :  { %v5990_v37 = vcombine.low %v503_v25, %v507_v26 }
 0x1d9   :  { %2255 = vmatpush1.bf16.msra.mxu0 %v5926_v30  ;;  %v6126_v30 = vcombine.low %v639_v19, %v643_v20  ;;  %v6768_v20 = vld [vmem:[#allocation11 + $0xe0] ss:$28 sps:$4 sm:$0xff]  }
 0x1da   :  { %2296 = vmatpush1.bf16.msra.mxu1 %v6054_v31  ;;  %2256 = vmatprep.subr.bf16.mxu0 %v5919_v32  ;;  %v5991_v31 = vcombine.high %v503_v25, %v507_v26  ;;  %v6119_v32 = vcombine.high %v631_v27, %v635_v28  ;;  %v6782_v25 = vld [vmem:[#allocation11 + $0x74] ss:$28 sps:$4 sm:$0xff]   ;;  %v6795_v26 = vld [vmem:[#allocation11 + $0x428] ss:$28 sps:$4 sm:$0xff]  }
 0x1db   :  { %2297 = vmatprep.subr.bf16.mxu1 %v6047_v33  ;;  %v495_v33 = vld [vmem:[#allocation8 + $0x258] sm:$0xff] }
 0x1dc   :  { %v5982_v50 = vcombine.low %v495_v33, %v499_v34 }
 0x1dd   :  { %2257 = vmatpush1.bf16.msra.mxu0 %v5918_v38  ;;  %v6118_v38 = vcombine.low %v631_v27, %v635_v28  ;;  %v6803_v27 = vld [vmem:[#allocation11 + $0x3f4] ss:$28 sps:$4 sm:$0xff]  }
 0x1de   :  { %2298 = vmatpush1.bf16.msra.mxu1 %v6046_v39  ;;  %2258 = vmatprep.subr.bf16.mxu0 %v5911_v40  ;;  %v5983_v39 = vcombine.high %v495_v33, %v499_v34  ;;  %v6111_v40 = vcombine.high %v623_v35, %v627_v36  ;;  %v6780_v28 = vld [vmem:[#allocation11 + $0x70] ss:$28 sps:$4 sm:$0xff]   ;;  %v6794_v33 = vld [vmem:[#allocation11 + $0x4] ss:$28 sps:$4 sm:$0xff]   ;;  %v6807_v34 = vld [vmem:[#allocation11 + $0x3b8] ss:$28 sps:$4 sm:$0xff]  }
 0x1df   :  { %2299 = vmatprep.subr.bf16.mxu1 %v6039_v41  ;;  %v487_v41 = vld [vmem:[#allocation8 + $0x218] sm:$0xff] }
 0x1e1   :  { %2259 = vmatpush1.bf16.msra.mxu0 %v5910_v51  ;;  %v6110_v51 = vcombine.low %v623_v35, %v627_v36  ;;  %v6815_v35 = vld [vmem:[#allocation11 + $0x384] ss:$28 sps:$4 sm:$0xff]  }
 0x1e2   :  { %2300 = vmatpush1.bf16.msra.mxu1 %v6038_v52  ;;  %2260 = vmatprep.subr.bf16.mxu0 %v6031_v53  ;;  %v5975_v52 = vcombine.high %v487_v41, %v491_v42  ;;  %v6103_v53 = vcombine.high %v615_v44, %v619_v49  ;;  %v6792_v36 = vld [vmem:[#allocation11] ss:$28 sps:$4 sm:$0xff]   ;;  %v6827_v44 = vld [vmem:[#allocation11 + $0x694] ss:$28 sps:$4 sm:$0xff]  }
 0x1e3   :  { %2301 = vmatprep.subr.bf16.mxu1 %v6159_v54  ;;  %v5974_v54 = vcombine.low %v487_v41, %v491_v42  ;;  %v6806_v41 = vld [vmem:[#allocation11 + $0x314] ss:$28 sps:$4 sm:$0xff]   ;;  %v6819_v42 = vld [vmem:[#allocation11 + $0x6c8] ss:$28 sps:$4 sm:$0xff]  }
 0x1e4   :  { %v6804_v49 = vld [vmem:[#allocation11 + $0x310] ss:$28 sps:$4 sm:$0xff]  }
 0x1e5   :  { %2261 = vmatpush2.bf16.msra.mxu0 %v6030_v59  ;;  %v7686_v59 = vld [vmem:[#allocation10] sm:$0xff] }
 0x1e6   :  { %2302 = vmatpush2.bf16.msra.mxu1 %v6158_v60  ;;  %2262 = vmatprep.subr.bf16.mxu0 %v6023_v61  ;;  %v6764_v60 = vld [vmem:[#allocation11 + $0x154] ss:$28 sps:$4 sm:$0xff]   ;;  %v6771_v61 = vld [vmem:[#allocation11 + $0x508] ss:$28 sps:$4 sm:$0xff]  }
 0x1e7   :  { %2303 = vmatprep.subr.bf16.mxu1 %v6151_v62  ;;  %v685_v62 = vrot.slane %v7686_v59, %v7655_v47 }
 0x1e9   :  { %2263 = vmatpush2.bf16.msra.mxu0 %v6022_v3 }
 0x1ea   :  { %2304 = vmatpush2.bf16.msra.mxu1 %v6150_v4  ;;  %2264 = vmatprep.subr.bf16.mxu0 %v6015_v5  ;;  %v6767_v5 = vld [vmem:[#allocation11 + $0x11c] ss:$28 sps:$4 sm:$0xff]  }
 0x1eb   :  { %2305 = vmatprep.subr.bf16.mxu1 %v6143_v6  ;;  %v6777_v6 = vld [vmem:[#allocation11 + $0x4d0] ss:$28 sps:$4 sm:$0xff]  }
 0x1ed   :  { %2265 = vmatpush2.bf16.msra.mxu0 %v6014_v14  ;;  %v6765_v14 = vld [vmem:[#allocation11 + $0x118] ss:$28 sps:$4 sm:$0xff]  }
 0x1ee   :  { %2306 = vmatpush2.bf16.msra.mxu1 %v6142_v11  ;;  %2266 = vmatprep.subr.bf16.mxu0 %v6007_v15 }
 0x1ef   :  { %2307 = vmatprep.subr.bf16.mxu1 %v6135_v16  ;;  %v6783_v16 = vld [vmem:[#allocation11 + $0x498] ss:$28 sps:$4 sm:$0xff]  }
 0x1f1   :  { %2267 = vmatpush2.bf16.msra.mxu0 %v6006_v21  ;;  %v6776_v21 = vld [vmem:[#allocation11 + $0xac] ss:$28 sps:$4 sm:$0xff]  }
 0x1f2   :  { %2308 = vmatpush2.bf16.msra.mxu1 %v6134_v22  ;;  %2268 = vmatprep.subr.bf16.mxu0 %v5999_v23  ;;  %v6789_v22 = vld [vmem:[#allocation11 + $0x460] ss:$28 sps:$4 sm:$0xff]   ;;  %v6797_v23 = vld [vmem:[#allocation11 + $0x42c] ss:$28 sps:$4 sm:$0xff]  }
 0x1f3   :  { %2309 = vmatprep.subr.bf16.mxu1 %v6127_v24  ;;  %v6774_v24 = vld [vmem:[#allocation11 + $0xa8] ss:$28 sps:$4 sm:$0xff]  }
 0x1f5   :  { %2269 = vmatpush2.bf16.msra.mxu0 %v5998_v29  ;;  %v6788_v29 = vld [vmem:[#allocation11 + $0x3c] ss:$28 sps:$4 sm:$0xff]  }
 0x1f6   :  { %2310 = vmatpush2.bf16.msra.mxu1 %v6126_v30  ;;  %2270 = vmatprep.subr.bf16.mxu0 %v5991_v31  ;;  %v6801_v30 = vld [vmem:[#allocation11 + $0x3f0] ss:$28 sps:$4 sm:$0xff]   ;;  %v6809_v31 = vld [vmem:[#allocation11 + $0x3bc] ss:$28 sps:$4 sm:$0xff]  }
 0x1f7   :  { %2311 = vmatprep.subr.bf16.mxu1 %v6119_v32  ;;  %v6786_v32 = vld [vmem:[#allocation11 + $0x38] ss:$28 sps:$4 sm:$0xff]  }
 0x1f9   :  { %2271 = vmatpush2.bf16.msra.mxu0 %v5990_v37  ;;  %v6800_v37 = vld [vmem:[#allocation11 + $0x34c] ss:$28 sps:$4 sm:$0xff]  }
 0x1fa   :  { %2312 = vmatpush2.bf16.msra.mxu1 %v6118_v38  ;;  %2272 = vmatprep.subr.bf16.mxu0 %v5983_v39  ;;  %v6813_v38 = vld [vmem:[#allocation11 + $0x380] ss:$28 sps:$4 sm:$0xff]   ;;  %v6821_v39 = vld [vmem:[#allocation11 + $0x6cc] ss:$28 sps:$4 sm:$0xff]  }
 0x1fb   :  { %2313 = vmatprep.subr.bf16.mxu1 %v6111_v40  ;;  %v6798_v40 = vld [vmem:[#allocation11 + $0x348] ss:$28 sps:$4 sm:$0xff]  }
 0x1fd   :  { %2273 = vmatpush2.bf16.msra.mxu0 %v5982_v50  ;;  %v6812_v50 = vld [vmem:[#allocation11 + $0x2dc] ss:$28 sps:$4 sm:$0xff]  }
 0x1fe   :  { %2314 = vmatpush2.bf16.msra.mxu1 %v6110_v51  ;;  %2274 = vmatprep.subr.bf16.mxu0 %v5975_v52  ;;  %v6825_v51 = vld [vmem:[#allocation11 + $0x690] ss:$28 sps:$4 sm:$0xff]   ;;  %v6833_v52 = vld [vmem:[#allocation11 + $0x65c] ss:$28 sps:$4 sm:$0xff]  }
 0x1ff   :  { %2315 = vmatprep.subr.bf16.mxu1 %v6103_v53  ;;  %v6810_v53 = vld [vmem:[#allocation11 + $0x2d8] ss:$28 sps:$4 sm:$0xff]  }
 0x201   :  { %2275 = vmatpush2.bf16.msra.mxu0 %v5974_v54  ;;  %v6818_v54 = vld [vmem:[#allocation11 + $0x2a4] ss:$28 sps:$4 sm:$0xff]  }
 0x202   :  { %2316 = vmatpush2.bf16.msra.mxu1 %v6102_v55  ;;  %5195 = vmatprep.subr.bf16.mxu0 %v6761_v56  ;;  %v6831_v55 = vld [vmem:[#allocation11 + $0x658] ss:$28 sps:$4 sm:$0xff]   ;;  %v6839_v56 = vld [vmem:[#allocation11 + $0x624] ss:$28 sps:$4 sm:$0xff]  }
 0x203   :  { %5236 = vmatprep.subr.bf16.mxu1 %v6773_v57  ;;  %v6816_v57 = vld [vmem:[#allocation11 + $0x2a0] ss:$28 sps:$4 sm:$0xff]  }
 0x204   :  { %2277 = vmatmul.mubr.bf16.vlgmr.msra.gmra.mxu0 %v7670_v12  ;;  %v7691_v0 = vpop.f32.mrf.mxu0  ;;  %v7693_v1 = vpop.f32.mrf.mxu1 }
 0x205   :  { %2318 = vmatmul.mubr.bf16.vlgmr.msra.gmra.mxu1 %v7664_v7  ;;  %5196 = vmatpush1.bf16.msra.mxu0 %v6759_v58  ;;  %v6770_v7 = vld [vmem:[#allocation11 + $0xe4] ss:$28 sps:$4 sm:$0xff]   ;;  %v6824_v58 = vld [vmem:[#allocation11 + $0x26c] ss:$28 sps:$4 sm:$0xff]  }
 0x206   :  { %v2034_v3 = vpop.f32.mrf.mxu0  ;;  %v2075_v4 = vpop.f32.mrf.mxu1  ;;  %5197 = vmatprep.subr.bf16.mxu0 %v6764_v60  ;;  %5237 = vmatpush1.bf16.msra.mxu1 %v6771_v61  ;;  %v6837_v60 = vld [vmem:[#allocation11 + $0x620] ss:$28 sps:$4 sm:$0xff]   ;;  %v6845_v61 = vld [vmem:[#allocation11 + $0x5ec] ss:$28 sps:$4 sm:$0xff]  }
 0x207   :  { %v2035_v10 = vadd.f32 %v2034_v3, %v685_v62  ;;  %5238 = vmatprep.subr.bf16.mxu1 %v6779_v63  ;;  %v6822_v62 = vld [vmem:[#allocation11 + $0x268] ss:$28 sps:$4 sm:$0xff]   ;;  %v681_v63 = vrot.slane %v7686_v59, %v7649_v45 }
 0x208   :  { %v2036_v9 = vpop.f32.mrf.mxu0  ;;  %v2077_v13 = vpop.f32.mrf.mxu1  ;;  %v6843_v3 = vld [vmem:[#allocation11 + $0x5e8] ss:$28 sps:$4 sm:$0xff]  }
 0x209   :  { %v2076_v12 = vadd.f32 %v2075_v4, %v2035_v10  ;;  %5198 = vmatpush1.bf16.msra.mxu0 %v6762_v2  ;;  %v6830_v2 = vld [vmem:[#allocation11 + $0x234] ss:$28 sps:$4 sm:$0xff]   ;;  %v6836_v10 = vld [vmem:[#allocation11 + $0x1fc] ss:$28 sps:$4 sm:$0xff]  }
 0x20a   :  { %v2037_v11 = vpop.f32.mrf.mxu0  ;;  %v2078_v15 = vpop.f32.mrf.mxu1  ;;  %5199 = vmatprep.subr.bf16.mxu0 %v6767_v5  ;;  %5239 = vmatpush1.bf16.msra.mxu1 %v6777_v6  ;;  %v6848_v4 = vld [vmem:[#allocation11 + $0x5b4] ss:$28 sps:$4 sm:$0xff]   ;;  %v2033_v6 = vadd.f32 %v7691_v0, %v681_v63  ;;  %v6851_v9 = vld [vmem:[#allocation11 + $0x57c] ss:$28 sps:$4 sm:$0xff]  }
 0x20b   :  { %v2327_v17 = vmax.f32 %v2076_v12, 0.0  ;;  %5240 = vmatprep.subr.bf16.mxu1 %v6785_v8  ;;  %v6828_v5 = vld [vmem:[#allocation11 + $0x230] ss:$28 sps:$4 sm:$0xff]   ;;  %v6834_v13 = vld [vmem:[#allocation11 + $0x1f8] ss:$28 sps:$4 sm:$0xff]  }
 0x20c   :  { %v6846_v8 = vld [vmem:[#allocation11 + $0x5b0] ss:$28 sps:$4 sm:$0xff]   ;;  %v2074_v12 = vadd.f32 %v7693_v1, %v2033_v6  ;;  %v6849_v11 = vld [vmem:[#allocation11 + $0x578] ss:$28 sps:$4 sm:$0xff]   ;;  %v6854_v15 = vld [vmem:[#allocation11 + $0x544] ss:$28 sps:$4 sm:$0xff]  }
 0x20d   :  { %v7696_v19 = vpack.c.bf16 %v2327_v17, %v2327_v17  ;;  %5200 = vmatpush1.bf16.msra.mxu0 %v6765_v14  ;;  %v6842_v14 = vld [vmem:[#allocation11 + $0x1c4] ss:$28 sps:$4 sm:$0xff]   ;;  %v6857_v17 = vld [vmem:[#allocation11 + $0x88c] ss:$28 sps:$4 sm:$0xff]  }
 0x20e   :  { %5201 = vmatprep.subr.bf16.mxu0 %v6770_v7  ;;  %5241 = vmatpush1.bf16.msra.mxu1 %v6783_v16  ;;  %v6840_v7 = vld [vmem:[#allocation11 + $0x1c0] ss:$28 sps:$4 sm:$0xff]   ;;  %v2326_v16 = vmax.f32 %v2074_v12, 0.0  ;;  %v6855_v1 = vld [vmem:[#allocation11 + $0x888] ss:$28 sps:$4 sm:$0xff]  }
 0x20f   :  { %5227 = vmatprep.mubr.bf16.mxu0 %v7696_v19  ;;  %5242 = vmatprep.subr.bf16.mxu1 %v6791_v18  ;;  %v6852_v0 = vld [vmem:[#allocation11 + $0x540] ss:$28 sps:$4 sm:$0xff]   ;;  %v6905_v18 = vld [vmem:[#allocation11 + $0xc0c] ss:$28 sps:$4 sm:$0xff]  }
 0x210   :  { %v6921_v63 = vld [vmem:[#allocation11 + $0xb60] ss:$28 sps:$4 sm:$0xff]   ;;  %v6881_v6 = vld [vmem:[#allocation11 + $0xa4c] ss:$28 sps:$4 sm:$0xff]  }
 0x211   :  { %5202 = vmatpush1.bf16.msra.mxu0 %v6768_v20  ;;  %v689_v20 = vrot.slane %v7686_v59, %v7652_v46  ;;  %v6941_v12 = vld [vmem:[#allocation11 + $0xabc] ss:$28 sps:$4 sm:$0xff]  }
 0x212   :  { %5203 = vmatprep.subr.bf16.mxu0 %v6776_v21  ;;  %5243 = vmatpush1.bf16.msra.mxu1 %v6789_v22  ;;  %v7705_v21 = vpack.c.bf16 %v2326_v16, %v2326_v16  ;;  %v6860_v22 = vld [vmem:[#allocation11 + $0x854] ss:$28 sps:$4 sm:$0xff]  }
 0x213   :  { %5244 = vmatprep.subr.bf16.mxu1 %v6797_v23  ;;  %v693_v23 = vrot.slane %v7686_v59, %v7658_v48  ;;  %v6885_v16 = vld [vmem:[#allocation11 + $0x9d8] ss:$28 sps:$4 sm:$0xff]  }
 0x215   :  { %5204 = vmatpush1.bf16.msra.mxu0 %v6774_v24 }
 0x216   :  { %5205 = vmatprep.subr.bf16.mxu0 %v6782_v25  ;;  %5245 = vmatpush1.bf16.msra.mxu1 %v6795_v26 }
 0x217   :  { %5246 = vmatprep.subr.bf16.mxu1 %v6803_v27  ;;  %v6858_v27 = vld [vmem:[#allocation11 + $0x850] ss:$28 sps:$4 sm:$0xff]  }
 0x219   :  { %5206 = vmatpush1.bf16.msra.mxu0 %v6780_v28 }
 0x21a   :  { %5207 = vmatprep.subr.bf16.mxu0 %v6788_v29  ;;  %5247 = vmatpush1.bf16.msra.mxu1 %v6801_v30  ;;  %v6863_v30 = vld [vmem:[#allocation11 + $0x81c] ss:$28 sps:$4 sm:$0xff]  }
 0x21b   :  { %5248 = vmatprep.subr.bf16.mxu1 %v6809_v31 }
 0x21d   :  { %5208 = vmatpush1.bf16.msra.mxu0 %v6786_v32 }
 0x21e   :  { %5209 = vmatprep.subr.bf16.mxu0 %v6794_v33  ;;  %5249 = vmatpush1.bf16.msra.mxu1 %v6807_v34 }
 0x21f   :  { %5250 = vmatprep.subr.bf16.mxu1 %v6815_v35 }
 0x221   :  { %5210 = vmatpush1.bf16.msra.mxu0 %v6792_v36  ;;  %v6861_v36 = vld [vmem:[#allocation11 + $0x818] ss:$28 sps:$4 sm:$0xff]  }
 0x222   :  { %5211 = vmatprep.subr.bf16.mxu0 %v6800_v37  ;;  %5251 = vmatpush1.bf16.msra.mxu1 %v6813_v38 }
 0x223   :  { %5252 = vmatprep.subr.bf16.mxu1 %v6821_v39 }
 0x225   :  { %5212 = vmatpush2.bf16.msra.mxu0 %v6798_v40  ;;  %v6866_v40 = vld [vmem:[#allocation11 + $0x7e4] ss:$28 sps:$4 sm:$0xff]  }
 0x226   :  { %5213 = vmatprep.subr.bf16.mxu0 %v6806_v41  ;;  %5253 = vmatpush2.bf16.msra.mxu1 %v6819_v42 }
 0x227   :  { %5254 = vmatprep.subr.bf16.mxu1 %v6827_v44  ;;  %v6864_v44 = vld [vmem:[#allocation11 + $0x7e0] ss:$28 sps:$4 sm:$0xff]  }
 0x229   :  { %5214 = vmatpush2.bf16.msra.mxu0 %v6804_v49  ;;  %v6903_v49 = vld [vmem:[#allocation11 + $0xc08] ss:$28 sps:$4 sm:$0xff]  }
 0x22a   :  { %5215 = vmatprep.subr.bf16.mxu0 %v6812_v50  ;;  %5255 = vmatpush2.bf16.msra.mxu1 %v6825_v51  ;;  %v6869_v51 = vld [vmem:[#allocation11 + $0x7ac] ss:$28 sps:$4 sm:$0xff]  }
 0x22b   :  { %5256 = vmatprep.subr.bf16.mxu1 %v6833_v52  ;;  %v6911_v52 = vld [vmem:[#allocation11 + $0xbd4] ss:$28 sps:$4 sm:$0xff]  }
 0x22d   :  { %5216 = vmatpush2.bf16.msra.mxu0 %v6810_v53  ;;  %v6867_v53 = vld [vmem:[#allocation11 + $0x7a8] ss:$28 sps:$4 sm:$0xff]  }
 0x22e   :  { %5217 = vmatprep.subr.bf16.mxu0 %v6818_v54  ;;  %5257 = vmatpush2.bf16.msra.mxu1 %v6831_v55  ;;  %v6909_v54 = vld [vmem:[#allocation11 + $0xbd0] ss:$28 sps:$4 sm:$0xff]  }
 0x22f   :  { %5258 = vmatprep.subr.bf16.mxu1 %v6839_v56  ;;  %v6872_v55 = vld [vmem:[#allocation11 + $0x774] ss:$28 sps:$4 sm:$0xff]   ;;  %v6917_v56 = vld [vmem:[#allocation11 + $0xb9c] ss:$28 sps:$4 sm:$0xff]  }
 0x231   :  { %5218 = vmatpush2.bf16.msra.mxu0 %v6816_v57  ;;  %v6870_v57 = vld [vmem:[#allocation11 + $0x770] ss:$28 sps:$4 sm:$0xff]  }
 0x232   :  { %5219 = vmatprep.subr.bf16.mxu0 %v6824_v58  ;;  %5259 = vmatpush2.bf16.msra.mxu1 %v6837_v60  ;;  %v6915_v58 = vld [vmem:[#allocation11 + $0xb98] ss:$28 sps:$4 sm:$0xff]  }
 0x233   :  { %5260 = vmatprep.subr.bf16.mxu1 %v6845_v61  ;;  %v6875_v60 = vld [vmem:[#allocation11 + $0x73c] ss:$28 sps:$4 sm:$0xff]   ;;  %v6923_v61 = vld [vmem:[#allocation11 + $0xb64] ss:$28 sps:$4 sm:$0xff]  }
 0x235   :  { %5220 = vmatpush2.bf16.msra.mxu0 %v6822_v62  ;;  %v6873_v62 = vld [vmem:[#allocation11 + $0x738] ss:$28 sps:$4 sm:$0xff]  }
 0x236   :  { %5221 = vmatprep.subr.bf16.mxu0 %v6830_v2  ;;  %5261 = vmatpush2.bf16.msra.mxu1 %v6843_v3  ;;  %v6878_v2 = vld [vmem:[#allocation11 + $0x704] ss:$28 sps:$4 sm:$0xff]   ;;  %v6929_v3 = vld [vmem:[#allocation11 + $0xb2c] ss:$28 sps:$4 sm:$0xff]  }
 0x237   :  { %5262 = vmatprep.subr.bf16.mxu1 %v6848_v4  ;;  %v6876_v4 = vld [vmem:[#allocation11 + $0x700] ss:$28 sps:$4 sm:$0xff]  }
 0x239   :  { %5222 = vmatpush2.bf16.msra.mxu0 %v6828_v5  ;;  %v6927_v5 = vld [vmem:[#allocation11 + $0xb28] ss:$28 sps:$4 sm:$0xff]  }
 0x23a   :  { %5223 = vmatprep.subr.bf16.mxu0 %v6836_v10  ;;  %5263 = vmatpush2.bf16.msra.mxu1 %v6846_v8  ;;  %v6935_v10 = vld [vmem:[#allocation11 + $0xaf4] ss:$28 sps:$4 sm:$0xff]   ;;  %v6879_v8 = vld [vmem:[#allocation11 + $0xa48] ss:$28 sps:$4 sm:$0xff]  }
 0x23b   :  { %5264 = vmatprep.subr.bf16.mxu1 %v6851_v9  ;;  %v6933_v9 = vld [vmem:[#allocation11 + $0xaf0] ss:$28 sps:$4 sm:$0xff]  }
 0x23d   :  { %5224 = vmatpush2.bf16.msra.mxu0 %v6834_v13  ;;  %v6884_v13 = vld [vmem:[#allocation11 + $0xa14] ss:$28 sps:$4 sm:$0xff]  }
 0x23e   :  { %5225 = vmatprep.subr.bf16.mxu0 %v6842_v14  ;;  %5265 = vmatpush2.bf16.msra.mxu1 %v6849_v11  ;;  %v6882_v14 = vld [vmem:[#allocation11 + $0xa10] ss:$28 sps:$4 sm:$0xff]   ;;  %v6939_v11 = vld [vmem:[#allocation11 + $0xab8] ss:$28 sps:$4 sm:$0xff]  }
 0x23f   :  { %5266 = vmatprep.subr.bf16.mxu1 %v6854_v15  ;;  %v6887_v15 = vld [vmem:[#allocation11 + $0x9dc] ss:$28 sps:$4 sm:$0xff]  }
 0x241   :  { %5226 = vmatpush2.bf16.msra.mxu0 %v6840_v7  ;;  %v6947_v7 = vld [vmem:[#allocation11 + $0xa84] ss:$28 sps:$4 sm:$0xff]  }
 0x242   :  { %5267 = vmatpush2.bf16.msra.mxu1 %v6852_v0  ;;  %5277 = vmatprep.subr.bf16.mxu0 %v6857_v17  ;;  %v6945_v0 = vld [vmem:[#allocation11 + $0xa80] ss:$28 sps:$4 sm:$0xff]  }
 0x243   :  { %5318 = vmatprep.subr.bf16.mxu1 %v6905_v18  ;;  %v6890_v17 = vld [vmem:[#allocation11 + $0x9a4] ss:$28 sps:$4 sm:$0xff]   ;;  %v6953_v18 = vld [vmem:[#allocation11 + $0xdcc] ss:$28 sps:$4 sm:$0xff]  }
 0x244   :  { %v2114_v24 = vpop.f32.mrf.mxu0  ;;  %v2155_v25 = vpop.f32.mrf.mxu1  ;;  %5228 = vmatmul.mubr.bf16.vlgmr.msra.gmra.mxu0 %v7705_v21 }
 0x245   :  { %v2115_v26 = vadd.f32 %v2114_v24, %v689_v20  ;;  %5278 = vmatpush1.bf16.msra.mxu0 %v6855_v1  ;;  %v6888_v20 = vld [vmem:[#allocation11 + $0x9a0] ss:$28 sps:$4 sm:$0xff]   ;;  %v6951_v1 = vld [vmem:[#allocation11 + $0xdc8] ss:$28 sps:$4 sm:$0xff]  }
 0x246   :  { %v2116_v28 = vpop.f32.mrf.mxu0  ;;  %v2157_v29 = vpop.f32.mrf.mxu1  ;;  %5279 = vmatprep.subr.bf16.mxu0 %v6860_v22  ;;  %v6893_v22 = vld [vmem:[#allocation11 + $0x96c] ss:$28 sps:$4 sm:$0xff]  }
 0x247   :  { %v2156_v31 = vadd.f32 %v2155_v25, %v2115_v26  ;;  %v2117_v32 = vadd.f32 %v2116_v28, %v693_v23  ;;  %v6959_v23 = vld [vmem:[#allocation11 + $0xd94] ss:$28 sps:$4 sm:$0xff]   ;;  %v6891_v24 = vld [vmem:[#allocation11 + $0x968] ss:$28 sps:$4 sm:$0xff]  }
 0x248   :  { %v2118_v33 = vpop.f32.mrf.mxu0  ;;  %v2159_v34 = vpop.f32.mrf.mxu1  ;;  %v6957_v25 = vld [vmem:[#allocation11 + $0xd90] ss:$28 sps:$4 sm:$0xff]  }
 0x249   :  { %v2158_v35 = vadd.f32 %v2157_v29, %v2117_v32  ;;  %5280 = vmatpush1.bf16.msra.mxu0 %v6858_v27  ;;  %v2328_v37 = vmax.f32 %v2156_v31, 0.0  ;;  %v6896_v26 = vld [vmem:[#allocation11 + $0x934] ss:$28 sps:$4 sm:$0xff]   ;;  %v6965_v27 = vld [vmem:[#allocation11 + $0xd5c] ss:$28 sps:$4 sm:$0xff]  }
 0x24a   :  { %v2119_v38 = vpop.f32.mrf.mxu0  ;;  %v2160_v39 = vpop.f32.mrf.mxu1  ;;  %5281 = vmatprep.subr.bf16.mxu0 %v6863_v30  ;;  %v6894_v28 = vld [vmem:[#allocation11 + $0x930] ss:$28 sps:$4 sm:$0xff]   ;;  %v6963_v29 = vld [vmem:[#allocation11 + $0xd58] ss:$28 sps:$4 sm:$0xff]   ;;  %v6971_v31 = vld [vmem:[#allocation11 + $0xd24] ss:$28 sps:$4 sm:$0xff]  }
 0x24b   :  { %v2329_v41 = vmax.f32 %v2158_v35, 0.0  ;;  %v7712_v50 = vpack.c.bf16 %v2328_v37, %v2328_v37  ;;  %v6899_v30 = vld [vmem:[#allocation11 + $0x8fc] ss:$28 sps:$4 sm:$0xff]   ;;  %v6902_v34 = vld [vmem:[#allocation11 + $0x8c4] ss:$28 sps:$4 sm:$0xff]  }
 0x24c   :  { %v6897_v32 = vld [vmem:[#allocation11 + $0x8f8] ss:$28 sps:$4 sm:$0xff]   ;;  %v6969_v33 = vld [vmem:[#allocation11 + $0xd20] ss:$28 sps:$4 sm:$0xff]   ;;  %v6977_v35 = vld [vmem:[#allocation11 + $0xcec] ss:$28 sps:$4 sm:$0xff]  }
 0x24d   :  { %v7710_v42 = vpack.c.bf16 %v2329_v41, %v2329_v41  ;;  %5282 = vmatpush1.bf16.msra.mxu0 %v6861_v36  ;;  %v696_v36 = vsub.s32 4, %v7646_v43  ;;  %v6900_v37 = vld [vmem:[#allocation11 + $0x8c0] ss:$28 sps:$4 sm:$0xff]   ;;  %v6975_v38 = vld [vmem:[#allocation11 + $0xce8] ss:$28 sps:$4 sm:$0xff]   ;;  %v700_v41 = vsub.s32 5, %v7646_v43 }
 0x24e   :  { %5283 = vmatprep.subr.bf16.mxu0 %v6866_v40  ;;  %v6908_v39 = vld [vmem:[#allocation11 + $0x194] ss:$28 sps:$4 sm:$0xff]  }
 0x24f   :  { %5268 = vmatprep.mubr.bf16.mxu1 %v7710_v42  ;;  %v6983_v40 = vld [vmem:[#allocation11 + $0xcb4] ss:$28 sps:$4 sm:$0xff]  }
 0x250   :  { %5269 = vmatmul.mubr.bf16.vlgmr.msra.gmra.mxu1 %v7712_v50 }
 0x251   :  { %5284 = vmatpush1.bf16.msra.mxu0 %v6864_v44  ;;  %5319 = vmatpush1.bf16.msra.mxu1 %v6903_v49  ;;  %v697_v44 = vrot.slane %v7686_v59, %v696_v36  ;;  %v6981_v49 = vld [vmem:[#allocation11 + $0xcb0] ss:$28 sps:$4 sm:$0xff]  }
 0x252   :  { %5285 = vmatprep.subr.bf16.mxu0 %v6869_v51  ;;  %5320 = vmatprep.subr.bf16.mxu1 %v6911_v52  ;;  %v6989_v51 = vld [vmem:[#allocation11 + $0xc7c] ss:$28 sps:$4 sm:$0xff]   ;;  %v701_v52 = vrot.slane %v7686_v59, %v700_v41 }
 0x255   :  { %5286 = vmatpush1.bf16.msra.mxu0 %v6867_v53  ;;  %5321 = vmatpush1.bf16.msra.mxu1 %v6909_v54 }
 0x256   :  { %5287 = vmatprep.subr.bf16.mxu0 %v6872_v55  ;;  %5322 = vmatprep.subr.bf16.mxu1 %v6917_v56  ;;  %v6987_v56 = vld [vmem:[#allocation11 + $0xc78] ss:$28 sps:$4 sm:$0xff]  }
 0x259   :  { %5288 = vmatpush1.bf16.msra.mxu0 %v6870_v57  ;;  %5323 = vmatpush1.bf16.msra.mxu1 %v6915_v58  ;;  %v6995_v58 = vld [vmem:[#allocation11 + $0xc44] ss:$28 sps:$4 sm:$0xff]  }
 0x25a   :  { %5289 = vmatprep.subr.bf16.mxu0 %v6875_v60  ;;  %5324 = vmatprep.subr.bf16.mxu1 %v6923_v61 }
 0x25d   :  { %5290 = vmatpush1.bf16.msra.mxu0 %v6873_v62  ;;  %5325 = vmatpush1.bf16.msra.mxu1 %v6921_v63 }
 0x25e   :  { %5291 = vmatprep.subr.bf16.mxu0 %v6878_v2  ;;  %5326 = vmatprep.subr.bf16.mxu1 %v6929_v3 }
 0x261   :  { %5292 = vmatpush1.bf16.msra.mxu0 %v6876_v4  ;;  %5327 = vmatpush1.bf16.msra.mxu1 %v6927_v5  ;;  %v6993_v4 = vld [vmem:[#allocation11 + $0xc40] ss:$28 sps:$4 sm:$0xff]  }
 0x262   :  { %5293 = vmatprep.subr.bf16.mxu0 %v6881_v6  ;;  %5328 = vmatprep.subr.bf16.mxu1 %v6935_v10  ;;  %v7001_v10 = vld [vmem:[#allocation11 + $0x514] ss:$28 sps:$4 sm:$0xff]  }
 0x265   :  { %5294 = vmatpush2.bf16.msra.mxu0 %v6879_v8  ;;  %5329 = vmatpush1.bf16.msra.mxu1 %v6933_v9 }
 0x266   :  { %5295 = vmatprep.subr.bf16.mxu0 %v6884_v13  ;;  %5330 = vmatprep.subr.bf16.mxu1 %v6941_v12  ;;  %v6906_v12 = vld [vmem:[#allocation11 + $0x190] ss:$28 sps:$4 sm:$0xff]  }
 0x269   :  { %5296 = vmatpush2.bf16.msra.mxu0 %v6882_v14  ;;  %5331 = vmatpush1.bf16.msra.mxu1 %v6939_v11  ;;  %v6914_v11 = vld [vmem:[#allocation11 + $0x15c] ss:$28 sps:$4 sm:$0xff]  }
 0x26a   :  { %5297 = vmatprep.subr.bf16.mxu0 %v6887_v15  ;;  %5332 = vmatprep.subr.bf16.mxu1 %v6947_v7  ;;  %v6912_v15 = vld [vmem:[#allocation11 + $0x158] ss:$28 sps:$4 sm:$0xff]   ;;  %v6920_v7 = vld [vmem:[#allocation11 + $0x124] ss:$28 sps:$4 sm:$0xff]  }
 0x26d   :  { %5298 = vmatpush2.bf16.msra.mxu0 %v6885_v16  ;;  %5333 = vmatpush1.bf16.msra.mxu1 %v6945_v0  ;;  %v6918_v16 = vld [vmem:[#allocation11 + $0x120] ss:$28 sps:$4 sm:$0xff]   ;;  %v6926_v0 = vld [vmem:[#allocation11 + $0xec] ss:$28 sps:$4 sm:$0xff]  }
 0x26e   :  { %5299 = vmatprep.subr.bf16.mxu0 %v6890_v17  ;;  %5334 = vmatprep.subr.bf16.mxu1 %v6953_v18  ;;  %v6924_v17 = vld [vmem:[#allocation11 + $0xe8] ss:$28 sps:$4 sm:$0xff]   ;;  %v6932_v18 = vld [vmem:[#allocation11 + $0xb4] ss:$28 sps:$4 sm:$0xff]  }
 0x271   :  { %5300 = vmatpush2.bf16.msra.mxu0 %v6888_v20  ;;  %5335 = vmatpush2.bf16.msra.mxu1 %v6951_v1  ;;  %v6930_v20 = vld [vmem:[#allocation11 + $0xb0] ss:$28 sps:$4 sm:$0xff]   ;;  %v6938_v1 = vld [vmem:[#allocation11 + $0x7c] ss:$28 sps:$4 sm:$0xff]  }
 0x272   :  { %5301 = vmatprep.subr.bf16.mxu0 %v6893_v22  ;;  %5336 = vmatprep.subr.bf16.mxu1 %v6959_v23  ;;  %v6936_v22 = vld [vmem:[#allocation11 + $0x78] ss:$28 sps:$4 sm:$0xff]   ;;  %v6944_v23 = vld [vmem:[#allocation11 + $0x44] ss:$28 sps:$4 sm:$0xff]  }
 0x275   :  { %5302 = vmatpush2.bf16.msra.mxu0 %v6891_v24  ;;  %5337 = vmatpush2.bf16.msra.mxu1 %v6957_v25  ;;  %v6942_v24 = vld [vmem:[#allocation11 + $0x40] ss:$28 sps:$4 sm:$0xff]   ;;  %v6950_v25 = vld [vmem:[#allocation11 + $0xc] ss:$28 sps:$4 sm:$0xff]  }
 0x276   :  { %5303 = vmatprep.subr.bf16.mxu0 %v6896_v26  ;;  %5338 = vmatprep.subr.bf16.mxu1 %v6965_v27  ;;  %v6948_v26 = vld [vmem:[#allocation11 + $0x8] ss:$28 sps:$4 sm:$0xff]   ;;  %v6956_v27 = vld [vmem:[#allocation11 + $0x354] ss:$28 sps:$4 sm:$0xff]  }
 0x279   :  { %5304 = vmatpush2.bf16.msra.mxu0 %v6894_v28  ;;  %5339 = vmatpush2.bf16.msra.mxu1 %v6963_v29  ;;  %v6954_v28 = vld [vmem:[#allocation11 + $0x350] ss:$28 sps:$4 sm:$0xff]   ;;  %v6962_v29 = vld [vmem:[#allocation11 + $0x31c] ss:$28 sps:$4 sm:$0xff]  }
 0x27a   :  { %5305 = vmatprep.subr.bf16.mxu0 %v6899_v30  ;;  %5340 = vmatprep.subr.bf16.mxu1 %v6971_v31  ;;  %v6960_v30 = vld [vmem:[#allocation11 + $0x318] ss:$28 sps:$4 sm:$0xff]   ;;  %v6968_v31 = vld [vmem:[#allocation11 + $0x2e4] ss:$28 sps:$4 sm:$0xff]  }
 0x27d   :  { %5306 = vmatpush2.bf16.msra.mxu0 %v6897_v32  ;;  %5341 = vmatpush2.bf16.msra.mxu1 %v6969_v33  ;;  %v6966_v32 = vld [vmem:[#allocation11 + $0x2e0] ss:$28 sps:$4 sm:$0xff]   ;;  %v6974_v33 = vld [vmem:[#allocation11 + $0x2ac] ss:$28 sps:$4 sm:$0xff]  }
 0x27e   :  { %5307 = vmatprep.subr.bf16.mxu0 %v6902_v34  ;;  %5342 = vmatprep.subr.bf16.mxu1 %v6977_v35  ;;  %v6972_v34 = vld [vmem:[#allocation11 + $0x2a8] ss:$28 sps:$4 sm:$0xff]   ;;  %v6980_v35 = vld [vmem:[#allocation11 + $0x274] ss:$28 sps:$4 sm:$0xff]  }
 0x281   :  { %5308 = vmatpush2.bf16.msra.mxu0 %v6900_v37  ;;  %5343 = vmatpush2.bf16.msra.mxu1 %v6975_v38  ;;  %v6978_v37 = vld [vmem:[#allocation11 + $0x270] ss:$28 sps:$4 sm:$0xff]   ;;  %v704_v38 = vsub.s32 6, %v7646_v43 }
 0x282   :  { %5359 = vmatprep.subr.bf16.mxu0 %v6908_v39  ;;  %5344 = vmatprep.subr.bf16.mxu1 %v6983_v40  ;;  %v6986_v39 = vld [vmem:[#allocation11 + $0x23c] ss:$28 sps:$4 sm:$0xff]   ;;  %v708_v40 = vsub.s32 7, %v7646_v43 }
 0x284   :  { %v2196_v53 = vpop.f32.mrf.mxu0 }
 0x285   :  { %v2197_v54 = vadd.f32 %v2196_v53, %v697_v44  ;;  %v2237_v55 = vpop.f32.mrf.mxu1  ;;  %5345 = vmatpush2.bf16.msra.mxu1 %v6981_v49  ;;  %v6984_v44 = vld [vmem:[#allocation11 + $0x238] ss:$28 sps:$4 sm:$0xff]   ;;  %v705_v49 = vrot.slane %v7686_v59, %v704_v38 }
 0x286   :  { %v2198_v57 = vpop.f32.mrf.mxu0  ;;  %5346 = vmatprep.subr.bf16.mxu1 %v6989_v51  ;;  %v6992_v51 = vld [vmem:[#allocation11 + $0x204] ss:$28 sps:$4 sm:$0xff]  }
 0x287   :  { %v2238_v60 = vadd.f32 %v2237_v55, %v2197_v54  ;;  %v2199_v61 = vadd.f32 %v2198_v57, %v701_v52  ;;  %v2239_v62 = vpop.f32.mrf.mxu1  ;;  %v709_v52 = vrot.slane %v7686_v59, %v708_v40  ;;  %v7004_v59 = vld [vmem:[#allocation11 + $0x894] ss:$28 sps:$4 sm:$0xff]   ;;  %v7038_v40 = vld [vmem:[#allocation11 + $0x740] ss:$28 sps:$4 sm:$0xff]  }
 0x288   :  { %v2200_v63 = vpop.f32.mrf.mxu0 }
 0x289   :  { %v2240_v2 = vadd.f32 %v2239_v62, %v2199_v61  ;;  %v2241_v3 = vpop.f32.mrf.mxu1  ;;  %5347 = vmatpush2.bf16.msra.mxu1 %v6987_v56  ;;  %v2330_v5 = vmax.f32 %v2238_v60, 0.0  ;;  %v6990_v56 = vld [vmem:[#allocation11 + $0x200] ss:$28 sps:$4 sm:$0xff]  }
 0x28a   :  { %v2201_v6 = vpop.f32.mrf.mxu0  ;;  %5348 = vmatprep.subr.bf16.mxu1 %v6995_v58  ;;  %v6998_v58 = vld [vmem:[#allocation11 + $0x1cc] ss:$28 sps:$4 sm:$0xff]  }
 0x28b   :  { %v2331_v8 = vmax.f32 %v2240_v2, 0.0  ;;  %v2242_v9 = vpop.f32.mrf.mxu1  ;;  %v7726_v14 = vpack.c.bf16 %v2330_v5, %v2330_v5 }
 0x28d   :  { %v7724_v13 = vpack.c.bf16 %v2331_v8, %v2331_v8  ;;  %5349 = vmatpush2.bf16.msra.mxu1 %v6993_v4  ;;  %v6996_v4 = vld [vmem:[#allocation11 + $0x1c8] ss:$28 sps:$4 sm:$0xff]  }
 0x28e   :  { %5400 = vmatprep.subr.bf16.mxu1 %v7001_v10 }
 0x28f   :  { %5309 = vmatprep.mubr.bf16.mxu0 %v7724_v13 }
 0x290   :  { %5310 = vmatmul.mubr.bf16.vlgmr.msra.gmra.mxu0 %v7726_v14 }
 0x291   :  { %5360 = vmatpush1.bf16.msra.mxu0 %v6906_v12  ;;  %5391 = vmatprep.mubr.bf16.mxu0 %v7696_v19  ;;  %v6999_v12 = vld [vmem:[#allocation11 + $0x510] ss:$28 sps:$4 sm:$0xff]  }
 0x292   :  { %5361 = vmatprep.subr.bf16.mxu0 %v6914_v11  ;;  %v7002_v11 = vld [vmem:[#allocation11 + $0x890] ss:$28 sps:$4 sm:$0xff]  }
 0x295   :  { %5362 = vmatpush1.bf16.msra.mxu0 %v6912_v15 }
 0x296   :  { %5363 = vmatprep.subr.bf16.mxu0 %v6920_v7  ;;  %v7007_v7 = vld [vmem:[#allocation11 + $0x4dc] ss:$28 sps:$4 sm:$0xff]  }
 0x299   :  { %5364 = vmatpush1.bf16.msra.mxu0 %v6918_v16  ;;  %v7010_v16 = vld [vmem:[#allocation11 + $0x85c] ss:$28 sps:$4 sm:$0xff]  }
 0x29a   :  { %5365 = vmatprep.subr.bf16.mxu0 %v6926_v0  ;;  %v7005_v0 = vld [vmem:[#allocation11 + $0x4d8] ss:$28 sps:$4 sm:$0xff]  }
 0x29d   :  { %5366 = vmatpush1.bf16.msra.mxu0 %v6924_v17  ;;  %v7008_v17 = vld [vmem:[#allocation11 + $0x858] ss:$28 sps:$4 sm:$0xff]  }
 0x29e   :  { %5367 = vmatprep.subr.bf16.mxu0 %v6932_v18  ;;  %v7013_v18 = vld [vmem:[#allocation11 + $0x4a4] ss:$28 sps:$4 sm:$0xff]  }
 0x2a1   :  { %5368 = vmatpush1.bf16.msra.mxu0 %v6930_v20  ;;  %v7016_v20 = vld [vmem:[#allocation11 + $0x824] ss:$28 sps:$4 sm:$0xff]  }
 0x2a2   :  { %5369 = vmatprep.subr.bf16.mxu0 %v6938_v1  ;;  %v7011_v1 = vld [vmem:[#allocation11 + $0x4a0] ss:$28 sps:$4 sm:$0xff]  }
 0x2a5   :  { %5370 = vmatpush1.bf16.msra.mxu0 %v6936_v22  ;;  %v7014_v22 = vld [vmem:[#allocation11 + $0x820] ss:$28 sps:$4 sm:$0xff]  }
 0x2a6   :  { %5371 = vmatprep.subr.bf16.mxu0 %v6944_v23  ;;  %v7019_v23 = vld [vmem:[#allocation11 + $0x46c] ss:$28 sps:$4 sm:$0xff]  }
 0x2a9   :  { %5372 = vmatpush1.bf16.msra.mxu0 %v6942_v24  ;;  %v7022_v24 = vld [vmem:[#allocation11 + $0x7ec] ss:$28 sps:$4 sm:$0xff]  }
 0x2aa   :  { %5373 = vmatprep.subr.bf16.mxu0 %v6950_v25  ;;  %v7017_v25 = vld [vmem:[#allocation11 + $0x468] ss:$28 sps:$4 sm:$0xff]  }
 0x2ad   :  { %5374 = vmatpush1.bf16.msra.mxu0 %v6948_v26  ;;  %v7020_v26 = vld [vmem:[#allocation11 + $0x7e8] ss:$28 sps:$4 sm:$0xff]  }
 0x2ae   :  { %5375 = vmatprep.subr.bf16.mxu0 %v6956_v27  ;;  %v7025_v27 = vld [vmem:[#allocation11 + $0x434] ss:$28 sps:$4 sm:$0xff]  }
 0x2b1   :  { %5376 = vmatpush2.bf16.msra.mxu0 %v6954_v28  ;;  %v7028_v28 = vld [vmem:[#allocation11 + $0x7b4] ss:$28 sps:$4 sm:$0xff]  }
 0x2b2   :  { %5377 = vmatprep.subr.bf16.mxu0 %v6962_v29  ;;  %v7023_v29 = vld [vmem:[#allocation11 + $0x430] ss:$28 sps:$4 sm:$0xff]  }
 0x2b5   :  { %5378 = vmatpush2.bf16.msra.mxu0 %v6960_v30  ;;  %v7026_v30 = vld [vmem:[#allocation11 + $0x7b0] ss:$28 sps:$4 sm:$0xff]  }
 0x2b6   :  { %5379 = vmatprep.subr.bf16.mxu0 %v6968_v31  ;;  %v7031_v31 = vld [vmem:[#allocation11 + $0x3fc] ss:$28 sps:$4 sm:$0xff]  }
 0x2b9   :  { %5380 = vmatpush2.bf16.msra.mxu0 %v6966_v32  ;;  %v7034_v32 = vld [vmem:[#allocation11 + $0x77c] ss:$28 sps:$4 sm:$0xff]  }
 0x2ba   :  { %5381 = vmatprep.subr.bf16.mxu0 %v6974_v33  ;;  %v7029_v33 = vld [vmem:[#allocation11 + $0x3f8] ss:$28 sps:$4 sm:$0xff]  }
 0x2bd   :  { %5382 = vmatpush2.bf16.msra.mxu0 %v6972_v34  ;;  %v7032_v34 = vld [vmem:[#allocation11 + $0x778] ss:$28 sps:$4 sm:$0xff]  }
 0x2be   :  { %5383 = vmatprep.subr.bf16.mxu0 %v6980_v35  ;;  %v7037_v35 = vld [vmem:[#allocation11 + $0x3c4] ss:$28 sps:$4 sm:$0xff]  }
 0x2c1   :  { %5384 = vmatpush2.bf16.msra.mxu0 %v6978_v37  ;;  %v7040_v37 = vld [vmem:[#allocation11 + $0x744] ss:$28 sps:$4 sm:$0xff]  }
 0x2c2   :  { %5385 = vmatprep.subr.bf16.mxu0 %v6986_v39  ;;  %v7035_v39 = vld [vmem:[#allocation11 + $0x3c0] ss:$28 sps:$4 sm:$0xff]  }
 0x2c4   :  { %v2278_v53 = vpop.f32.mrf.mxu0 }
 0x2c5   :  { %v2279_v54 = vadd.f32 %v2278_v53, %v705_v49  ;;  %v2319_v55 = vpop.f32.mrf.mxu1  ;;  %5386 = vmatpush2.bf16.msra.mxu0 %v6984_v44  ;;  %v7043_v44 = vld [vmem:[#allocation11 + $0x38c] ss:$28 sps:$4 sm:$0xff]   ;;  %v7049_v53 = vld [vmem:[#allocation11 + $0x6d4] ss:$28 sps:$4 sm:$0xff]  }
 0x2c6   :  { %v2280_v57 = vpop.f32.mrf.mxu0  ;;  %5387 = vmatprep.subr.bf16.mxu0 %v6992_v51  ;;  %v7046_v49 = vld [vmem:[#allocation11 + $0x70c] ss:$28 sps:$4 sm:$0xff]  }
 0x2c7   :  { %v2320_v60 = vadd.f32 %v2319_v55, %v2279_v54  ;;  %v2281_v61 = vadd.f32 %v2280_v57, %v709_v52  ;;  %v2321_v62 = vpop.f32.mrf.mxu1  ;;  %v7041_v51 = vld [vmem:[#allocation11 + $0x388] ss:$28 sps:$4 sm:$0xff]   ;;  %v7052_v54 = vld [vmem:[#allocation11 + $0xa54] ss:$28 sps:$4 sm:$0xff]   ;;  %v7055_v57 = vld [vmem:[#allocation11 + $0x69c] ss:$28 sps:$4 sm:$0xff]  }
 0x2c8   :  { %v2282_v63 = vpop.f32.mrf.mxu0  ;;  %v7044_v52 = vld [vmem:[#allocation11 + $0x708] ss:$28 sps:$4 sm:$0xff]   ;;  %v7047_v55 = vld [vmem:[#allocation11 + $0x6d0] ss:$28 sps:$4 sm:$0xff]  }
 0x2c9   :  { %v2322_v2 = vadd.f32 %v2321_v62, %v2281_v61  ;;  %v2323_v3 = vpop.f32.mrf.mxu1  ;;  %5388 = vmatpush2.bf16.msra.mxu0 %v6990_v56  ;;  %v2332_v5 = vmax.f32 %v2320_v60, 0.0  ;;  %v7050_v56 = vld [vmem:[#allocation11 + $0xa50] ss:$28 sps:$4 sm:$0xff]   ;;  %v7053_v60 = vld [vmem:[#allocation11 + $0x698] ss:$28 sps:$4 sm:$0xff]  }
 0x2ca   :  { %v2283_v6 = vpop.f32.mrf.mxu0  ;;  %5389 = vmatprep.subr.bf16.mxu0 %v6998_v58  ;;  %v7058_v58 = vld [vmem:[#allocation11 + $0xa1c] ss:$28 sps:$4 sm:$0xff]   ;;  %v7061_v62 = vld [vmem:[#allocation11 + $0x664] ss:$28 sps:$4 sm:$0xff]  }
 0x2cb   :  { %v2333_v10 = vmax.f32 %v2322_v2, 0.0  ;;  %v2324_v8 = vpop.f32.mrf.mxu1  ;;  %v7739_v15 = vpack.c.bf16 %v2332_v5, %v2332_v5  ;;  %v7056_v61 = vld [vmem:[#allocation11 + $0xa18] ss:$28 sps:$4 sm:$0xff]   ;;  %v7064_v63 = vld [vmem:[#allocation11 + $0x9e4] ss:$28 sps:$4 sm:$0xff]  }
 0x2cc   :  { %v7059_v2 = vld [vmem:[#allocation11 + $0x660] ss:$28 sps:$4 sm:$0xff]   ;;  %v7070_v5 = vld [vmem:[#allocation11 + $0x9ac] ss:$28 sps:$4 sm:$0xff]   ;;  %v7076_v8 = vld [vmem:[#allocation11 + $0x974] ss:$28 sps:$4 sm:$0xff]  }
 0x2cd   :  { %v7737_v9 = vpack.c.bf16 %v2333_v10, %v2333_v10  ;;  %5390 = vmatpush2.bf16.msra.mxu0 %v6996_v4  ;;  %v7062_v3 = vld [vmem:[#allocation11 + $0x9e0] ss:$28 sps:$4 sm:$0xff]   ;;  %v7067_v4 = vld [vmem:[#allocation11 + $0x62c] ss:$28 sps:$4 sm:$0xff]   ;;  %v7073_v10 = vld [vmem:[#allocation11 + $0x5f4] ss:$28 sps:$4 sm:$0xff]  }
 0x2ce   :  { %5441 = vmatprep.subr.bf16.mxu0 %v7004_v59  ;;  %v7065_v6 = vld [vmem:[#allocation11 + $0x628] ss:$28 sps:$4 sm:$0xff]  }
 0x2cf   :  { %5350 = vmatprep.mubr.bf16.mxu1 %v7737_v9  ;;  %v7068_v59 = vld [vmem:[#allocation11 + $0x9a8] ss:$28 sps:$4 sm:$0xff]  }
 0x2d0   :  { %5392 = vmatmul.mubr.bf16.vlgmr.msra.gmra.mxu0 %v7705_v21  ;;  %5351 = vmatmul.mubr.bf16.vlgmr.msra.gmra.mxu1 %v7739_v15 }
 0x2d1   :  { %5401 = vmatpush1.bf16.msra.mxu1 %v6999_v12  ;;  %5442 = vmatpush1.bf16.msra.mxu0 %v7002_v11  ;;  %v7071_v12 = vld [vmem:[#allocation11 + $0x5f0] ss:$28 sps:$4 sm:$0xff]  }
 0x2d2   :  { %5473 = vmatprep.mubr.bf16.mxu0 %v7724_v13  ;;  %5432 = vmatprep.mubr.bf16.mxu1 %v7710_v42  ;;  %v7074_v11 = vld [vmem:[#allocation11 + $0x970] ss:$28 sps:$4 sm:$0xff]  }
 0x2d3   :  { %5402 = vmatprep.subr.bf16.mxu1 %v7007_v7  ;;  %5443 = vmatprep.subr.bf16.mxu0 %v7010_v16  ;;  %v7079_v7 = vld [vmem:[#allocation11 + $0x5bc] ss:$28 sps:$4 sm:$0xff]  }
 0x2d4   :  { %v7082_v16 = vld [vmem:[#allocation11 + $0x93c] ss:$28 sps:$4 sm:$0xff]  }
 0x2d5   :  { %5403 = vmatpush1.bf16.msra.mxu1 %v7005_v0  ;;  %5444 = vmatpush1.bf16.msra.mxu0 %v7008_v17  ;;  %v7077_v0 = vld [vmem:[#allocation11 + $0x5b8] ss:$28 sps:$4 sm:$0xff]  }
 0x2d6   :  { %5404 = vmatprep.subr.bf16.mxu1 %v7013_v18  ;;  %5445 = vmatprep.subr.bf16.mxu0 %v7016_v20  ;;  %v7080_v17 = vld [vmem:[#allocation11 + $0x938] ss:$28 sps:$4 sm:$0xff]   ;;  %v7085_v18 = vld [vmem:[#allocation11 + $0x584] ss:$28 sps:$4 sm:$0xff]  }
 0x2d7   :  { %v7088_v20 = vld [vmem:[#allocation11 + $0x904] ss:$28 sps:$4 sm:$0xff]  }
 0x2d9   :  { %5405 = vmatpush1.bf16.msra.mxu1 %v7011_v1  ;;  %5446 = vmatpush1.bf16.msra.mxu0 %v7014_v22  ;;  %v7083_v22 = vld [vmem:[#allocation11 + $0x580] ss:$28 sps:$4 sm:$0xff]  }
 0x2da   :  { %5406 = vmatprep.subr.bf16.mxu1 %v7019_v23  ;;  %5447 = vmatprep.subr.bf16.mxu0 %v7022_v24  ;;  %v7086_v23 = vld [vmem:[#allocation11 + $0x900] ss:$28 sps:$4 sm:$0xff]  }
 0x2dd   :  { %5407 = vmatpush1.bf16.msra.mxu1 %v7017_v25  ;;  %5448 = vmatpush1.bf16.msra.mxu0 %v7020_v26  ;;  %v7091_v25 = vld [vmem:[#allocation11 + $0x54c] ss:$28 sps:$4 sm:$0xff]  }
 0x2de   :  { %5408 = vmatprep.subr.bf16.mxu1 %v7025_v27  ;;  %5449 = vmatprep.subr.bf16.mxu0 %v7028_v28  ;;  %v7094_v26 = vld [vmem:[#allocation11 + $0x8cc] ss:$28 sps:$4 sm:$0xff]   ;;  %v7746_v27 = vld [vmem:[#allocation13] sm:$0xff] }
 0x2e1   :  { %5409 = vmatpush1.bf16.msra.mxu1 %v7023_v29  ;;  %5450 = vmatpush1.bf16.msra.mxu0 %v7026_v30  ;;  %v7089_v29 = vld [vmem:[#allocation11 + $0x548] ss:$28 sps:$4 sm:$0xff]  }
 0x2e2   :  { %5410 = vmatprep.subr.bf16.mxu1 %v7031_v31  ;;  %5451 = vmatprep.subr.bf16.mxu0 %v7034_v32  ;;  %v7092_v30 = vld [vmem:[#allocation11 + $0x8c8] ss:$28 sps:$4 sm:$0xff]   ;;  %v7097_v32 = vld [vmem:[#allocation11 + $0xc14] ss:$28 sps:$4 sm:$0xff]  }
 0x2e5   :  { %5411 = vmatpush1.bf16.msra.mxu1 %v7029_v33  ;;  %5452 = vmatpush1.bf16.msra.mxu0 %v7032_v34  ;;  %v7100_v33 = vld [vmem:[#allocation11 + $0x19c] ss:$28 sps:$4 sm:$0xff]   ;;  %v2859_v34 = vrot.slane %v7746_v27, %v7649_v45 }
 0x2e6   :  { %5412 = vmatprep.subr.bf16.mxu1 %v7037_v35  ;;  %5453 = vmatprep.subr.bf16.mxu0 %v7040_v37  ;;  %v2863_v35 = vrot.slane %v7746_v27, %v7655_v47  ;;  %v7095_v37 = vld [vmem:[#allocation11 + $0xc10] ss:$28 sps:$4 sm:$0xff]   ;;  %v7101_v45 = vld [vmem:[#allocation11 + $0xbd8] ss:$28 sps:$4 sm:$0xff]  }
 0x2e9   :  { %5413 = vmatpush1.bf16.msra.mxu1 %v7035_v39  ;;  %5454 = vmatpush1.bf16.msra.mxu0 %v7038_v40  ;;  %v7098_v39 = vld [vmem:[#allocation11 + $0x198] ss:$28 sps:$4 sm:$0xff]  }
 0x2ea   :  { %5414 = vmatprep.subr.bf16.mxu1 %v7043_v44  ;;  %5455 = vmatprep.subr.bf16.mxu0 %v7046_v49  ;;  %v7103_v44 = vld [vmem:[#allocation11 + $0xbdc] ss:$28 sps:$4 sm:$0xff]   ;;  %v7106_v49 = vld [vmem:[#allocation11 + $0x164] ss:$28 sps:$4 sm:$0xff]  }
 0x2ed   :  { %5415 = vmatpush1.bf16.msra.mxu1 %v7041_v51  ;;  %5456 = vmatpush1.bf16.msra.mxu0 %v7044_v52 }
 0x2ee   :  { %5416 = vmatprep.subr.bf16.mxu1 %v7049_v53  ;;  %5457 = vmatprep.subr.bf16.mxu0 %v7052_v54  ;;  %v7104_v54 = vld [vmem:[#allocation11 + $0x160] ss:$28 sps:$4 sm:$0xff]  }
 0x2f1   :  { %5417 = vmatpush2.bf16.msra.mxu1 %v7047_v55  ;;  %5458 = vmatpush2.bf16.msra.mxu0 %v7050_v56  ;;  %v7109_v55 = vld [vmem:[#allocation11 + $0xba4] ss:$28 sps:$4 sm:$0xff]  }
 0x2f2   :  { %5418 = vmatprep.subr.bf16.mxu1 %v7055_v57  ;;  %5459 = vmatprep.subr.bf16.mxu0 %v7058_v58  ;;  %v7112_v57 = vld [vmem:[#allocation11 + $0x12c] ss:$28 sps:$4 sm:$0xff]  }
 0x2f5   :  { %5419 = vmatpush2.bf16.msra.mxu1 %v7053_v60  ;;  %5460 = vmatpush2.bf16.msra.mxu0 %v7056_v61  ;;  %v7107_v60 = vld [vmem:[#allocation11 + $0xba0] ss:$28 sps:$4 sm:$0xff]  }
 0x2f6   :  { %5420 = vmatprep.subr.bf16.mxu1 %v7061_v62  ;;  %5461 = vmatprep.subr.bf16.mxu0 %v7064_v63  ;;  %v7110_v62 = vld [vmem:[#allocation11 + $0x128] ss:$28 sps:$4 sm:$0xff]  }
 0x2f7   :  { %v7115_v63 = vld [vmem:[#allocation11 + $0xb6c] ss:$28 sps:$4 sm:$0xff]  }
 0x2f9   :  { %5421 = vmatpush2.bf16.msra.mxu1 %v7059_v2  ;;  %5462 = vmatpush2.bf16.msra.mxu0 %v7062_v3  ;;  %v7118_v2 = vld [vmem:[#allocation11 + $0xf4] ss:$28 sps:$4 sm:$0xff]   ;;  %v7113_v3 = vld [vmem:[#allocation11 + $0xb68] ss:$28 sps:$4 sm:$0xff]  }
 0x2fa   :  { %5422 = vmatprep.subr.bf16.mxu1 %v7067_v4  ;;  %5463 = vmatprep.subr.bf16.mxu0 %v7070_v5  ;;  %v7116_v4 = vld [vmem:[#allocation11 + $0xf0] ss:$28 sps:$4 sm:$0xff]  }
 0x2fb   :  { %v7121_v5 = vld [vmem:[#allocation11 + $0xb34] ss:$28 sps:$4 sm:$0xff]  }
 0x2fd   :  { %5423 = vmatpush2.bf16.msra.mxu1 %v7065_v6  ;;  %5464 = vmatpush2.bf16.msra.mxu0 %v7068_v59  ;;  %v7124_v6 = vld [vmem:[#allocation11 + $0xbc] ss:$28 sps:$4 sm:$0xff]   ;;  %v7119_v59 = vld [vmem:[#allocation11 + $0xb30] ss:$28 sps:$4 sm:$0xff]  }
 0x2fe   :  { %5424 = vmatprep.subr.bf16.mxu1 %v7073_v10  ;;  %5465 = vmatprep.subr.bf16.mxu0 %v7076_v8  ;;  %v7122_v10 = vld [vmem:[#allocation11 + $0xb8] ss:$28 sps:$4 sm:$0xff]  }
 0x2ff   :  { %v7127_v8 = vld [vmem:[#allocation11 + $0xafc] ss:$28 sps:$4 sm:$0xff]  }
 0x301   :  { %5425 = vmatpush2.bf16.msra.mxu1 %v7071_v12  ;;  %5466 = vmatpush2.bf16.msra.mxu0 %v7074_v11  ;;  %v7130_v12 = vld [vmem:[#allocation11 + $0x84] ss:$28 sps:$4 sm:$0xff]   ;;  %v7125_v11 = vld [vmem:[#allocation11 + $0xaf8] ss:$28 sps:$4 sm:$0xff]  }
 0x302   :  { %5426 = vmatprep.subr.bf16.mxu1 %v7079_v7  ;;  %5467 = vmatprep.subr.bf16.mxu0 %v7082_v16  ;;  %v7128_v7 = vld [vmem:[#allocation11 + $0x80] ss:$28 sps:$4 sm:$0xff]  }
 0x303   :  { %v7133_v16 = vld [vmem:[#allocation11 + $0xac4] ss:$28 sps:$4 sm:$0xff]  }
 0x304   :  { %v5229_v1 = vpop.f32.mrf.mxu0 }
 0x305   :  { %5427 = vmatpush2.bf16.msra.mxu1 %v7077_v0  ;;  %5468 = vmatpush2.bf16.msra.mxu0 %v7080_v17  ;;  %v5230_v40 = vadd.f32 %v5229_v1, %v2859_v34  ;;  %v7136_v0 = vld [vmem:[#allocation11 + $0x4c] ss:$28 sps:$4 sm:$0xff]   ;;  %v7131_v17 = vld [vmem:[#allocation11 + $0xac0] ss:$28 sps:$4 sm:$0xff]   ;;  %v7142_v1 = vld [vmem:[#allocation11 + $0x14] ss:$28 sps:$4 sm:$0xff]  }
 0x306   :  { %v5231_v24 = vpop.f32.mrf.mxu0  ;;  %5428 = vmatprep.subr.bf16.mxu1 %v7085_v18  ;;  %5469 = vmatprep.subr.bf16.mxu0 %v7088_v20  ;;  %v7134_v18 = vld [vmem:[#allocation11 + $0x48] ss:$28 sps:$4 sm:$0xff]  }
 0x307   :  { %v5232_v52 = vadd.f32 %v5231_v24, %v2863_v35  ;;  %v7139_v20 = vld [vmem:[#allocation11 + $0xa8c] ss:$28 sps:$4 sm:$0xff]   ;;  %v7145_v24 = vld [vmem:[#allocation11 + $0xdd4] ss:$28 sps:$4 sm:$0xff]   ;;  %v7155_v35 = vld [vmem:[#allocation11 + $0xd60] ss:$28 sps:$4 sm:$0xff]  }
 0x308   :  { %v5233_v28 = vpop.f32.mrf.mxu0  ;;  %v7160_v34 = vld [vmem:[#allocation11 + $0x2ec] ss:$28 sps:$4 sm:$0xff]  }
 0x309   :  { %5429 = vmatpush2.bf16.msra.mxu1 %v7083_v22  ;;  %5470 = vmatpush2.bf16.msra.mxu0 %v7086_v23  ;;  %v7137_v22 = vld [vmem:[#allocation11 + $0xa88] ss:$28 sps:$4 sm:$0xff]   ;;  %v7140_v23 = vld [vmem:[#allocation11 + $0x10] ss:$28 sps:$4 sm:$0xff]   ;;  %v7146_v28 = vld [vmem:[#allocation11 + $0x358] ss:$28 sps:$4 sm:$0xff]  }
 0x30a   :  { %v5234_v31 = vpop.f32.mrf.mxu0  ;;  %5430 = vmatprep.subr.bf16.mxu1 %v7091_v25  ;;  %5471 = vmatprep.subr.bf16.mxu0 %v7094_v26  ;;  %v7148_v25 = vld [vmem:[#allocation11 + $0x35c] ss:$28 sps:$4 sm:$0xff]   ;;  %v7143_v26 = vld [vmem:[#allocation11 + $0xdd0] ss:$28 sps:$4 sm:$0xff]  }
 0x30b   :  { %v7149_v31 = vld [vmem:[#allocation11 + $0xd98] ss:$28 sps:$4 sm:$0xff]  }
 0x30d   :  { %5431 = vmatpush2.bf16.msra.mxu1 %v7089_v29  ;;  %5472 = vmatpush2.bf16.msra.mxu0 %v7092_v30  ;;  %v7151_v29 = vld [vmem:[#allocation11 + $0xd9c] ss:$28 sps:$4 sm:$0xff]   ;;  %v7154_v30 = vld [vmem:[#allocation11 + $0x324] ss:$28 sps:$4 sm:$0xff]  }
 0x30e   :  { %5482 = vmatprep.subr.bf16.mxu1 %v7097_v32  ;;  %5523 = vmatprep.subr.bf16.mxu0 %v7100_v33  ;;  %v7152_v32 = vld [vmem:[#allocation11 + $0x320] ss:$28 sps:$4 sm:$0xff]  }
 0x30f   :  { %v7157_v33 = vld [vmem:[#allocation11 + $0xd64] ss:$28 sps:$4 sm:$0xff]  }
 0x310   :  { %5433 = vmatmul.mubr.bf16.vlgmr.msra.gmra.mxu1 %v7712_v50  ;;  %5474 = vmatmul.mubr.bf16.vlgmr.msra.gmra.mxu0 %v7726_v14  ;;  %v5270_v51 = vpop.f32.mrf.mxu1 }
 0x311   :  { %v7754_v53 = vadd.f32 %v5270_v51, %v5230_v40  ;;  %5483 = vmatpush1.bf16.msra.mxu1 %v7095_v37  ;;  %5514 = vmatprep.mubr.bf16.mxu1 %v7737_v9  ;;  %v7158_v37 = vld [vmem:[#allocation11 + $0x2e8] ss:$28 sps:$4 sm:$0xff]   ;;  %v7166_v40 = vld [vmem:[#allocation11 + $0x2b4] ss:$28 sps:$4 sm:$0xff]  }
 0x312   :  { %5524 = vmatpush1.bf16.msra.mxu0 %v7098_v39  ;;  %5555 = vmatprep.mubr.bf16.mxu0 %v7696_v19  ;;  %v5272_v47 = vpop.f32.mrf.mxu1  ;;  %v7163_v39 = vld [vmem:[#allocation11 + $0xd2c] ss:$28 sps:$4 sm:$0xff]   ;;  %v7169_v51 = vld [vmem:[#allocation11 + $0xcf4] ss:$28 sps:$4 sm:$0xff]  }
 0x313   :  { %v7758_v56 = vadd.f32 %v5272_v47, %v5232_v52  ;;  %5484 = vmatprep.subr.bf16.mxu1 %v7103_v44  ;;  %5525 = vmatprep.subr.bf16.mxu0 %v7106_v49  ;;  %v7161_v44 = vld [vmem:[#allocation11 + $0xd28] ss:$28 sps:$4 sm:$0xff]   ;;  %v7164_v49 = vld [vmem:[#allocation11 + $0x2b0] ss:$28 sps:$4 sm:$0xff]   ;;  %v7172_v52 = vld [vmem:[#allocation11 + $0x27c] ss:$28 sps:$4 sm:$0xff]  }
 0x314   :  { %v5274_v58 = vpop.f32.mrf.mxu1  ;;  %v7170_v47 = vld [vmem:[#allocation11 + $0x278] ss:$28 sps:$4 sm:$0xff]  }
 0x315   :  { %5485 = vmatpush1.bf16.msra.mxu1 %v7101_v45  ;;  %v7167_v45 = vld [vmem:[#allocation11 + $0xcf0] ss:$28 sps:$4 sm:$0xff]   ;;  %v7176_v58 = vld [vmem:[#allocation11 + $0x240] ss:$28 sps:$4 sm:$0xff]  }
 0x316   :  { %5526 = vmatpush1.bf16.msra.mxu0 %v7104_v54  ;;  %v5275_v61 = vpop.f32.mrf.mxu1  ;;  %5486 = vmatprep.subr.bf16.mxu1 %v7109_v55  ;;  %v7175_v54 = vld [vmem:[#allocation11 + $0xcbc] ss:$28 sps:$4 sm:$0xff]   ;;  %v7178_v55 = vld [vmem:[#allocation11 + $0x244] ss:$28 sps:$4 sm:$0xff]  }
 0x317   :  { %5527 = vmatprep.subr.bf16.mxu0 %v7112_v57  ;;  %v7173_v57 = vld [vmem:[#allocation11 + $0xcb8] ss:$28 sps:$4 sm:$0xff]   ;;  %v7184_v61 = vld [vmem:[#allocation11 + $0x20c] ss:$28 sps:$4 sm:$0xff]  }
 0x319   :  { %5487 = vmatpush1.bf16.msra.mxu1 %v7107_v60  ;;  %v7181_v60 = vld [vmem:[#allocation11 + $0xc84] ss:$28 sps:$4 sm:$0xff]  }
 0x31a   :  { %5528 = vmatpush1.bf16.msra.mxu0 %v7110_v62  ;;  %5488 = vmatprep.subr.bf16.mxu1 %v7115_v63  ;;  %v7179_v62 = vld [vmem:[#allocation11 + $0xc80] ss:$28 sps:$4 sm:$0xff]   ;;  %v7182_v63 = vld [vmem:[#allocation11 + $0x208] ss:$28 sps:$4 sm:$0xff]  }
 0x31b   :  { %5529 = vmatprep.subr.bf16.mxu0 %v7118_v2  ;;  %v7187_v2 = vld [vmem:[#allocation11 + $0xc4c] ss:$28 sps:$4 sm:$0xff]  }
 0x31d   :  { %5489 = vmatpush1.bf16.msra.mxu1 %v7113_v3  ;;  %v7190_v3 = vld [vmem:[#allocation11 + $0x1d4] ss:$28 sps:$4 sm:$0xff]  }
 0x31e   :  { %5530 = vmatpush1.bf16.msra.mxu0 %v7116_v4  ;;  %5490 = vmatprep.subr.bf16.mxu1 %v7121_v5  ;;  %v7185_v4 = vld [vmem:[#allocation11 + $0xc48] ss:$28 sps:$4 sm:$0xff]   ;;  %v7188_v5 = vld [vmem:[#allocation11 + $0x1d0] ss:$28 sps:$4 sm:$0xff]  }
 0x31f   :  { %5531 = vmatprep.subr.bf16.mxu0 %v7124_v6  ;;  %v7193_v6 = vld [vmem:[#allocation11 + $0x51c] ss:$28 sps:$4 sm:$0xff]  }
 0x321   :  { %5491 = vmatpush1.bf16.msra.mxu1 %v7119_v59  ;;  %v7196_v59 = vld [vmem:[#allocation11 + $0x89c] ss:$28 sps:$4 sm:$0xff]  }
 0x322   :  { %5532 = vmatpush1.bf16.msra.mxu0 %v7122_v10  ;;  %5492 = vmatprep.subr.bf16.mxu1 %v7127_v8  ;;  %v7191_v10 = vld [vmem:[#allocation11 + $0x518] ss:$28 sps:$4 sm:$0xff]  }
 0x323   :  { %5533 = vmatprep.subr.bf16.mxu0 %v7130_v12  ;;  %v7194_v8 = vld [vmem:[#allocation11 + $0x898] ss:$28 sps:$4 sm:$0xff]   ;;  %v7199_v12 = vld [vmem:[#allocation11 + $0x4e4] ss:$28 sps:$4 sm:$0xff]  }
 0x325   :  { %5493 = vmatpush1.bf16.msra.mxu1 %v7125_v11 }
 0x326   :  { %5534 = vmatpush1.bf16.msra.mxu0 %v7128_v7  ;;  %5494 = vmatprep.subr.bf16.mxu1 %v7133_v16  ;;  %v7202_v7 = vld [vmem:[#allocation11 + $0x864] ss:$28 sps:$4 sm:$0xff]  }
 0x327   :  { %5535 = vmatprep.subr.bf16.mxu0 %v7136_v0  ;;  %v7197_v16 = vld [vmem:[#allocation11 + $0x4e0] ss:$28 sps:$4 sm:$0xff]  }
 0x329   :  { %5495 = vmatpush1.bf16.msra.mxu1 %v7131_v17  ;;  %v7200_v17 = vld [vmem:[#allocation11 + $0x860] ss:$28 sps:$4 sm:$0xff]  }
 0x32a   :  { %5536 = vmatpush1.bf16.msra.mxu0 %v7134_v18  ;;  %5496 = vmatprep.subr.bf16.mxu1 %v7139_v20  ;;  %v7205_v18 = vld [vmem:[#allocation11 + $0x4ac] ss:$28 sps:$4 sm:$0xff]  }
 0x32b   :  { %5537 = vmatprep.subr.bf16.mxu0 %v7142_v1  ;;  %v7208_v20 = vld [vmem:[#allocation11 + $0x82c] ss:$28 sps:$4 sm:$0xff]  }
 0x32d   :  { %5497 = vmatpush1.bf16.msra.mxu1 %v7137_v22  ;;  %v7203_v22 = vld [vmem:[#allocation11 + $0x4a8] ss:$28 sps:$4 sm:$0xff]  }
 0x32e   :  { %5538 = vmatpush1.bf16.msra.mxu0 %v7140_v23  ;;  %5498 = vmatprep.subr.bf16.mxu1 %v7145_v24  ;;  %v7206_v24 = vld [vmem:[#allocation11 + $0x828] ss:$28 sps:$4 sm:$0xff]  }
 0x32f   :  { %5539 = vmatprep.subr.bf16.mxu0 %v7148_v25  ;;  %v7211_v25 = vld [vmem:[#allocation11 + $0x474] ss:$28 sps:$4 sm:$0xff]  }
 0x331   :  { %5499 = vmatpush2.bf16.msra.mxu1 %v7143_v26  ;;  %v7214_v26 = vld [vmem:[#allocation11 + $0x7f4] ss:$28 sps:$4 sm:$0xff]  }
 0x332   :  { %5540 = vmatpush2.bf16.msra.mxu0 %v7146_v28  ;;  %5500 = vmatprep.subr.bf16.mxu1 %v7151_v29  ;;  %v7209_v28 = vld [vmem:[#allocation11 + $0x470] ss:$28 sps:$4 sm:$0xff]  }
 0x333   :  { %5541 = vmatprep.subr.bf16.mxu0 %v7154_v30  ;;  %v7212_v29 = vld [vmem:[#allocation11 + $0x7f0] ss:$28 sps:$4 sm:$0xff]   ;;  %v7217_v30 = vld [vmem:[#allocation11 + $0x43c] ss:$28 sps:$4 sm:$0xff]  }
 0x335   :  { %5501 = vmatpush2.bf16.msra.mxu1 %v7149_v31  ;;  %v7220_v31 = vld [vmem:[#allocation11 + $0x7bc] ss:$28 sps:$4 sm:$0xff]  }
 0x336   :  { %5542 = vmatpush2.bf16.msra.mxu0 %v7152_v32  ;;  %5502 = vmatprep.subr.bf16.mxu1 %v7157_v33  ;;  %v7215_v32 = vld [vmem:[#allocation11 + $0x438] ss:$28 sps:$4 sm:$0xff]  }
 0x337   :  { %5543 = vmatprep.subr.bf16.mxu0 %v7160_v34  ;;  %v7218_v33 = vld [vmem:[#allocation11 + $0x7b8] ss:$28 sps:$4 sm:$0xff]   ;;  %v7223_v34 = vld [vmem:[#allocation11 + $0x404] ss:$28 sps:$4 sm:$0xff]  }
 0x339   :  { %5503 = vmatpush2.bf16.msra.mxu1 %v7155_v35  ;;  %v7226_v35 = vld [vmem:[#allocation11 + $0x784] ss:$28 sps:$4 sm:$0xff]  }
 0x33a   :  { %5544 = vmatpush2.bf16.msra.mxu0 %v7158_v37  ;;  %5504 = vmatprep.subr.bf16.mxu1 %v7163_v39  ;;  %v7221_v37 = vld [vmem:[#allocation11 + $0x400] ss:$28 sps:$4 sm:$0xff]  }
 0x33b   :  { %5545 = vmatprep.subr.bf16.mxu0 %v7166_v40  ;;  %v7224_v39 = vld [vmem:[#allocation11 + $0x780] ss:$28 sps:$4 sm:$0xff]   ;;  %v7229_v40 = vld [vmem:[#allocation11 + $0x3cc] ss:$28 sps:$4 sm:$0xff]  }
 0x33d   :  { %5505 = vmatpush2.bf16.msra.mxu1 %v7161_v44  ;;  %v7232_v44 = vld [vmem:[#allocation11 + $0x74c] ss:$28 sps:$4 sm:$0xff]  }
 0x33e   :  { %5546 = vmatpush2.bf16.msra.mxu0 %v7164_v49  ;;  %5506 = vmatprep.subr.bf16.mxu1 %v7169_v51  ;;  %v7227_v49 = vld [vmem:[#allocation11 + $0x3c8] ss:$28 sps:$4 sm:$0xff]  }
 0x33f   :  { %5547 = vmatprep.subr.bf16.mxu0 %v7172_v52  ;;  %v7230_v51 = vld [vmem:[#allocation11 + $0x748] ss:$28 sps:$4 sm:$0xff]   ;;  %v7235_v52 = vld [vmem:[#allocation11 + $0x394] ss:$28 sps:$4 sm:$0xff]  }
 0x341   :  { %5507 = vmatpush2.bf16.msra.mxu1 %v7167_v45  ;;  %v7238_v45 = vld [vmem:[#allocation11 + $0x714] ss:$28 sps:$4 sm:$0xff]  }
 0x342   :  { %5548 = vmatpush2.bf16.msra.mxu0 %v7170_v47  ;;  %5508 = vmatprep.subr.bf16.mxu1 %v7175_v54  ;;  %v7233_v47 = vld [vmem:[#allocation11 + $0x390] ss:$28 sps:$4 sm:$0xff]  }
 0x343   :  { %5549 = vmatprep.subr.bf16.mxu0 %v7178_v55  ;;  %v7236_v54 = vld [vmem:[#allocation11 + $0x710] ss:$28 sps:$4 sm:$0xff]   ;;  %v7241_v55 = vld [vmem:[#allocation11 + $0x6dc] ss:$28 sps:$4 sm:$0xff]  }
 0x345   :  { %5509 = vmatpush2.bf16.msra.mxu1 %v7173_v57  ;;  %v7244_v57 = vld [vmem:[#allocation11 + $0xa5c] ss:$28 sps:$4 sm:$0xff]  }
 0x346   :  { %5550 = vmatpush2.bf16.msra.mxu0 %v7176_v58  ;;  %5510 = vmatprep.subr.bf16.mxu1 %v7181_v60  ;;  %v7239_v58 = vld [vmem:[#allocation11 + $0x6d8] ss:$28 sps:$4 sm:$0xff]  }
 0x347   :  { %5551 = vmatprep.subr.bf16.mxu0 %v7184_v61  ;;  %v7242_v60 = vld [vmem:[#allocation11 + $0xa58] ss:$28 sps:$4 sm:$0xff]   ;;  %v7247_v61 = vld [vmem:[#allocation11 + $0x6a4] ss:$28 sps:$4 sm:$0xff]  }
 0x349   :  { %5511 = vmatpush2.bf16.msra.mxu1 %v7179_v62  ;;  %v7250_v62 = vld [vmem:[#allocation11 + $0xa24] ss:$28 sps:$4 sm:$0xff]  }
 0x34a   :  { %5552 = vmatpush2.bf16.msra.mxu0 %v7182_v63  ;;  %5512 = vmatprep.subr.bf16.mxu1 %v7187_v2  ;;  %v7245_v63 = vld [vmem:[#allocation11 + $0x6a0] ss:$28 sps:$4 sm:$0xff]  }
 0x34b   :  { %5553 = vmatprep.subr.bf16.mxu0 %v7190_v3  ;;  %v7248_v2 = vld [vmem:[#allocation11 + $0xa20] ss:$28 sps:$4 sm:$0xff]   ;;  %v7253_v3 = vld [vmem:[#allocation11 + $0x66c] ss:$28 sps:$4 sm:$0xff]  }
 0x34d   :  { %5513 = vmatpush2.bf16.msra.mxu1 %v7185_v4  ;;  %v7256_v4 = vld [vmem:[#allocation11 + $0x9ec] ss:$28 sps:$4 sm:$0xff]  }
 0x34e   :  { %5554 = vmatpush2.bf16.msra.mxu0 %v7188_v5  ;;  %5564 = vmatprep.subr.bf16.mxu1 %v7193_v6  ;;  %v7251_v5 = vld [vmem:[#allocation11 + $0x668] ss:$28 sps:$4 sm:$0xff]  }
 0x34f   :  { %5605 = vmatprep.subr.bf16.mxu0 %v7196_v59  ;;  %v7254_v6 = vld [vmem:[#allocation11 + $0x9e8] ss:$28 sps:$4 sm:$0xff]   ;;  %v7259_v59 = vld [vmem:[#allocation11 + $0x634] ss:$28 sps:$4 sm:$0xff]  }
 0x350   :  { %5515 = vmatmul.mubr.bf16.vlgmr.msra.gmra.mxu1 %v7739_v15  ;;  %v7761_v11 = vpop.f32.mrf.mxu0 }
 0x351   :  { %5556 = vmatmul.mubr.bf16.vlgmr.msra.gmra.mxu0 %v7705_v21  ;;  %5565 = vmatpush1.bf16.msra.mxu1 %v7191_v10  ;;  %v7262_v10 = vld [vmem:[#allocation11 + $0x9b4] ss:$28 sps:$4 sm:$0xff]  }
 0x352   :  { %5596 = vmatprep.mubr.bf16.mxu1 %v7710_v42  ;;  %5606 = vmatpush1.bf16.msra.mxu0 %v7194_v8  ;;  %v7765_v0 = vpop.f32.mrf.mxu0  ;;  %v7257_v8 = vld [vmem:[#allocation11 + $0x630] ss:$28 sps:$4 sm:$0xff]  }
 0x353   :  { %5637 = vmatprep.mubr.bf16.mxu0 %v7724_v13  ;;  %5566 = vmatprep.subr.bf16.mxu1 %v7199_v12  ;;  %v7260_v12 = vld [vmem:[#allocation11 + $0x9b0] ss:$28 sps:$4 sm:$0xff]  }
 0x354   :  { %5607 = vmatprep.subr.bf16.mxu0 %v7202_v7  ;;  %v5315_v1 = vpop.f32.mrf.mxu0  ;;  %v7265_v7 = vld [vmem:[#allocation11 + $0x5fc] ss:$28 sps:$4 sm:$0xff]  }
 0x355   :  { %5567 = vmatpush1.bf16.msra.mxu1 %v7197_v16  ;;  %v7268_v16 = vld [vmem:[#allocation11 + $0x97c] ss:$28 sps:$4 sm:$0xff]   ;;  %v7274_v1 = vld [vmem:[#allocation11 + $0x944] ss:$28 sps:$4 sm:$0xff]  }
 0x356   :  { %5608 = vmatpush1.bf16.msra.mxu0 %v7200_v17  ;;  %v5316_v23 = vpop.f32.mrf.mxu0  ;;  %5568 = vmatprep.subr.bf16.mxu1 %v7205_v18  ;;  %v7263_v17 = vld [vmem:[#allocation11 + $0x5f8] ss:$28 sps:$4 sm:$0xff]  }
 0x357   :  { %5609 = vmatprep.subr.bf16.mxu0 %v7208_v20  ;;  %v7266_v18 = vld [vmem:[#allocation11 + $0x978] ss:$28 sps:$4 sm:$0xff]   ;;  %v7271_v20 = vld [vmem:[#allocation11 + $0x5c4] ss:$28 sps:$4 sm:$0xff]  }
 0x358   :  { %v7272_v23 = vld [vmem:[#allocation11 + $0x940] ss:$28 sps:$4 sm:$0xff]  }
 0x359   :  { %5569 = vmatpush1.bf16.msra.mxu1 %v7203_v22  ;;  %v7269_v22 = vld [vmem:[#allocation11 + $0x5c0] ss:$28 sps:$4 sm:$0xff]  }
 0x35a   :  { %5610 = vmatpush1.bf16.msra.mxu0 %v7206_v24  ;;  %5570 = vmatprep.subr.bf16.mxu1 %v7211_v25  ;;  %v7277_v24 = vld [vmem:[#allocation11 + $0x58c] ss:$28 sps:$4 sm:$0xff]  }
 0x35b   :  { %5611 = vmatprep.subr.bf16.mxu0 %v7214_v26  ;;  %v7280_v25 = vld [vmem:[#allocation11 + $0x90c] ss:$28 sps:$4 sm:$0xff]  }
 0x35c   :  { %v7275_v26 = vld [vmem:[#allocation11 + $0x588] ss:$28 sps:$4 sm:$0xff]  }
 0x35d   :  { %5571 = vmatpush1.bf16.msra.mxu1 %v7209_v28  ;;  %v7278_v28 = vld [vmem:[#allocation11 + $0x908] ss:$28 sps:$4 sm:$0xff]  }
 0x35e   :  { %5612 = vmatpush1.bf16.msra.mxu0 %v7212_v29  ;;  %5572 = vmatprep.subr.bf16.mxu1 %v7217_v30  ;;  %v7283_v29 = vld [vmem:[#allocation11 + $0x554] ss:$28 sps:$4 sm:$0xff]  }
 0x35f   :  { %5613 = vmatprep.subr.bf16.mxu0 %v7220_v31  ;;  %v7286_v30 = vld [vmem:[#allocation11 + $0x8d4] ss:$28 sps:$4 sm:$0xff]  }
 0x360   :  { %v7281_v31 = vld [vmem:[#allocation11 + $0x550] ss:$28 sps:$4 sm:$0xff]  }
 0x361   :  { %5573 = vmatpush1.bf16.msra.mxu1 %v7215_v32  ;;  %v7284_v32 = vld [vmem:[#allocation11 + $0x8d0] ss:$28 sps:$4 sm:$0xff]  }
 0x362   :  { %5614 = vmatpush1.bf16.msra.mxu0 %v7218_v33  ;;  %5574 = vmatprep.subr.bf16.mxu1 %v7223_v34  ;;  %v7289_v33 = vld [vmem:[#allocation11 + $0xc1c] ss:$28 sps:$4 sm:$0xff]  }
 0x363   :  { %5615 = vmatprep.subr.bf16.mxu0 %v7226_v35  ;;  %v7290_v34 = vld [vmem:[#allocation11 + $0x360] ss:$28 sps:$4 sm:$0xff]   ;;  %v7287_v35 = vld [vmem:[#allocation11 + $0xc18] ss:$28 sps:$4 sm:$0xff]  }
 0x365   :  { %5575 = vmatpush1.bf16.msra.mxu1 %v7221_v37  ;;  %v7291_v37 = vld [vmem:[#allocation11 + $0x1a0] ss:$28 sps:$4 sm:$0xff]  }
 0x366   :  { %5616 = vmatpush1.bf16.msra.mxu0 %v7224_v39  ;;  %5576 = vmatprep.subr.bf16.mxu1 %v7229_v40  ;;  %v5312_v39 = vadd.f32 %v7761_v11, %v7754_v53  ;;  %v7294_v40 = vld [vmem:[#allocation11 + $0xbe4] ss:$28 sps:$4 sm:$0xff]  }
 0x367   :  { %5617 = vmatprep.subr.bf16.mxu0 %v7232_v44 }
 0x369   :  { %5577 = vmatpush1.bf16.msra.mxu1 %v7227_v49 }
 0x36a   :  { %5618 = vmatpush1.bf16.msra.mxu0 %v7230_v51  ;;  %5578 = vmatprep.subr.bf16.mxu1 %v7235_v52  ;;  %v7295_v51 = vld [vmem:[#allocation11 + $0x328] ss:$28 sps:$4 sm:$0xff]   ;;  %v5314_v52 = vadd.f32 %v7765_v0, %v7758_v56 }
 0x36b   :  { %5619 = vmatprep.subr.bf16.mxu0 %v7238_v45 }
 0x36d   :  { %5579 = vmatpush1.bf16.msra.mxu1 %v7233_v47  ;;  %v7292_v47 = vld [vmem:[#allocation11 + $0xbe0] ss:$28 sps:$4 sm:$0xff]  }
 0x36e   :  { %5620 = vmatpush1.bf16.msra.mxu0 %v7236_v54  ;;  %5580 = vmatprep.subr.bf16.mxu1 %v7241_v55  ;;  %v7296_v54 = vld [vmem:[#allocation11 + $0x168] ss:$28 sps:$4 sm:$0xff]  }
 0x36f   :  { %5621 = vmatprep.subr.bf16.mxu0 %v7244_v57  ;;  %v7299_v55 = vld [vmem:[#allocation11 + $0xbac] ss:$28 sps:$4 sm:$0xff]  }
 0x371   :  { %5581 = vmatpush2.bf16.msra.mxu1 %v7239_v58  ;;  %v7300_v58 = vld [vmem:[#allocation11 + $0x2f0] ss:$28 sps:$4 sm:$0xff]  }
 0x372   :  { %5622 = vmatpush2.bf16.msra.mxu0 %v7242_v60  ;;  %5582 = vmatprep.subr.bf16.mxu1 %v7247_v61  ;;  %v7297_v60 = vld [vmem:[#allocation11 + $0xba8] ss:$28 sps:$4 sm:$0xff]  }
 0x373   :  { %5623 = vmatprep.subr.bf16.mxu0 %v7250_v62 }
 0x375   :  { %5583 = vmatpush2.bf16.msra.mxu1 %v7245_v63  ;;  %v7301_v63 = vld [vmem:[#allocation11 + $0x130] ss:$28 sps:$4 sm:$0xff]  }
 0x376   :  { %5624 = vmatpush2.bf16.msra.mxu0 %v7248_v2  ;;  %5584 = vmatprep.subr.bf16.mxu1 %v7253_v3  ;;  %v7304_v2 = vld [vmem:[#allocation11 + $0xb74] ss:$28 sps:$4 sm:$0xff]  }
 0x377   :  { %5625 = vmatprep.subr.bf16.mxu0 %v7256_v4  ;;  %v7305_v3 = vld [vmem:[#allocation11 + $0x2b8] ss:$28 sps:$4 sm:$0xff]   ;;  %v7302_v4 = vld [vmem:[#allocation11 + $0xb70] ss:$28 sps:$4 sm:$0xff]  }
 0x379   :  { %5585 = vmatpush2.bf16.msra.mxu1 %v7251_v5  ;;  %v7309_v5 = vld [vmem:[#allocation11 + $0xb3c] ss:$28 sps:$4 sm:$0xff]  }
 0x37a   :  { %5626 = vmatpush2.bf16.msra.mxu0 %v7254_v6  ;;  %5586 = vmatprep.subr.bf16.mxu1 %v7259_v59  ;;  %v7310_v6 = vld [vmem:[#allocation11 + $0x280] ss:$28 sps:$4 sm:$0xff]   ;;  %v7307_v59 = vld [vmem:[#allocation11 + $0xb38] ss:$28 sps:$4 sm:$0xff]  }
 0x37b   :  { %5627 = vmatprep.subr.bf16.mxu0 %v7262_v10  ;;  %v7311_v10 = vld [vmem:[#allocation11 + $0xc0] ss:$28 sps:$4 sm:$0xff]  }
 0x37d   :  { %5587 = vmatpush2.bf16.msra.mxu1 %v7257_v8  ;;  %v7314_v8 = vld [vmem:[#allocation11 + $0xb04] ss:$28 sps:$4 sm:$0xff]  }
 0x37e   :  { %5628 = vmatpush2.bf16.msra.mxu0 %v7260_v12  ;;  %5588 = vmatprep.subr.bf16.mxu1 %v7265_v7  ;;  %v7315_v12 = vld [vmem:[#allocation11 + $0x248] ss:$28 sps:$4 sm:$0xff]   ;;  %v7312_v7 = vld [vmem:[#allocation11 + $0xb00] ss:$28 sps:$4 sm:$0xff]  }
 0x37f   :  { %5629 = vmatprep.subr.bf16.mxu0 %v7268_v16  ;;  %v7316_v16 = vld [vmem:[#allocation11 + $0x88] ss:$28 sps:$4 sm:$0xff]  }
 0x381   :  { %5589 = vmatpush2.bf16.msra.mxu1 %v7263_v17  ;;  %v7319_v17 = vld [vmem:[#allocation11 + $0xacc] ss:$28 sps:$4 sm:$0xff]  }
 0x382   :  { %5630 = vmatpush2.bf16.msra.mxu0 %v7266_v18  ;;  %5590 = vmatprep.subr.bf16.mxu1 %v7271_v20  ;;  %v7320_v18 = vld [vmem:[#allocation11 + $0x210] ss:$28 sps:$4 sm:$0xff]   ;;  %v7317_v20 = vld [vmem:[#allocation11 + $0xac8] ss:$28 sps:$4 sm:$0xff]  }
 0x383   :  { %5631 = vmatprep.subr.bf16.mxu0 %v7274_v1  ;;  %v7321_v1 = vld [vmem:[#allocation11 + $0x50] ss:$28 sps:$4 sm:$0xff]  }
 0x385   :  { %5591 = vmatpush2.bf16.msra.mxu1 %v7269_v22  ;;  %v7324_v22 = vld [vmem:[#allocation11 + $0xa94] ss:$28 sps:$4 sm:$0xff]  }
 0x386   :  { %5632 = vmatpush2.bf16.msra.mxu0 %v7272_v23  ;;  %5592 = vmatprep.subr.bf16.mxu1 %v7277_v24  ;;  %v7325_v23 = vld [vmem:[#allocation11 + $0x1d8] ss:$28 sps:$4 sm:$0xff]   ;;  %v7322_v24 = vld [vmem:[#allocation11 + $0xa90] ss:$28 sps:$4 sm:$0xff]  }
 0x387   :  { %5633 = vmatprep.subr.bf16.mxu0 %v7280_v25  ;;  %v7326_v25 = vld [vmem:[#allocation11 + $0x18] ss:$28 sps:$4 sm:$0xff]  }
 0x389   :  { %5593 = vmatpush2.bf16.msra.mxu1 %v7275_v26  ;;  %v7329_v26 = vld [vmem:[#allocation11 + $0xddc] ss:$28 sps:$4 sm:$0xff]  }
 0x38a   :  { %5634 = vmatpush2.bf16.msra.mxu0 %v7278_v28  ;;  %5594 = vmatprep.subr.bf16.mxu1 %v7283_v29  ;;  %v7330_v28 = vld [vmem:[#allocation11 + $0xa60] ss:$28 sps:$4 sm:$0xff]   ;;  %v7327_v29 = vld [vmem:[#allocation11 + $0xdd8] ss:$28 sps:$4 sm:$0xff]  }
 0x38b   :  { %5635 = vmatprep.subr.bf16.mxu0 %v7286_v30  ;;  %v7331_v30 = vld [vmem:[#allocation11 + $0x8a0] ss:$28 sps:$4 sm:$0xff]  }
 0x38d   :  { %5595 = vmatpush2.bf16.msra.mxu1 %v7281_v31  ;;  %v7334_v31 = vld [vmem:[#allocation11 + $0xda4] ss:$28 sps:$4 sm:$0xff]  }
 0x38e   :  { %5636 = vmatpush2.bf16.msra.mxu0 %v7284_v32  ;;  %5646 = vmatprep.subr.bf16.mxu1 %v7289_v33  ;;  %v7335_v32 = vld [vmem:[#allocation11 + $0xa28] ss:$28 sps:$4 sm:$0xff]   ;;  %v7332_v33 = vld [vmem:[#allocation11 + $0xda0] ss:$28 sps:$4 sm:$0xff]  }
 0x38f   :  { %6608 = vmatprep.subr.bf16.mxu0 %v7290_v34  ;;  %v7336_v34 = vld [vmem:[#allocation11 + $0x868] ss:$28 sps:$4 sm:$0xff]  }
 0x390   :  { %v7770_v44 = vpop.f32.mrf.mxu0  ;;  %5597 = vmatmul.mubr.bf16.vlgmr.msra.gmra.mxu1 %v7712_v50  ;;  %v5352_v49 = vpop.f32.mrf.mxu1 }
 0x391   :  { %5638 = vmatmul.mubr.bf16.vlgmr.msra.gmra.mxu0 %v7726_v14  ;;  %v5353_v45 = vadd.f32 %v5352_v49, %v5312_v39  ;;  %5647 = vmatpush1.bf16.msra.mxu1 %v7287_v35  ;;  %v7339_v35 = vld [vmem:[#allocation11 + $0xd6c] ss:$28 sps:$4 sm:$0xff]   ;;  %v7344_v49 = vld [vmem:[#allocation11 + $0xd34] ss:$28 sps:$4 sm:$0xff]  }
 0x392   :  { %5678 = vmatprep.mubr.bf16.mxu1 %v7737_v9  ;;  %6609 = vmatpush3.bf16.msra.mxu0 %v7291_v37  ;;  %v7777_v53 = vpop.f32.mrf.mxu0  ;;  %v5354_v11 = vpop.f32.mrf.mxu1  ;;  %v7340_v37 = vld [vmem:[#allocation11 + $0x9f0] ss:$28 sps:$4 sm:$0xff]   ;;  %v7337_v39 = vld [vmem:[#allocation11 + $0xd68] ss:$28 sps:$4 sm:$0xff]  }
 0x393   :  { %5847 = vst [vmem:[#allocation14] sm:$0xff] %v5353_v45  ;;  %5719 = vmatprep.mubr.bf16.mxu0 %v7696_v19  ;;  %v5355_v57 = vadd.f32 %v5354_v11, %v5314_v52  ;;  %5648 = vmatprep.subr.bf16.mxu1 %v7294_v40  ;;  %v7306_v19 = vld [vmem:[#allocation11 + $0xf8] ss:$28 sps:$4 sm:$0xff]   ;;  %v7341_v40 = vld [vmem:[#allocation11 + $0x830] ss:$28 sps:$4 sm:$0xff]  }
 0x394   :  { %v5397_v56 = vpop.f32.mrf.mxu0  ;;  %6610 = vmatprep.subr.bf16.mxu0 %v7295_v51  ;;  %v5356_v0 = vpop.f32.mrf.mxu1  ;;  %v7345_v51 = vld [vmem:[#allocation11 + $0x9b8] ss:$28 sps:$4 sm:$0xff]   ;;  %v7351_v11 = vld [vmem:[#allocation11 + $0x7c0] ss:$28 sps:$4 sm:$0xff]  }
 0x395   :  { %5848 = vst [vmem:[#allocation14 + $0x8] sm:$0xff] %v5355_v57  ;;  %5649 = vmatpush1.bf16.msra.mxu1 %v7292_v47  ;;  %v7346_v52 = vld [vmem:[#allocation11 + $0x7f8] ss:$28 sps:$4 sm:$0xff]   ;;  %v7352_v57 = vld [vmem:[#allocation11 + $0xcc0] ss:$28 sps:$4 sm:$0xff]  }
 0x396   :  { %6611 = vmatpush3.bf16.msra.mxu0 %v7296_v54  ;;  %v5398_v61 = vpop.f32.mrf.mxu0  ;;  %v5357_v62 = vpop.f32.mrf.mxu1  ;;  %5650 = vmatprep.subr.bf16.mxu1 %v7299_v55  ;;  %v7349_v45 = vld [vmem:[#allocation11 + $0xcfc] ss:$28 sps:$4 sm:$0xff]   ;;  %v7354_v54 = vld [vmem:[#allocation11 + $0xcc4] ss:$28 sps:$4 sm:$0xff]   ;;  %v7359_v56 = vld [vmem:[#allocation11 + $0xc8c] ss:$28 sps:$4 sm:$0xff]  }
 0x397   :  { %6612 = vmatprep.subr.bf16.mxu0 %v7300_v58  ;;  %v7347_v47 = vld [vmem:[#allocation11 + $0xcf8] ss:$28 sps:$4 sm:$0xff]   ;;  %v7355_v55 = vld [vmem:[#allocation11 + $0x948] ss:$28 sps:$4 sm:$0xff]   ;;  %v7360_v0 = vld [vmem:[#allocation11 + $0x910] ss:$28 sps:$4 sm:$0xff]  }
 0x398   :  { %v7356_v58 = vld [vmem:[#allocation11 + $0x788] ss:$28 sps:$4 sm:$0xff]   ;;  %v7361_v61 = vld [vmem:[#allocation11 + $0x750] ss:$28 sps:$4 sm:$0xff]  }
 0x399   :  { %5651 = vmatpush1.bf16.msra.mxu1 %v7297_v60  ;;  %v7357_v60 = vld [vmem:[#allocation11 + $0xc88] ss:$28 sps:$4 sm:$0xff]   ;;  %v7364_v62 = vld [vmem:[#allocation11 + $0xc54] ss:$28 sps:$4 sm:$0xff]  }
 0x39a   :  { %6613 = vmatpush3.bf16.msra.mxu0 %v7301_v63  ;;  %5652 = vmatprep.subr.bf16.mxu1 %v7304_v2  ;;  %v7365_v63 = vld [vmem:[#allocation11 + $0x8d8] ss:$28 sps:$4 sm:$0xff]   ;;  %v7362_v2 = vld [vmem:[#allocation11 + $0xc50] ss:$28 sps:$4 sm:$0xff]  }
 0x39b   :  { %6614 = vmatprep.subr.bf16.mxu0 %v7305_v3  ;;  %v7366_v3 = vld [vmem:[#allocation11 + $0x718] ss:$28 sps:$4 sm:$0xff]  }
 0x39d   :  { %5653 = vmatpush1.bf16.msra.mxu1 %v7302_v4  ;;  %v7367_v4 = vld [vmem:[#allocation11 + $0x6e0] ss:$28 sps:$4 sm:$0xff]  }
 0x39e   :  { %6615 = vmatpush3.bf16.msra.mxu0 %v7306_v19  ;;  %5654 = vmatprep.subr.bf16.mxu1 %v7309_v5  ;;  %v7368_v19 = vld [vmem:[#allocation11 + $0x520] ss:$28 sps:$4 sm:$0xff]   ;;  %v7369_v5 = vld [vmem:[#allocation11 + $0x6a8] ss:$28 sps:$4 sm:$0xff]  }
 0x39f   :  { %6616 = vmatprep.subr.bf16.mxu0 %v7310_v6 }
 0x3a1   :  { %5655 = vmatpush1.bf16.msra.mxu1 %v7307_v59 }
 0x3a2   :  { %6617 = vmatpush3.bf16.msra.mxu0 %v7311_v10  ;;  %5656 = vmatprep.subr.bf16.mxu1 %v7314_v8  ;;  %v7370_v10 = vld [vmem:[#allocation11 + $0x4e8] ss:$28 sps:$4 sm:$0xff]  }
 0x3a3   :  { %6618 = vmatprep.subr.bf16.mxu0 %v7315_v12 }
 0x3a5   :  { %5657 = vmatpush1.bf16.msra.mxu1 %v7312_v7  ;;  %v7371_v7 = vld [vmem:[#allocation11 + $0x670] ss:$28 sps:$4 sm:$0xff]  }
 0x3a6   :  { %6619 = vmatpush3.bf16.msra.mxu0 %v7316_v16  ;;  %5658 = vmatprep.subr.bf16.mxu1 %v7319_v17 }
 0x3a7   :  { %6620 = vmatprep.subr.bf16.mxu0 %v7320_v18  ;;  %v7372_v18 = vld [vmem:[#allocation11 + $0x4b0] ss:$28 sps:$4 sm:$0xff]  }
 0x3a9   :  { %5659 = vmatpush1.bf16.msra.mxu1 %v7317_v20 }
 0x3aa   :  { %6621 = vmatpush3.bf16.msra.mxu0 %v7321_v1  ;;  %5660 = vmatprep.subr.bf16.mxu1 %v7324_v22  ;;  %v7373_v22 = vld [vmem:[#allocation11 + $0x638] ss:$28 sps:$4 sm:$0xff]  }
 0x3ab   :  { %6622 = vmatprep.subr.bf16.mxu0 %v7325_v23  ;;  %v7375_v23 = vld [vmem:[#allocation11 + $0x600] ss:$28 sps:$4 sm:$0xff]  }
 0x3ad   :  { %5661 = vmatpush1.bf16.msra.mxu1 %v7322_v24  ;;  %v7377_v24 = vld [vmem:[#allocation11 + $0x5c8] ss:$28 sps:$4 sm:$0xff]  }
 0x3ae   :  { %6623 = vmatpush3.bf16.msra.mxu0 %v7326_v25  ;;  %5662 = vmatprep.subr.bf16.mxu1 %v7329_v26  ;;  %v7378_v25 = vld [vmem:[#allocation11 + $0x408] ss:$28 sps:$4 sm:$0xff]   ;;  %v7379_v26 = vld [vmem:[#allocation11 + $0x590] ss:$28 sps:$4 sm:$0xff]  }
 0x3af   :  { %6652 = vmatprep.subr.bf16.mxu0 %v7330_v28  ;;  %v7380_v28 = vld [vmem:[#allocation11 + $0x3d0] ss:$28 sps:$4 sm:$0xff]  }
 0x3b1   :  { %5720 = vmatmul.mubr.bf16.vlgmr.msra.gmra.mxu0 %v7705_v21  ;;  %5663 = vmatpush2.bf16.msra.mxu1 %v7327_v29  ;;  %v7342_v21 = vld [vmem:[#allocation11 + $0xd30] ss:$28 sps:$4 sm:$0xff]   ;;  %v7381_v29 = vld [vmem:[#allocation11 + $0x558] ss:$28 sps:$4 sm:$0xff]  }
 0x3b2   :  { %6653 = vmatpush3.bf16.msra.mxu0 %v7331_v30  ;;  %5799 = vmatprep.mubr.bf16.mxu0 %v7724_v13  ;;  %v7350_v13 = vld [vmem:[#allocation11 + $0x980] ss:$28 sps:$4 sm:$0xff]   ;;  %v7382_v30 = vld [vmem:[#allocation11 + $0x398] ss:$28 sps:$4 sm:$0xff]  }
 0x3b3   :  { %5664 = vmatprep.subr.bf16.mxu1 %v7334_v31  ;;  %6654 = vmatprep.subr.bf16.mxu0 %v7335_v32  ;;  %v7383_v31 = vld [vmem:[#allocation11 + $0xde0] ss:$28 sps:$4 sm:$0xff]  }
 0x3b4   :  { %v7384_v32 = vld [vmem:[#allocation11 + $0xc20] ss:$28 sps:$4 sm:$0xff]  }
 0x3b5   :  { %5665 = vmatpush2.bf16.msra.mxu1 %v7332_v33  ;;  %v7385_v33 = vld [vmem:[#allocation11 + $0xda8] ss:$28 sps:$4 sm:$0xff]  }
 0x3b6   :  { %6655 = vmatpush3.bf16.msra.mxu0 %v7336_v34  ;;  %5666 = vmatprep.subr.bf16.mxu1 %v7339_v35  ;;  %v7386_v34 = vld [vmem:[#allocation11 + $0xbe8] ss:$28 sps:$4 sm:$0xff]   ;;  %v7387_v35 = vld [vmem:[#allocation11 + $0xd70] ss:$28 sps:$4 sm:$0xff]  }
 0x3b7   :  { %6656 = vmatprep.subr.bf16.mxu0 %v7340_v37  ;;  %v7388_v37 = vld [vmem:[#allocation11 + $0xbb0] ss:$28 sps:$4 sm:$0xff]  }
 0x3b9   :  { %5667 = vmatpush2.bf16.msra.mxu1 %v7337_v39  ;;  %v7389_v39 = vld [vmem:[#allocation11 + $0xd38] ss:$28 sps:$4 sm:$0xff]  }
 0x3ba   :  { %6657 = vmatpush3.bf16.msra.mxu0 %v7341_v40  ;;  %5668 = vmatprep.subr.bf16.mxu1 %v7344_v49  ;;  %v7390_v40 = vld [vmem:[#allocation11 + $0xb78] ss:$28 sps:$4 sm:$0xff]   ;;  %v7391_v49 = vld [vmem:[#allocation11 + $0xd00] ss:$28 sps:$4 sm:$0xff]  }
 0x3bb   :  { %6658 = vmatprep.subr.bf16.mxu0 %v7345_v51  ;;  %v7392_v51 = vld [vmem:[#allocation11 + $0xb40] ss:$28 sps:$4 sm:$0xff]  }
 0x3bd   :  { %5669 = vmatpush2.bf16.msra.mxu1 %v7342_v21  ;;  %v7393_v21 = vld [vmem:[#allocation11 + $0xcc8] ss:$28 sps:$4 sm:$0xff]  }
 0x3be   :  { %6659 = vmatpush3.bf16.msra.mxu0 %v7346_v52  ;;  %5670 = vmatprep.subr.bf16.mxu1 %v7349_v45  ;;  %v7395_v52 = vld [vmem:[#allocation11 + $0xc90] ss:$28 sps:$4 sm:$0xff]  }
 0x3bf   :  { %6660 = vmatprep.subr.bf16.mxu0 %v7350_v13  ;;  %v7396_v45 = vld [vmem:[#allocation11 + $0xad0] ss:$28 sps:$4 sm:$0xff]   ;;  %v7397_v13 = vld [vmem:[#allocation11 + $0xc58] ss:$28 sps:$4 sm:$0xff]  }
 0x3c1   :  { %5671 = vmatpush2.bf16.msra.mxu1 %v7347_v47  ;;  %v2871_v47 = vrot.slane %v7746_v27, %v7658_v48 }
 0x3c2   :  { %6661 = vmatpush3.bf16.msra.mxu0 %v7351_v11  ;;  %5672 = vmatprep.subr.bf16.mxu1 %v7354_v54  ;;  %v7398_v54 = vld [vmem:[#allocation11 + $0xa98] ss:$28 sps:$4 sm:$0xff]  }
 0x3c3   :  { %6662 = vmatprep.subr.bf16.mxu0 %v7355_v55  ;;  %v5396_v55 = vadd.f32 %v7777_v53, %v2871_v47 }
 0x3c5   :  { %5673 = vmatpush2.bf16.msra.mxu1 %v7352_v57 }
 0x3c6   :  { %6663 = vmatpush3.bf16.msra.mxu0 %v7356_v58  ;;  %5674 = vmatprep.subr.bf16.mxu1 %v7359_v56 }
 0x3c7   :  { %6664 = vmatprep.subr.bf16.mxu0 %v7360_v0 }
 0x3c9   :  { %5675 = vmatpush2.bf16.msra.mxu1 %v7357_v60 }
 0x3ca   :  { %6665 = vmatpush3.bf16.msra.mxu0 %v7361_v61  ;;  %5676 = vmatprep.subr.bf16.mxu1 %v7364_v62 }
 0x3cb   :  { %6666 = vmatprep.subr.bf16.mxu0 %v7365_v63 }
 0x3cd   :  { %5677 = vmatpush2.bf16.msra.mxu1 %v7362_v2 }
 0x3ce   :  { %6667 = vmatpush3.bf16.msra.mxu0 %v7366_v3  ;;  %6630 = vmatprep.subr.bf16.mxu1 %v7367_v4 }
 0x3d0   :  { %v7782_v6 = vpop.f32.mrf.mxu1  ;;  %v7784_v59 = vpop.f32.mrf.mxu0  ;;  %5679 = vmatmul.mubr.bf16.vlgmr.msra.gmra.mxu1 %v7739_v15 }
 0x3d1   :  { %5800 = vmatmul.mubr.bf16.vlgmr.msra.gmra.mxu0 %v7726_v14  ;;  %6631 = vmatpush3.bf16.msra.mxu1 %v7368_v19  ;;  %v7374_v14 = vld [vmem:[#allocation11 + $0x478] ss:$28 sps:$4 sm:$0xff]  }
 0x3d2   :  { %5759 = vmatprep.mubr.bf16.mxu1 %v7710_v42  ;;  %v7789_v8 = vpop.f32.mrf.mxu1  ;;  %v7791_v12 = vpop.f32.mrf.mxu0  ;;  %6632 = vmatprep.subr.bf16.mxu1 %v7369_v5  ;;  %v7376_v42 = vld [vmem:[#allocation11 + $0x440] ss:$28 sps:$4 sm:$0xff]  }
 0x3d3   :  { %v5437_v58 = vadd.f32 %v7789_v8, %v5396_v55 }
 0x3d4   :  { %v5438_v16 = vpop.f32.mrf.mxu1  ;;  %v5479_v17 = vpop.f32.mrf.mxu0 }
 0x3d5   :  { %6633 = vmatpush3.bf16.msra.mxu1 %v7370_v10  ;;  %v5478_v0 = vadd.f32 %v7791_v12, %v5437_v58 }
 0x3d6   :  { %v5439_v20 = vpop.f32.mrf.mxu1  ;;  %v5480_v1 = vpop.f32.mrf.mxu0  ;;  %6634 = vmatprep.subr.bf16.mxu1 %v7371_v7 }
 0x3d9   :  { %6635 = vmatpush3.bf16.msra.mxu1 %v7372_v18  ;;  %v7399_v18 = vld [vmem:[#allocation13] sm:$0xff] }
 0x3da   :  { %6636 = vmatprep.subr.bf16.mxu1 %v7373_v22  ;;  %v2875_v20 = vrot.slane %v7399_v18, %v696_v36  ;;  %v2879_v1 = vrot.slane %v7399_v18, %v700_v41 }
 0x3dd   :  { %6637 = vmatpush3.bf16.msra.mxu1 %v7374_v14 }
 0x3de   :  { %6638 = vmatprep.subr.bf16.mxu1 %v7375_v23 }
 0x3e1   :  { %6639 = vmatpush3.bf16.msra.mxu1 %v7376_v42 }
 0x3e2   :  { %6640 = vmatprep.subr.bf16.mxu1 %v7377_v24 }
 0x3e5   :  { %6641 = vmatpush3.bf16.msra.mxu1 %v7378_v25 }
 0x3e6   :  { %6642 = vmatprep.subr.bf16.mxu1 %v7379_v26 }
 0x3e9   :  { %6643 = vmatpush3.bf16.msra.mxu1 %v7380_v28 }
 0x3ea   :  { %6644 = vmatprep.subr.bf16.mxu1 %v7381_v29 }
 0x3ed   :  { %6645 = vmatpush3.bf16.msra.mxu1 %v7382_v30 }
 0x3ee   :  { %6674 = vmatprep.subr.bf16.mxu1 %v7383_v31 }
 0x3f0   :  { %5760 = vmatmul.mubr.bf16.vlgmr.msra.gmra.mxu1 %v7712_v50  ;;  %v7394_v50 = vld [vmem:[#allocation11 + $0xb08] ss:$28 sps:$4 sm:$0xff]  }
 0x3f1   :  { %6675 = vmatpush3.bf16.msra.mxu1 %v7384_v32  ;;  %5839 = vmatprep.mubr.bf16.mxu1 %v7737_v9  ;;  %v2867_v9 = vrot.slane %v7746_v27, %v7652_v46 }
 0x3f2   :  { %6676 = vmatprep.subr.bf16.mxu1 %v7385_v33 }
 0x3f3   :  { %v5394_v11 = vadd.f32 %v7770_v44, %v2867_v9 }
 0x3f5   :  { %6677 = vmatpush3.bf16.msra.mxu1 %v7386_v34  ;;  %v5435_v57 = vadd.f32 %v7782_v6, %v5394_v11 }
 0x3f6   :  { %6678 = vmatprep.subr.bf16.mxu1 %v7387_v35 }
 0x3f7   :  { %v5476_v46 = vadd.f32 %v7784_v59, %v5435_v57 }
 0x3f9   :  { %6679 = vmatpush3.bf16.msra.mxu1 %v7388_v37 }
 0x3fa   :  { %6680 = vmatprep.subr.bf16.mxu1 %v7389_v39 }
 0x3fd   :  { %6681 = vmatpush3.bf16.msra.mxu1 %v7390_v40 }
 0x3fe   :  { %6682 = vmatprep.subr.bf16.mxu1 %v7391_v49  ;;  %v2883_v49 = vrot.slane %v7399_v18, %v704_v38 }
 0x401   :  { %6683 = vmatpush3.bf16.msra.mxu1 %v7392_v51 }
 0x402   :  { %6684 = vmatprep.subr.bf16.mxu1 %v7393_v21 }
 0x405   :  { %6685 = vmatpush3.bf16.msra.mxu1 %v7394_v50 }
 0x406   :  { %6686 = vmatprep.subr.bf16.mxu1 %v7395_v52 }
 0x409   :  { %6687 = vmatpush3.bf16.msra.mxu1 %v7396_v45 }
 0x40a   :  { %6688 = vmatprep.subr.bf16.mxu1 %v7397_v13 }
 0x40d   :  { %6689 = vmatpush3.bf16.msra.mxu1 %v7398_v54 }
 0x410   :  { %v5516_v56 = vpop.f32.mrf.mxu1  ;;  %5840 = vmatmul.mubr.bf16.vlgmr.msra.gmra.mxu1 %v7739_v15 }
 0x411   :  { %v5517_v48 = vadd.f32 %v5516_v56, %v5476_v46  ;;  %v5557_v27 = vpop.f32.mrf.mxu0 }
 0x412   :  { %v5518_v44 = vpop.f32.mrf.mxu1  ;;  %v5558_v22 = vadd.f32 %v5557_v27, %v2875_v20 }
 0x413   :  { %5849 = vst [vmem:[#allocation14 + $0x10] sm:$0xff] %v5517_v48  ;;  %v5519_v60 = vadd.f32 %v5518_v44, %v5478_v0  ;;  %v5559_v61 = vpop.f32.mrf.mxu0 }
 0x414   :  { %v5520_v62 = vpop.f32.mrf.mxu1  ;;  %v5560_v14 = vadd.f32 %v5559_v61, %v2879_v1 }
 0x415   :  { %5850 = vst [vmem:[#allocation14 + $0x18] sm:$0xff] %v5519_v60  ;;  %v5561_v53 = vpop.f32.mrf.mxu0 }
 0x416   :  { %v5521_v63 = vpop.f32.mrf.mxu1 }
 0x417   :  { %v5562_v2 = vpop.f32.mrf.mxu0 }
 0x450   :  { %v5598_v3 = vpop.f32.mrf.mxu1 }
 0x451   :  { %v5639_v4 = vpop.f32.mrf.mxu0  ;;  %v5599_v23 = vadd.f32 %v5598_v3, %v5558_v22 }
 0x452   :  { %v5600_v19 = vpop.f32.mrf.mxu1 }
 0x453   :  { %v5641_v5 = vpop.f32.mrf.mxu0  ;;  %v5601_v42 = vadd.f32 %v5600_v19, %v5560_v14  ;;  %v5640_v24 = vadd.f32 %v5639_v4, %v5599_v23 }
 0x454   :  { %v5602_v6 = vpop.f32.mrf.mxu1 }
 0x455   :  { %v5643_v59 = vpop.f32.mrf.mxu0  ;;  %v5642_v26 = vadd.f32 %v5641_v5, %v5601_v42 }
 0x456   :  { %v5603_v15 = vpop.f32.mrf.mxu1 }
 0x457   :  { %v5644_v10 = vpop.f32.mrf.mxu0 }
 0x471   :  { %v6624_v8 = vpop.f32.mrf.mxu0 }
 0x473   :  { %v6625_v12 = vpop.f32.mrf.mxu0 }
 0x474   :  { %v6626_v7 = vadd.f32 %v6625_v12, %v6624_v8 }
 0x475   :  { %v6627_v16 = vpop.f32.mrf.mxu0 }
 0x476   :  { %v5722_v21 = vadd.f32 %v6626_v7, %v2883_v49 }
 0x477   :  { %v6628_v17 = vpop.f32.mrf.mxu0 }
 0x490   :  { %v5680_v25 = vpop.f32.mrf.mxu1 }
 0x491   :  { %v5681_v28 = vadd.f32 %v5680_v25, %v5640_v24  ;;  %v6668_v29 = vpop.f32.mrf.mxu0 }
 0x492   :  { %v5682_v30 = vpop.f32.mrf.mxu1 }
 0x493   :  { %5851 = vst [vmem:[#allocation14 + $0x20] sm:$0xff] %v5681_v28  ;;  %v5683_v31 = vadd.f32 %v5682_v30, %v5642_v26  ;;  %v6669_v32 = vpop.f32.mrf.mxu0 }
 0x494   :  { %v5684_v33 = vpop.f32.mrf.mxu1  ;;  %v6670_v9 = vadd.f32 %v6669_v32, %v6668_v29 }
 0x495   :  { %5852 = vst [vmem:[#allocation14 + $0x28] sm:$0xff] %v5683_v31  ;;  %v6671_v34 = vpop.f32.mrf.mxu0 }
 0x496   :  { %v5685_v36 = vpop.f32.mrf.mxu1 }
 0x497   :  { %v6672_v35 = vpop.f32.mrf.mxu0 }
 0x4b0   :  { %v6646_v37 = vpop.f32.mrf.mxu1 }
 0x4b2   :  { %v6647_v41 = vpop.f32.mrf.mxu1 }
 0x4b3   :  { %v6648_v51 = vadd.f32 %v6647_v41, %v6646_v37 }
 0x4b4   :  { %v6649_v39 = vpop.f32.mrf.mxu1 }
 0x4b5   :  { %v5762_v50 = vadd.f32 %v6648_v51, %v5722_v21 }
 0x4b6   :  { %v6650_v40 = vpop.f32.mrf.mxu1 }
 0x4b7   :  { %v5802_v13 = vadd.f32 %v6670_v9, %v5762_v50 }
 0x4d0   :  { %v6690_v52 = vpop.f32.mrf.mxu1 }
 0x4d2   :  { %v6691_v45 = vpop.f32.mrf.mxu1 }
 0x4d3   :  { %v6692_v47 = vadd.f32 %v6691_v45, %v6690_v52 }
 0x4d4   :  { %v6693_v11 = vpop.f32.mrf.mxu1 }
 0x4d5   :  { %v5842_v54 = vadd.f32 %v6692_v47, %v5802_v13 }
 0x4d6   :  { %v6694_v55 = vpop.f32.mrf.mxu1 }
 0x4d7   :  { %5853 = vst [vmem:[#allocation14 + $0x30] sm:$0xff] %v5842_v54 }
 0x4d8   :  { %7551 = shalt.err (!%p7548_p11)
}
 0x4d9   :  { %5863 = dma.vmem_to_hbm [thread:$0]  %s5861_s6, 896, %s7822_s7, [#allocation4]  }
 0x4da   :  { %7568 = dma.done.wait [#allocation4], 896  }
 0x4db   :  { %7569 = vsyncadd [#allocation4], 4294966400 }
 0x4dc   :  { %5867 = vsyncpa [#allocation3], 1 }
 0x4dd   :  { %5868 = vsyncpa [#allocation6], 1 }
 0x4de   :  { %5869 = vsyncpa [#allocation9], 1 }
 0x4df   :  { %5870 = vsyncpa [#allocation12], 1 }
 0x4e0   :  { %5871 = vsyncpa [#allocation4], 1 }

</bundles_post_ra>
